<compile_context>
chip_gen: v7x
topology: tpu7x:2x2x1
jax: 0.10.0
libtpu: 0.0.40
codegen_flags: <defaults>
</compile_context>

<pallas_src>
import jax
import jax.numpy as jnp
from jax.experimental import pallas as pl
from jax.experimental.pallas import tpu as pltpu

EMBED_DIM = 320
EXPANDED_DIM = 512
NUM_CLASSES = (6, 5, 3)          # daily, gender, embel
NUM_TASKS = 3
OUT_WIDTH = 128                  # single lane-dense 128-wide logits slab for ALL tasks
COL_OFFSETS = (0, 8, 16)         # per-task column offsets inside the 128-lane slab
BN_EPS = 1e-5                    # PyTorch BatchNorm1d default eps
SQRT_HALF = 0.7071067811865476
BATCH_TILE = 128                 # rows per grid step on the large-batch path


def _gelu_exact(h):
    """Exact erf GELU (matches nn.GELU() default), computed in f32."""
    return 0.5 * h * (1.0 + jax.lax.erf(h * jnp.float32(SQRT_HALF)))


# ----------------------------- kernels ---------------------------------------

def _heads_kernel_small(x_ref, w1_ref, b1_ref, w2_hbm_ref, b2_ref, out_ref,
                        w2_vmem, w2_sem):
    """Gridless small-batch path: W2's HBM->VMEM DMA overlapped with matmul-1 + GELU."""
    # Start the W2 copy immediately; it completes while the MXU pushes W1.
    cp = pltpu.make_async_copy(w2_hbm_ref, w2_vmem, w2_sem)
    cp.start()

    x = x_ref[...].astype(jnp.bfloat16)
    # Linear(320 -> 6*512) with inference BatchNorm folded in; f32 MXU accumulation.
    h = jnp.dot(x, w1_ref[...], preferred_element_type=jnp.float32) + b1_ref[...]
    h = _gelu_exact(h)
    # Dropout(p=0.01) is identity at inference.
    # TODO(synk): train-mode Dropout and batch-statistics BatchNorm not implemented.

    cp.wait()
    # Block-structured Linear(6*512 -> 128) with the 0.5 distillation average folded in.
    out_ref[...] = jnp.dot(h.astype(jnp.bfloat16), w2_vmem[...],
                           preferred_element_type=jnp.float32) + b2_ref[...]


def _heads_kernel_grid(x_ref, w1_ref, b1_ref, w2_ref, b2_ref, out_ref):
    """Batch-gridded path: weights stay VMEM-resident across grid steps."""
    x = x_ref[...].astype(jnp.bfloat16)
    h = jnp.dot(x, w1_ref[...], preferred_element_type=jnp.float32) + b1_ref[...]
    h = _gelu_exact(h)
    out_ref[...] = jnp.dot(h.astype(jnp.bfloat16), w2_ref[...],
                           preferred_element_type=jnp.float32) + b2_ref[...]


# ----------------------------- wrapper ---------------------------------------

def fused_heads_forward(feat, packed, *, batch_tile=BATCH_TILE):
    """All six heads in one pallas_call; per-task logits sliced out of the 128-lane slab."""
    batch = feat.shape[0]
    hidden_total = packed["w1"].shape[1]              # 6 * 512

    # Pad the batch to a multiple of 8 (sublane alignment).
    pad8 = (-batch) % 8
    feat_p = jnp.pad(feat, ((0, pad8), (0, 0))) if pad8 else feat
    padded = feat_p.shape[0]

    if padded <= batch_tile:
        # Gridless: whole problem resident in VMEM; W2 DMA hidden under matmul-1.
        vmem = pl.BlockSpec(memory_space=pltpu.MemorySpace.VMEM)
        out = pl.pallas_call(
            _heads_kernel_small,
            out_shape=jax.ShapeDtypeStruct((padded, OUT_WIDTH), jnp.float32),
            in_specs=[vmem, vmem, vmem,
                      pl.BlockSpec(memory_space=pl.ANY),   # W2 stays in HBM; manual DMA
                      vmem],
            out_specs=vmem,
            scratch_shapes=[pltpu.VMEM((hidden_total, OUT_WIDTH), jnp.bfloat16),
                            pltpu.SemaphoreType.DMA(())],
        )(feat_p, packed["w1"], packed["b1"], packed["w2"], packed["b2"])
    else:
        # Batch grid: amortize weight DMAs / MXU weight pushes over many rows and
        # let v7x shard grid steps across both TensorCores.
        padT = (-padded) % batch_tile
        if padT:
            feat_p = jnp.pad(feat_p, ((0, padT), (0, 0)))
        padded = feat_p.shape[0]
        nb = padded // batch_tile
        out = pl.pallas_call(
            _heads_kernel_grid,
            out_shape=jax.ShapeDtypeStruct((padded, OUT_WIDTH), jnp.float32),
            grid_spec=pltpu.PrefetchScalarGridSpec(
                num_scalar_prefetch=0,
                grid=(nb,),
                in_specs=[
                    pl.BlockSpec((batch_tile, EMBED_DIM), lambda i: (i, 0)),
                    pl.BlockSpec((EMBED_DIM, hidden_total), lambda i: (0, 0)),
                    pl.BlockSpec((1, hidden_total), lambda i: (0, 0)),
                    pl.BlockSpec((hidden_total, OUT_WIDTH), lambda i: (0, 0)),
                    pl.BlockSpec((1, OUT_WIDTH), lambda i: (0, 0)),
                ],
                out_specs=pl.BlockSpec((batch_tile, OUT_WIDTH), lambda i: (i, 0)),
            ),
            compiler_params=pltpu.CompilerParams(
                dimension_semantics=("parallel",)),
        )(feat_p, packed["w1"], packed["b1"], packed["w2"], packed["b2"])

    return tuple(out[:batch, COL_OFFSETS[t]:COL_OFFSETS[t] + NUM_CLASSES[t]]
                 for t in range(NUM_TASKS))


# --------------------------- parameter prep ----------------------------------

def init_mlp_classifier(key, in_dim, hidden_dim, out_dim):
    """PyTorch-default Linear init; BN params/stats randomized to exercise the fold."""
    k1, k2, k3, k4, k5, k6, k7, k8 = jax.random.split(key, 8)
    bound1 = 1.0 / float(in_dim) ** 0.5
    bound2 = 1.0 / float(hidden_dim) ** 0.5
    return dict(
        w1=jax.random.uniform(k1, (in_dim, hidden_dim), jnp.float32, -bound1, bound1),
        b1=jax.random.uniform(k2, (1, hidden_dim), jnp.float32, -bound1, bound1),
        # Simulated trained BatchNorm affine params + running stats.
        gamma=jax.random.uniform(k5, (1, hidden_dim), jnp.float32, 0.5, 1.5),
        beta=0.1 * jax.random.normal(k6, (1, hidden_dim), jnp.float32),
        mean=0.1 * jax.random.normal(k7, (1, hidden_dim), jnp.float32),
        var=jax.random.uniform(k8, (1, hidden_dim), jnp.float32, 0.5, 1.5),
        w2=jax.random.uniform(k3, (hidden_dim, out_dim), jnp.float32, -bound2, bound2),
        b2=jax.random.uniform(k4, (1, out_dim), jnp.float32, -bound2, bound2),
    )


def _fold_bn(p):
    """Fold inference BatchNorm into the first Linear (done in float32)."""
    scale = p["gamma"] * jax.lax.rsqrt(p["var"] + BN_EPS)       # [1, H]
    w1 = p["w1"] * scale                                        # [in, H]
    b1 = (p["b1"] - p["mean"]) * scale + p["beta"]              # [1, H]
    return w1, b1


def pack_params(heads, dist_heads):
    """One-time packing (outside the traced forward): BN-fold, concat, bf16 cast.

    W2 is block-structured into a single [6*512, 128] slab: each head's rows are
    disjoint, each task's NUM_CLASSES columns sit at a fixed offset, and the 0.5
    distillation factor is folded in so head + dist_head logits accumulate into
    the same lanes (one matmul gives the eval-time average directly).
    """
    all_heads = list(heads) + list(dist_heads)                  # order: h0,h1,h2,d0,d1,d2
    w1s, b1s = [], []
    for p in all_heads:
        w1, b1 = _fold_bn(p)
        w1s.append(w1)
        b1s.append(b1)
    w1_packed = jnp.concatenate(w1s, axis=1)                    # [320, 6*512]
    b1_packed = jnp.concatenate(b1s, axis=1)                    # [1, 6*512]

    hidden_total = len(all_heads) * EXPANDED_DIM
    w2_packed = jnp.zeros((hidden_total, OUT_WIDTH), jnp.float32)
    b2_packed = jnp.zeros((1, OUT_WIDTH), jnp.float32)
    for i, p in enumerate(all_heads):
        task = i % NUM_TASKS
        c = NUM_CLASSES[task]
        r0 = i * EXPANDED_DIM
        c0 = COL_OFFSETS[task]
        w2_packed = w2_packed.at[r0:r0 + EXPANDED_DIM, c0:c0 + c].set(0.5 * p["w2"])
        b2_packed = b2_packed.at[0, c0:c0 + c].add(0.5 * p["b2"][0])

    return dict(
        w1=w1_packed.astype(jnp.bfloat16),
        b1=b1_packed,                         # f32 bias
        w2=w2_packed.astype(jnp.bfloat16),
        b2=b2_packed,                         # f32 bias
    )


def tiny_vit_mlp_forward(feat, packed):
    """TinyViT_MLP.forward with distillation=True, eval mode (distilled-average outputs)."""
    # TODO(synk): tiny_vit_5m_224 backbone not implemented; `feat` is its 320-d pooled output.
    return fused_heads_forward(feat, packed)   # (out_daily, out_gender, out_embel)


# ----------------------------- reference -------------------------------------

def reference_forward(feat, heads, dist_heads):
    """Pure-JAX f32 reference (un-fused, un-folded)."""
    def one(p):
        scale = p["gamma"] * jax.lax.rsqrt(p["var"] + BN_EPS)
        h = feat @ p["w1"] + p["b1"]
        h = (h - p["mean"]) * scale + p["beta"]
        h = 0.5 * h * (1.0 + jax.lax.erf(h * SQRT_HALF))
        return h @ p["w2"] + p["b2"]
    return tuple(0.5 * (one(h) + one(d)) for h, d in zip(heads, dist_heads))


# ------------------------------- main -----------------------------------------

if __name__ == "__main__":
    key = jax.random.PRNGKey(0)
    k_feat, k_feat_big, k_params = jax.random.split(key, 3)

    head_keys = jax.random.split(k_params, 2 * NUM_TASKS)
    heads = [init_mlp_classifier(head_keys[i], EMBED_DIM, EXPANDED_DIM, c)
             for i, c in enumerate(NUM_CLASSES)]
    dist_heads = [init_mlp_classifier(head_keys[NUM_TASKS + i], EMBED_DIM, EXPANDED_DIM, c)
                  for i, c in enumerate(NUM_CLASSES)]

    packed = pack_params(heads, dist_heads)     # packed ONCE, outside the forward
    fwd = jax.jit(tiny_vit_mlp_forward)

    # --- small batch (=8): gridless path, W2 DMA overlapped with matmul-1 ---
    feat = jax.random.normal(k_feat, (8, EMBED_DIM), dtype=jnp.float32)
    out_daily, out_gender, out_embel = fwd(feat, packed)
    jax.block_until_ready((out_daily, out_gender, out_embel))

    assert out_daily.shape == (8, 6)
    assert out_gender.shape == (8, 5)
    assert out_embel.shape == (8, 3)

    ref = reference_forward(feat, heads, dist_heads)
    for got, want in zip((out_daily, out_gender, out_embel), ref):
        assert float(jnp.max(jnp.abs(got - want))) < 5e-2

    # --- larger batch (=160): batch-gridded path (padded to 2 x 128-row blocks) ---
    feat_big = jax.random.normal(k_feat_big, (160, EMBED_DIM), dtype=jnp.float32)
    outs_big = fwd(feat_big, packed)
    jax.block_until_ready(outs_big)
    assert outs_big[0].shape == (160, 6)
    assert outs_big[1].shape == (160, 5)
    assert outs_big[2].shape == (160, 3)

    ref_big = reference_forward(feat_big, heads, dist_heads)
    for got, want in zip(outs_big, ref_big):
        assert float(jnp.max(jnp.abs(got - want))) < 5e-2

    print("KERNEL_OK")
</pallas_src>

<mosaic_0001>
module attributes {stable_mosaic.version = 11 : i64} {
  func.func @_heads_kernel_small(%arg0: memref<8x320xf32, #tpu.memory_space<vmem>>, %arg1: memref<320x3072xbf16, #tpu.memory_space<vmem>>, %arg2: memref<1x3072xf32, #tpu.memory_space<vmem>>, %arg3: memref<3072x128xbf16, #tpu.memory_space<any>>, %arg4: memref<1x128xf32, #tpu.memory_space<vmem>>, %arg5: memref<8x128xf32, #tpu.memory_space<vmem>>, %arg6: memref<3072x128xbf16, #tpu.memory_space<vmem>>, %arg7: memref<!tpu.dma_semaphore, #tpu.memory_space<semaphore_mem>>) attributes {dimension_semantics = [], scalar_prefetch = 0 : i64, scratch_operands = 2 : i64, tpu.core_type = #tpu.core_type<tc>} {
    tpu.enqueue_dma source(%arg3 : memref<3072x128xbf16, #tpu.memory_space<any>>) target(%arg6 : memref<3072x128xbf16, #tpu.memory_space<vmem>>) target_semaphore(%arg7 : memref<!tpu.dma_semaphore, #tpu.memory_space<semaphore_mem>>)
    %c0 = arith.constant 0 : index
    %c0_0 = arith.constant 0 : index
    %0 = vector.load %arg0[%c0, %c0_0] : memref<8x320xf32, #tpu.memory_space<vmem>>, vector<8x320xf32>
    %1 = arith.truncf %0 : vector<8x320xf32> to vector<8x320xbf16>
    %c0_1 = arith.constant 0 : index
    %c0_2 = arith.constant 0 : index
    %2 = vector.load %arg1[%c0_1, %c0_2] : memref<320x3072xbf16, #tpu.memory_space<vmem>>, vector<320x3072xbf16>
    %cst = arith.constant dense<0.000000e+00> : vector<8x3072xf32>
    %3 = tpu.matmul %1, %2, %cst {dimension_numbers = #tpu.dot_dimension_numbers<[1], [0], [0], [1], [0, 0, 1, 1], [], []>} : vector<8x320xbf16>, vector<320x3072xbf16>, vector<8x3072xf32> -> vector<8x3072xf32>
    %c0_3 = arith.constant 0 : index
    %c0_4 = arith.constant 0 : index
    %4 = vector.load %arg2[%c0_3, %c0_4] : memref<1x3072xf32, #tpu.memory_space<vmem>>, vector<1x3072xf32>
    %5 = vector.broadcast %4 : vector<1x3072xf32> to vector<8x3072xf32>
    %6 = arith.addf %3, %5 : vector<8x3072xf32>
    %cst_5 = arith.constant 5.000000e-01 : f32
    %7 = vector.broadcast %cst_5 : f32 to vector<8x3072xf32>
    %8 = arith.mulf %7, %6 : vector<8x3072xf32>
    %cst_6 = arith.constant 0.707106769 : f32
    %9 = vector.broadcast %cst_6 : f32 to vector<8x3072xf32>
    %10 = arith.mulf %6, %9 : vector<8x3072xf32>
    %11 = math.erf %10 : vector<8x3072xf32>
    %cst_7 = arith.constant 1.000000e+00 : f32
    %12 = vector.broadcast %cst_7 : f32 to vector<8x3072xf32>
    %13 = arith.addf %12, %11 : vector<8x3072xf32>
    %14 = arith.mulf %8, %13 : vector<8x3072xf32>
    tpu.wait_dma2 semaphore(%arg7 : memref<!tpu.dma_semaphore, #tpu.memory_space<semaphore_mem>>) src(%arg3 : memref<3072x128xbf16, #tpu.memory_space<any>>) dst(%arg6 : memref<3072x128xbf16, #tpu.memory_space<vmem>>)
    %15 = arith.truncf %14 : vector<8x3072xf32> to vector<8x3072xbf16>
    %c0_8 = arith.constant 0 : index
    %c0_9 = arith.constant 0 : index
    %16 = vector.load %arg6[%c0_8, %c0_9] : memref<3072x128xbf16, #tpu.memory_space<vmem>>, vector<3072x128xbf16>
    %cst_10 = arith.constant dense<0.000000e+00> : vector<8x128xf32>
    %17 = tpu.matmul %15, %16, %cst_10 {dimension_numbers = #tpu.dot_dimension_numbers<[1], [0], [0], [1], [0, 0, 1, 1], [], []>} : vector<8x3072xbf16>, vector<3072x128xbf16>, vector<8x128xf32> -> vector<8x128xf32>
    %c0_11 = arith.constant 0 : index
    %c0_12 = arith.constant 0 : index
    %18 = vector.load %arg4[%c0_11, %c0_12] : memref<1x128xf32, #tpu.memory_space<vmem>>, vector<1x128xf32>
    %19 = vector.broadcast %18 : vector<1x128xf32> to vector<8x128xf32>
    %20 = arith.addf %17, %19 : vector<8x128xf32>
    %c0_13 = arith.constant 0 : index
    %c0_14 = arith.constant 0 : index
    %21 = vector.load %arg5[%c0_13, %c0_14] : memref<8x128xf32, #tpu.memory_space<vmem>>, vector<8x128xf32>
    tpu.vector_store %arg5[%c0_13, %c0_14], %20 {strides = array<i32>} : memref<8x128xf32, #tpu.memory_space<vmem>>, vector<8x128xf32>,
    return
  }
}

</mosaic_0001>

<bundles_post_ra>
// kernel: tiny_vit_mlp_forward.1
= control target key start
LH: loop header
LB: loop body
LE: loop exit
PB: predicated region body
PF: predicated region fallthrough
CT: control target
= control target key end

     0   :  { %10 = vsyncpa [#allocation5], 0  ;;  %s6305_s0 = inlined_call_operand.hbm [shape: f32[8,320], index: 0, kind: input, shape index: {}]   ;;  %s6306_s1 = inlined_call_operand.hbm [shape: bf16[320,3072], index: 1, kind: input, shape index: {}]   ;;  %s6307_s2 = inlined_call_operand.hbm [shape: f32[1,3072], index: 2, kind: input, shape index: {}]   ;;  %s6308_s3 = inlined_call_operand.hbm [shape: bf16[3072,128], index: 3, kind: input, shape index: {}]   ;;  %s6309_s4 = inlined_call_operand.hbm [shape: f32[1,128], index: 4, kind: input, shape index: {}]   ;;  %s6310_s5 = inlined_call_operand.vmem [shape: f32[8,128], index: 5, kind: output, shape index: {}]  }
   0x1   :  { %11 = vsyncpa [#allocation7], 0 }
   0x2   :  { %12 = vsyncpa [#allocation10], 0  ;;  %s5924_s18 = smov [#allocation6]   ;;  %s5806_s22 = scalar_lea.hbm %s6306_s1, 61440 }
   0x3   :  { %s28_s19 = sshll.u32 %s5924_s18, 4  ;;  %p5807_p0 = scmp.ne.s32.totalorder %s6306_s1, %s5806_s22  ;;  %s29_s19 = int_to_ptr.vmem [resolvable:$true] %s28_s19 }
   0x4   :  { %p5810_p1 = scmp.lt.u32.totalorder %s5806_s22, %s6306_s1 }
   0x6   :  { %p5812_p2 = pnand %p5810_p1, %p5807_p0 }
   0x8   :  { %5815 = shalt.err (!%p5812_p2)
}
   0x9   :  { %s5816_s27 = scalar_lea.vmem %s29_s19, 61440  ;;  %p5821_p4 = scmp.lt.s32.totalorder %s29_s19, %s29_s19 }
   0xa   :  { %p5817_p3 = scmp.ne.s32.totalorder %s29_s19, %s5816_s27  ;;  %p5822_p5 = scmp.lt.s32.totalorder %s5816_s27, %s5816_s27 }
   0xc   :  { %p5823_p6 = por %p5822_p5, %p5821_p4 }
   0xe   :  { %p5824_p7 = pnand %p5823_p6, %p5817_p3 }
  0x10   :  { %5827 = shalt.err (!%p5824_p7)
}
  0x11   :  { %s5925_s28 = smov 1536   ;;  %s5926_s29 = smov 96  }
  0x12   :  { %34 = dma.hbm_to_vmem [thread:$0]  %s6306_s1, 61440, %s29_s19, [#allocation7], %s5925_s28, %s5925_s28, %s5926_s29  }
  0x13   :  { %s5927_s7 = smov [#allocation4]   ;;  %s5928_s9 = smov [#allocation8]  }
  0x14   :  { %s19_s8 = sshll.u32 %s5927_s7, 4  ;;  %s41_s10 = sshll.u32 %s5928_s9, 4  ;;  %s20_s8 = int_to_ptr.vmem [resolvable:$true] %s19_s8  ;;  %s42_s10 = int_to_ptr.vmem [resolvable:$true] %s41_s10 }
  0x15   :  { %s5828_s13 = scalar_lea.hbm %s6305_s0, 384 }
  0x16   :  { %p5829_p8 = scmp.ne.s32.totalorder %s6305_s0, %s5828_s13  ;;  %p5832_p9 = scmp.lt.u32.totalorder %s5828_s13, %s6305_s0 }
  0x18   :  { %p5834_p10 = pnand %p5832_p9, %p5829_p8 }
  0x1a   :  { %5837 = shalt.err (!%p5834_p10)
}
  0x1b   :  { %s5838_s1 = scalar_lea.vmem %s20_s8, 384  ;;  %p5843_p12 = scmp.lt.s32.totalorder %s20_s8, %s20_s8 }
  0x1c   :  { %p5839_p11 = scmp.ne.s32.totalorder %s20_s8, %s5838_s1  ;;  %p5844_p13 = scmp.lt.s32.totalorder %s5838_s1, %s5838_s1 }
  0x1e   :  { %p5845_p0 = por %p5844_p13, %p5843_p12 }
  0x20   :  { %p5846_p1 = pnand %p5845_p0, %p5839_p11 }
  0x22   :  { %5849 = shalt.err (!%p5846_p1)
}
  0x23   :  { %22 = dma.hbm_to_vmem [thread:$0]  %s6305_s0, 384, %s20_s8, [#allocation5]  }
  0x24   :  { %s5850_s22 = scalar_lea.hbm %s6307_s2, 384 }
  0x25   :  { %p5851_p2 = scmp.ne.s32.totalorder %s6307_s2, %s5850_s22  ;;  %p5854_p3 = scmp.lt.u32.totalorder %s5850_s22, %s6307_s2 }
  0x27   :  { %p5856_p4 = pnand %p5854_p3, %p5851_p2 }
  0x29   :  { %5859 = shalt.err (!%p5856_p4)
}
  0x2a   :  { %s5860_s27 = scalar_lea.vmem %s42_s10, 384  ;;  %p5865_p6 = scmp.lt.s32.totalorder %s42_s10, %s42_s10 }
  0x2b   :  { %p5861_p5 = scmp.ne.s32.totalorder %s42_s10, %s5860_s27  ;;  %p5866_p7 = scmp.lt.s32.totalorder %s5860_s27, %s5860_s27 }
  0x2d   :  { %p5867_p8 = por %p5866_p7, %p5865_p6 }
  0x2f   :  { %p5868_p9 = pnand %p5867_p8, %p5861_p5 }
  0x31   :  { %5871 = shalt.err (!%p5868_p9)
}
  0x32   :  { %44 = dma.hbm_to_vmem [thread:$0]  %s6307_s2, 384, %s42_s10, [#allocation7]  }
  0x33   :  { %s5929_s29 = smov [#allocation9]   ;;  %s5872_s8 = scalar_lea.hbm %s6309_s4, 16 }
  0x34   :  { %s51_s30 = sshll.u32 %s5929_s29, 4  ;;  %p5873_p10 = scmp.ne.s32.totalorder %s6309_s4, %s5872_s8  ;;  %s52_s30 = int_to_ptr.vmem [resolvable:$true] %s51_s30 }
  0x35   :  { %p5876_p11 = scmp.lt.u32.totalorder %s5872_s8, %s6309_s4 }
  0x37   :  { %p5878_p12 = pnand %p5876_p11, %p5873_p10 }
  0x39   :  { %5881 = shalt.err (!%p5878_p12)
}
  0x3a   :  { %s5882_s14 = scalar_lea.vmem %s52_s30, 16  ;;  %s5886_s2 = scalar_lea.vmem %s52_s30, 32 }
  0x3b   :  { %p5883_p13 = scmp.ne.s32.totalorder %s52_s30, %s5882_s14  ;;  %p5887_p0 = scmp.lt.s32.totalorder %s52_s30, %s52_s30 }
  0x3c   :  { %p5888_p1 = scmp.lt.s32.totalorder %s5886_s2, %s5882_s14 }
  0x3e   :  { %p5889_p2 = por %p5888_p1, %p5887_p0 }
  0x40   :  { %p5890_p3 = pnand %p5889_p2, %p5883_p13 }
  0x42   :  { %5893 = shalt.err (!%p5890_p3)
}
  0x43   :  { %54 = dma.hbm_to_vmem [thread:$0]  %s6309_s4, 16, %s52_s30, [#allocation10]  }
  0x44   :  { %5916 = dma.done.wait [#allocation5], 384  }
  0x45   :  { %5917 = vsyncadd [#allocation5], 4294966912 }
  0x46   :  { %5918 = dma.done.wait [#allocation7], 61824  }
  0x47   :  { %5919 = vsyncadd [#allocation7], 4294905472 }
  0x48   :  { %5920 = dma.done.wait [#allocation10], 16  }
  0x49   :  { %5921 = vsyncadd [#allocation10], 4294967280  ;;  %v85_v0 = vld [vmem:[#allocation6] sm:$0xff]  ;;  %v86_v2 = vld [vmem:[#allocation6 + $0x8] sm:$0xff]  ;;  %vm3091_vm0 = vcmask 523264   ;;  %s5931_s4 = smov [#allocation2]  }
  0x4a   :  { %v97_v1 = vld [vmem:[#allocation6 + $0x60] sm:$0xff]  ;;  %v98_v4 = vld [vmem:[#allocation6 + $0x68] sm:$0xff]  ;;  %v80_v53 = vld [vmem:[#allocation4 + $0x8] sm:$0xff]  ;;  %s75_s16 = sshll.u32 %s5931_s4, 4  ;;  %s5894_s18 = scalar_lea.hbm %s6308_s3, 24576  ;;  %s76_s16 = int_to_ptr.vmem [resolvable:$true] %s75_s16 }
  0x4b   :  { %v4921_v3 = vcombine.high %v85_v0, %v97_v1  ;;  %v4920_v5 = vcombine.low %v85_v0, %v97_v1  ;;  %v109_v6 = vld [vmem:[#allocation6 + $0xc0] sm:$0xff]  ;;  %v4923_v8 = vcombine.high %v86_v2, %v98_v4  ;;  %v4922_v9 = vcombine.low %v86_v2, %v98_v4  ;;  %v110_v11 = vld [vmem:[#allocation6 + $0xc8] sm:$0xff]  ;;  %p5895_p4 = scmp.ne.s32.totalorder %s6308_s3, %s5894_s18  ;;  %p5898_p5 = scmp.lt.u32.totalorder %s5894_s18, %s6308_s3 }
  0x4c   :  { %v121_v7 = vld [vmem:[#allocation6 + $0x120] sm:$0xff]  ;;  %v122_v12 = vld [vmem:[#allocation6 + $0x128] sm:$0xff]  ;;  %v6010_v57 = vpack.c.bf16 %v80_v53, %v80_v53 }
  0x4d   :  { %v4945_v10 = vcombine.high %v109_v6, %v121_v7  ;;  %v133_v13 = vld [vmem:[#allocation6 + $0x180] sm:$0xff]  ;;  %3095 = vmatprep.subr.bf16.mxu0 %v4921_v3  ;;  %v4947_v14 = vcombine.high %v110_v11, %v122_v12  ;;  %v134_v16 = vld [vmem:[#allocation6 + $0x188] sm:$0xff]  ;;  %3177 = vmatprep.subr.bf16.mxu1 %v4923_v8  ;;  %v4944_v18 = vcombine.low %v109_v6, %v121_v7  ;;  %p5900_p6 = pnand %p5898_p5, %p5895_p4 }
  0x4e   :  { %v145_v15 = vld [vmem:[#allocation6 + $0x1e0] sm:$0xff]  ;;  %v146_v17 = vld [vmem:[#allocation6 + $0x1e8] sm:$0xff]  ;;  %3096 = vmatpush1.bf16.msra.mxu0 %v4920_v5  ;;  %3178 = vmatpush1.bf16.msra.mxu1 %v4922_v9  ;;  %v4946_v19 = vcombine.low %v110_v11, %v122_v12 }
  0x4f   :  { %3097 = vmatprep.subr.bf16.mxu0 %v4945_v10  ;;  %v4969_v20 = vcombine.high %v133_v13, %v145_v15  ;;  %3179 = vmatprep.subr.bf16.mxu1 %v4947_v14  ;;  %v4971_v21 = vcombine.high %v134_v16, %v146_v17  ;;  %v157_v22 = vld [vmem:[#allocation6 + $0x240] sm:$0xff]  ;;  %v158_v24 = vld [vmem:[#allocation6 + $0x248] sm:$0xff]  ;;  %v4968_v26 = vcombine.low %v133_v13, %v145_v15 }
  0x50   :  { %v169_v23 = vld [vmem:[#allocation6 + $0x2a0] sm:$0xff]  ;;  %v170_v25 = vld [vmem:[#allocation6 + $0x2a8] sm:$0xff]  ;;  %v4970_v27 = vcombine.low %v134_v16, %v146_v17  ;;  %3127 = vmatprep.mubr.bf16.mxu0 %v6010_v57  ;;  %3209 = vmatprep.mubr.bf16.mxu1 %v6010_v57 }
  0x51   :  { %v4993_v28 = vcombine.high %v157_v22, %v169_v23  ;;  %v4995_v29 = vcombine.high %v158_v24, %v170_v25  ;;  %v181_v30 = vld [vmem:[#allocation6 + $0x300] sm:$0xff]  ;;  %v182_v32 = vld [vmem:[#allocation6 + $0x308] sm:$0xff]  ;;  %v4992_v34 = vcombine.low %v157_v22, %v169_v23  ;;  %v4994_v35 = vcombine.low %v158_v24, %v170_v25 }
  0x52   :  { %3098 = vmatpush1.bf16.msra.mxu0 %v4944_v18  ;;  %3180 = vmatpush1.bf16.msra.mxu1 %v4946_v19  ;;  %v193_v31 = vld [vmem:[#allocation6 + $0x360] sm:$0xff]  ;;  %v194_v33 = vld [vmem:[#allocation6 + $0x368] sm:$0xff] }
  0x53   :  { %3099 = vmatprep.subr.bf16.mxu0 %v4969_v20  ;;  %3181 = vmatprep.subr.bf16.mxu1 %v4971_v21  ;;  %v5017_v36 = vcombine.high %v181_v30, %v193_v31  ;;  %v5019_v37 = vcombine.high %v182_v32, %v194_v33  ;;  %v205_v38 = vld [vmem:[#allocation6 + $0x3c0] sm:$0xff]  ;;  %v206_v40 = vld [vmem:[#allocation6 + $0x3c8] sm:$0xff]  ;;  %v5016_v42 = vcombine.low %v181_v30, %v193_v31 }
  0x54   :  { %v217_v39 = vld [vmem:[#allocation6 + $0x420] sm:$0xff]  ;;  %v218_v41 = vld [vmem:[#allocation6 + $0x428] sm:$0xff]  ;;  %v5018_v43 = vcombine.low %v182_v32, %v194_v33 }
  0x55   :  { %v5041_v44 = vcombine.high %v205_v38, %v217_v39  ;;  %v5043_v45 = vcombine.high %v206_v40, %v218_v41  ;;  %v229_v46 = vld [vmem:[#allocation6 + $0x480] sm:$0xff]  ;;  %v230_v48 = vld [vmem:[#allocation6 + $0x488] sm:$0xff]  ;;  %v5040_v50 = vcombine.low %v205_v38, %v217_v39  ;;  %v5042_v51 = vcombine.low %v206_v40, %v218_v41 }
  0x56   :  { %3100 = vmatpush1.bf16.msra.mxu0 %v4968_v26  ;;  %3182 = vmatpush1.bf16.msra.mxu1 %v4970_v27  ;;  %v241_v47 = vld [vmem:[#allocation6 + $0x4e0] sm:$0xff]  ;;  %v242_v49 = vld [vmem:[#allocation6 + $0x4e8] sm:$0xff] }
  0x57   :  { %3101 = vmatprep.subr.bf16.mxu0 %v4993_v28  ;;  %3183 = vmatprep.subr.bf16.mxu1 %v4995_v29  ;;  %v5065_v52 = vcombine.high %v229_v46, %v241_v47  ;;  %v5067_v54 = vcombine.high %v230_v48, %v242_v49  ;;  %v253_v55 = vld [vmem:[#allocation6 + $0x540] sm:$0xff]  ;;  %v254_v58 = vld [vmem:[#allocation6 + $0x548] sm:$0xff]  ;;  %v5064_v60 = vcombine.low %v229_v46, %v241_v47 }
  0x58   :  { %v265_v56 = vld [vmem:[#allocation6 + $0x5a0] sm:$0xff]  ;;  %v266_v59 = vld [vmem:[#allocation6 + $0x5a8] sm:$0xff]  ;;  %v5066_v61 = vcombine.low %v230_v48, %v242_v49 }
  0x59   :  { %v5089_v62 = vcombine.high %v253_v55, %v265_v56  ;;  %v5091_v63 = vcombine.high %v254_v58, %v266_v59  ;;  %v277_v0 = vld [vmem:[#allocation6 + $0x600] sm:$0xff]  ;;  %v278_v2 = vld [vmem:[#allocation6 + $0x608] sm:$0xff]  ;;  %v5088_v4 = vcombine.low %v253_v55, %v265_v56  ;;  %v5090_v5 = vcombine.low %v254_v58, %v266_v59 }
  0x5a   :  { %3102 = vmatpush1.bf16.msra.mxu0 %v4992_v34  ;;  %3184 = vmatpush1.bf16.msra.mxu1 %v4994_v35  ;;  %v289_v1 = vld [vmem:[#allocation6 + $0x660] sm:$0xff]  ;;  %v290_v3 = vld [vmem:[#allocation6 + $0x668] sm:$0xff] }
  0x5b   :  { %3103 = vmatprep.subr.bf16.mxu0 %v5017_v36  ;;  %3185 = vmatprep.subr.bf16.mxu1 %v5019_v37  ;;  %v5113_v6 = vcombine.high %v277_v0, %v289_v1  ;;  %v5115_v7 = vcombine.high %v278_v2, %v290_v3  ;;  %v301_v8 = vld [vmem:[#allocation6 + $0x6c0] sm:$0xff]  ;;  %v302_v10 = vld [vmem:[#allocation6 + $0x6c8] sm:$0xff]  ;;  %v5112_v12 = vcombine.low %v277_v0, %v289_v1 }
  0x5c   :  { %v313_v9 = vld [vmem:[#allocation6 + $0x720] sm:$0xff]  ;;  %v314_v11 = vld [vmem:[#allocation6 + $0x728] sm:$0xff]  ;;  %v5114_v13 = vcombine.low %v278_v2, %v290_v3 }
  0x5d   :  { %v5137_v14 = vcombine.high %v301_v8, %v313_v9  ;;  %v5139_v15 = vcombine.high %v302_v10, %v314_v11  ;;  %v325_v16 = vld [vmem:[#allocation6 + $0x780] sm:$0xff]  ;;  %v326_v18 = vld [vmem:[#allocation6 + $0x788] sm:$0xff]  ;;  %v5136_v20 = vcombine.low %v301_v8, %v313_v9  ;;  %v5138_v21 = vcombine.low %v302_v10, %v314_v11 }
  0x5e   :  { %3104 = vmatpush1.bf16.msra.mxu0 %v5016_v42  ;;  %3186 = vmatpush1.bf16.msra.mxu1 %v5018_v43  ;;  %v337_v17 = vld [vmem:[#allocation6 + $0x7e0] sm:$0xff]  ;;  %v338_v19 = vld [vmem:[#allocation6 + $0x7e8] sm:$0xff] }
  0x5f   :  { %3105 = vmatprep.subr.bf16.mxu0 %v5041_v44  ;;  %3187 = vmatprep.subr.bf16.mxu1 %v5043_v45  ;;  %v5161_v22 = vcombine.high %v325_v16, %v337_v17  ;;  %v5163_v23 = vcombine.high %v326_v18, %v338_v19  ;;  %v349_v24 = vld [vmem:[#allocation6 + $0x840] sm:$0xff]  ;;  %v350_v26 = vld [vmem:[#allocation6 + $0x848] sm:$0xff]  ;;  %v5160_v28 = vcombine.low %v325_v16, %v337_v17 }
  0x60   :  { %v361_v25 = vld [vmem:[#allocation6 + $0x8a0] sm:$0xff]  ;;  %v362_v27 = vld [vmem:[#allocation6 + $0x8a8] sm:$0xff]  ;;  %v5162_v29 = vcombine.low %v326_v18, %v338_v19 }
  0x61   :  { %v5185_v30 = vcombine.high %v349_v24, %v361_v25  ;;  %v5187_v31 = vcombine.high %v350_v26, %v362_v27  ;;  %v373_v32 = vld [vmem:[#allocation6 + $0x900] sm:$0xff]  ;;  %v374_v34 = vld [vmem:[#allocation6 + $0x908] sm:$0xff]  ;;  %v5184_v36 = vcombine.low %v349_v24, %v361_v25  ;;  %v5186_v37 = vcombine.low %v350_v26, %v362_v27 }
  0x62   :  { %3106 = vmatpush1.bf16.msra.mxu0 %v5040_v50  ;;  %3188 = vmatpush1.bf16.msra.mxu1 %v5042_v51  ;;  %v385_v33 = vld [vmem:[#allocation6 + $0x960] sm:$0xff]  ;;  %v386_v35 = vld [vmem:[#allocation6 + $0x968] sm:$0xff] }
  0x63   :  { %3107 = vmatprep.subr.bf16.mxu0 %v5065_v52  ;;  %3189 = vmatprep.subr.bf16.mxu1 %v5067_v54  ;;  %v5209_v38 = vcombine.high %v373_v32, %v385_v33  ;;  %v5211_v39 = vcombine.high %v374_v34, %v386_v35  ;;  %v397_v40 = vld [vmem:[#allocation6 + $0x9c0] sm:$0xff]  ;;  %v398_v42 = vld [vmem:[#allocation6 + $0x9c8] sm:$0xff]  ;;  %v5208_v44 = vcombine.low %v373_v32, %v385_v33 }
  0x64   :  { %v409_v41 = vld [vmem:[#allocation6 + $0xa20] sm:$0xff]  ;;  %v410_v43 = vld [vmem:[#allocation6 + $0xa28] sm:$0xff]  ;;  %v5210_v45 = vcombine.low %v374_v34, %v386_v35 }
  0x65   :  { %v5233_v46 = vcombine.high %v397_v40, %v409_v41  ;;  %v5235_v47 = vcombine.high %v398_v42, %v410_v43  ;;  %v421_v48 = vld [vmem:[#allocation6 + $0xa80] sm:$0xff]  ;;  %v422_v50 = vld [vmem:[#allocation6 + $0xa88] sm:$0xff]  ;;  %v5232_v52 = vcombine.low %v397_v40, %v409_v41  ;;  %v5234_v53 = vcombine.low %v398_v42, %v410_v43  ;;  %v81_v41 = vld [vmem:[#allocation4 + $0x10] sm:$0xff] }
  0x66   :  { %3108 = vmatpush1.bf16.msra.mxu0 %v5064_v60  ;;  %3190 = vmatpush1.bf16.msra.mxu1 %v5066_v61  ;;  %v433_v49 = vld [vmem:[#allocation6 + $0xae0] sm:$0xff]  ;;  %v434_v51 = vld [vmem:[#allocation6 + $0xae8] sm:$0xff] }
  0x67   :  { %3109 = vmatprep.subr.bf16.mxu0 %v5089_v62  ;;  %3191 = vmatprep.subr.bf16.mxu1 %v5091_v63  ;;  %v5257_v54 = vcombine.high %v421_v48, %v433_v49  ;;  %v5259_v55 = vcombine.high %v422_v50, %v434_v51  ;;  %v445_v56 = vld [vmem:[#allocation6 + $0xb40] sm:$0xff]  ;;  %v446_v59 = vld [vmem:[#allocation6 + $0xb48] sm:$0xff]  ;;  %v5256_v61 = vcombine.low %v421_v48, %v433_v49  ;;  %v112_v48 = vld [vmem:[#allocation6 + $0xd8] sm:$0xff] }
  0x68   :  { %v457_v58 = vld [vmem:[#allocation6 + $0xba0] sm:$0xff]  ;;  %v458_v60 = vld [vmem:[#allocation6 + $0xba8] sm:$0xff]  ;;  %v5258_v62 = vcombine.low %v422_v50, %v434_v51  ;;  %v124_v49 = vld [vmem:[#allocation6 + $0x138] sm:$0xff] }
  0x69   :  { %v5281_v63 = vcombine.high %v445_v56, %v457_v58  ;;  %v5283_v0 = vcombine.high %v446_v59, %v458_v60  ;;  %v469_v1 = vld [vmem:[#allocation6 + $0xc00] sm:$0xff]  ;;  %v470_v3 = vld [vmem:[#allocation6 + $0xc08] sm:$0xff] }
  0x6a   :  { %3110 = vmatpush1.bf16.msra.mxu0 %v5088_v4  ;;  %3192 = vmatpush1.bf16.msra.mxu1 %v5090_v5  ;;  %v481_v2 = vld [vmem:[#allocation6 + $0xc60] sm:$0xff]  ;;  %v482_v4 = vld [vmem:[#allocation6 + $0xc68] sm:$0xff]  ;;  %v5280_v5 = vcombine.low %v445_v56, %v457_v58  ;;  %v136_v56 = vld [vmem:[#allocation6 + $0x198] sm:$0xff] }
  0x6b   :  { %3111 = vmatprep.subr.bf16.mxu0 %v5113_v6  ;;  %3193 = vmatprep.subr.bf16.mxu1 %v5115_v7  ;;  %v79_v6 = vld [vmem:[#allocation4] sm:$0xff]  ;;  %v5282_v7 = vcombine.low %v446_v59, %v458_v60  ;;  %v5305_v8 = vcombine.high %v469_v1, %v481_v2  ;;  %v5307_v9 = vcombine.high %v470_v3, %v482_v4  ;;  %v493_v10 = vld [vmem:[#allocation6 + $0xcc0] sm:$0xff]  ;;  %v148_v58 = vld [vmem:[#allocation6 + $0x1f8] sm:$0xff] }
  0x6c   :  { %v505_v11 = vld [vmem:[#allocation6 + $0xd20] sm:$0xff]  ;;  %v5306_v16 = vcombine.low %v470_v3, %v482_v4  ;;  %v4950_v60 = vcombine.low %v112_v48, %v124_v49  ;;  %v4974_v4 = vcombine.low %v136_v56, %v148_v58 }
  0x6d   :  { %v5329_v17 = vcombine.high %v493_v10, %v505_v11  ;;  %v517_v19 = vld [vmem:[#allocation6 + $0xd80] sm:$0xff] }
  0x6e   :  { %3112 = vmatpush1.bf16.msra.mxu0 %v5112_v12  ;;  %3194 = vmatpush1.bf16.msra.mxu1 %v5114_v13  ;;  %v6014_v12 = vpack.c.bf16 %v79_v6, %v79_v6  ;;  %v494_v13 = vld [vmem:[#allocation6 + $0xcc8] sm:$0xff]  ;;  %v541_v27 = vld [vmem:[#allocation6 + $0xe40] sm:$0xff] }
  0x6f   :  { %3113 = vmatprep.subr.bf16.mxu0 %v5137_v14  ;;  %3195 = vmatprep.subr.bf16.mxu1 %v5139_v15  ;;  %v506_v14 = vld [vmem:[#allocation6 + $0xd28] sm:$0xff]  ;;  %v5304_v15 = vcombine.low %v469_v1, %v481_v2  ;;  %v160_v1 = vld [vmem:[#allocation6 + $0x258] sm:$0xff] }
  0x70   :  { %v5331_v18 = vcombine.high %v494_v13, %v506_v14  ;;  %v5330_v24 = vcombine.low %v494_v13, %v506_v14  ;;  %v172_v2 = vld [vmem:[#allocation6 + $0x2b8] sm:$0xff] }
  0x71   :  { %v4999_v6 = vcombine.high %v160_v1, %v172_v2  ;;  %v4998_v13 = vcombine.low %v160_v1, %v172_v2 }
  0x72   :  { %3114 = vmatpush1.bf16.msra.mxu0 %v5136_v20  ;;  %3196 = vmatpush1.bf16.msra.mxu1 %v5138_v21  ;;  %v529_v20 = vld [vmem:[#allocation6 + $0xde0] sm:$0xff]  ;;  %v518_v21 = vld [vmem:[#allocation6 + $0xd88] sm:$0xff] }
  0x73   :  { %3115 = vmatprep.subr.bf16.mxu0 %v5161_v22  ;;  %3197 = vmatprep.subr.bf16.mxu1 %v5163_v23  ;;  %v530_v22 = vld [vmem:[#allocation6 + $0xde8] sm:$0xff]  ;;  %v5328_v23 = vcombine.low %v493_v10, %v505_v11  ;;  %v5353_v25 = vcombine.high %v517_v19, %v529_v20  ;;  %v5352_v32 = vcombine.low %v517_v19, %v529_v20  ;;  %v196_v10 = vld [vmem:[#allocation6 + $0x378] sm:$0xff] }
  0x74   :  { %v5355_v26 = vcombine.high %v518_v21, %v530_v22  ;;  %v5354_v33 = vcombine.low %v518_v21, %v530_v22  ;;  %v220_v19 = vld [vmem:[#allocation6 + $0x438] sm:$0xff] }
  0x76   :  { %3116 = vmatpush1.bf16.msra.mxu0 %v5160_v28  ;;  %3198 = vmatpush1.bf16.msra.mxu1 %v5162_v29  ;;  %v553_v28 = vld [vmem:[#allocation6 + $0xea0] sm:$0xff]  ;;  %v5930_v29 = vmov 0  }
  0x77   :  { %3117 = vmatprep.subr.bf16.mxu0 %v5185_v30  ;;  %3199 = vmatprep.subr.bf16.mxu1 %v5187_v31  ;;  %v542_v30 = vld [vmem:[#allocation6 + $0xe48] sm:$0xff]  ;;  %v5377_v34 = vcombine.high %v541_v27, %v553_v28  ;;  %v5376_v40 = vcombine.low %v541_v27, %v553_v28  ;;  %v244_v27 = vld [vmem:[#allocation6 + $0x4f8] sm:$0xff] }
  0x78   :  { %v554_v31 = vld [vmem:[#allocation6 + $0xea8] sm:$0xff] }
  0x79   :  { %v5379_v35 = vcombine.high %v542_v30, %v554_v31  ;;  %v5378_v42 = vcombine.low %v542_v30, %v554_v31 }
  0x7a   :  { %3118 = vmatpush1.bf16.msra.mxu0 %v5184_v36  ;;  %3200 = vmatpush1.bf16.msra.mxu1 %v5186_v37  ;;  %v87_v36 = vld [vmem:[#allocation6 + $0x10] sm:$0xff] }
  0x7b   :  { %3119 = vmatprep.subr.bf16.mxu0 %v5209_v38  ;;  %3201 = vmatprep.subr.bf16.mxu1 %v5211_v39  ;;  %v99_v37 = vld [vmem:[#allocation6 + $0x70] sm:$0xff]  ;;  %v88_v38 = vld [vmem:[#allocation6 + $0x18] sm:$0xff] }
  0x7c   :  { %v100_v39 = vld [vmem:[#allocation6 + $0x78] sm:$0xff]  ;;  %v4925_v43 = vcombine.high %v87_v36, %v99_v37  ;;  %v4924_v50 = vcombine.low %v87_v36, %v99_v37 }
  0x7d   :  { %v4926_v51 = vcombine.low %v88_v38, %v100_v39  ;;  %v268_v36 = vld [vmem:[#allocation6 + $0x5b8] sm:$0xff] }
  0x7e   :  { %3120 = vmatpush1.bf16.msra.mxu0 %v5208_v44  ;;  %3202 = vmatpush1.bf16.msra.mxu1 %v5210_v45  ;;  %v4927_v44 = vcombine.high %v88_v38, %v100_v39  ;;  %v111_v45 = vld [vmem:[#allocation6 + $0xd0] sm:$0xff] }
  0x7f   :  { %3121 = vmatprep.subr.bf16.mxu0 %v5233_v46  ;;  %3203 = vmatprep.subr.bf16.mxu1 %v5235_v47  ;;  %v123_v46 = vld [vmem:[#allocation6 + $0x130] sm:$0xff]  ;;  %v6020_v47 = vpack.c.bf16 %v81_v41, %v81_v41 }
  0x80   :  { %v4948_v59 = vcombine.low %v111_v45, %v123_v46  ;;  %v279_v41 = vld [vmem:[#allocation6 + $0x610] sm:$0xff] }
  0x82   :  { %3122 = vmatpush1.bf16.msra.mxu0 %v5232_v52  ;;  %3204 = vmatpush1.bf16.msra.mxu1 %v5234_v53  ;;  %v4949_v52 = vcombine.high %v111_v45, %v123_v46  ;;  %v4951_v53 = vcombine.high %v112_v48, %v124_v49 }
  0x83   :  { %3123 = vmatprep.subr.bf16.mxu0 %v5257_v54  ;;  %3205 = vmatprep.subr.bf16.mxu1 %v5259_v55  ;;  %v135_v54 = vld [vmem:[#allocation6 + $0x190] sm:$0xff] }
  0x84   :  { %v147_v55 = vld [vmem:[#allocation6 + $0x1f0] sm:$0xff] }
  0x85   :  { %v4972_v3 = vcombine.low %v135_v54, %v147_v55 }
  0x86   :  { %3124 = vmatpush1.bf16.msra.mxu0 %v5256_v61  ;;  %3206 = vmatpush1.bf16.msra.mxu1 %v5258_v62  ;;  %v4973_v61 = vcombine.high %v135_v54, %v147_v55  ;;  %v4975_v62 = vcombine.high %v136_v56, %v148_v58 }
  0x87   :  { %3125 = vmatprep.subr.bf16.mxu0 %v5281_v63  ;;  %3207 = vmatprep.subr.bf16.mxu1 %v5283_v0  ;;  %v159_v63 = vld [vmem:[#allocation6 + $0x250] sm:$0xff] }
  0x88   :  { %v171_v0 = vld [vmem:[#allocation6 + $0x2b0] sm:$0xff] }
  0x89   :  { %v4996_v11 = vcombine.low %v159_v63, %v171_v0 }
  0x8a   :  { %3126 = vmatpush1.bf16.msra.mxu0 %v5280_v5  ;;  %3208 = vmatpush1.bf16.msra.mxu1 %v5282_v7  ;;  %v4997_v5 = vcombine.high %v159_v63, %v171_v0  ;;  %v183_v7 = vld [vmem:[#allocation6 + $0x310] sm:$0xff] }
  0x8b   :  { %3136 = vmatprep.subr.bf16.mxu0 %v5305_v8  ;;  %3218 = vmatprep.subr.bf16.mxu1 %v5307_v9  ;;  %v195_v8 = vld [vmem:[#allocation6 + $0x370] sm:$0xff]  ;;  %v184_v9 = vld [vmem:[#allocation6 + $0x318] sm:$0xff] }
  0x8c   :  { %v5021_v14 = vcombine.high %v183_v7, %v195_v8  ;;  %v5020_v20 = vcombine.low %v183_v7, %v195_v8  ;;  %v5022_v21 = vcombine.low %v184_v9, %v196_v10 }
  0x8d   :  { %3128 = vmatmul.mubr.bf16.vlgmr.msra.gmra.mrb[0].mxu0 %v6014_v12  ;;  %3210 = vmatmul.mubr.bf16.vlgmr.msra.gmra.mrb[0].mxu1 %v6014_v12 }
  0x8e   :  { %3137 = vmatpush1.bf16.msra.mxu0 %v5304_v15  ;;  %3219 = vmatpush1.bf16.msra.mxu1 %v5306_v16  ;;  %v5023_v15 = vcombine.high %v184_v9, %v196_v10  ;;  %v207_v16 = vld [vmem:[#allocation6 + $0x3d0] sm:$0xff] }
  0x8f   :  { %3138 = vmatprep.subr.bf16.mxu0 %v5329_v17  ;;  %3220 = vmatprep.subr.bf16.mxu1 %v5331_v18  ;;  %v219_v17 = vld [vmem:[#allocation6 + $0x430] sm:$0xff]  ;;  %v208_v18 = vld [vmem:[#allocation6 + $0x3d8] sm:$0xff] }
  0x90   :  { %3168 = vmatprep.mubr.bf16.mxu0 %v5930_v29  ;;  %3250 = vmatprep.mubr.bf16.mxu1 %v5930_v29  ;;  %v5045_v22 = vcombine.high %v207_v16, %v219_v17  ;;  %v5044_v28 = vcombine.low %v207_v16, %v219_v17  ;;  %v5046_v30 = vcombine.low %v208_v18, %v220_v19 }
  0x92   :  { %3139 = vmatpush1.bf16.msra.mxu0 %v5328_v23  ;;  %3221 = vmatpush1.bf16.msra.mxu1 %v5330_v24  ;;  %v5047_v23 = vcombine.high %v208_v18, %v220_v19  ;;  %v231_v24 = vld [vmem:[#allocation6 + $0x490] sm:$0xff] }
  0x93   :  { %3140 = vmatprep.subr.bf16.mxu0 %v5353_v25  ;;  %3222 = vmatprep.subr.bf16.mxu1 %v5355_v26  ;;  %v243_v25 = vld [vmem:[#allocation6 + $0x4f0] sm:$0xff]  ;;  %v232_v26 = vld [vmem:[#allocation6 + $0x498] sm:$0xff] }
  0x94   :  { %v5069_v31 = vcombine.high %v231_v24, %v243_v25  ;;  %v5068_v37 = vcombine.low %v231_v24, %v243_v25  ;;  %v5070_v38 = vcombine.low %v232_v26, %v244_v27 }
  0x96   :  { %3141 = vmatpush1.bf16.msra.mxu0 %v5352_v32  ;;  %3223 = vmatpush1.bf16.msra.mxu1 %v5354_v33  ;;  %v5071_v32 = vcombine.high %v232_v26, %v244_v27  ;;  %v255_v33 = vld [vmem:[#allocation6 + $0x550] sm:$0xff] }
  0x97   :  { %3142 = vmatprep.subr.bf16.mxu0 %v5377_v34  ;;  %3224 = vmatprep.subr.bf16.mxu1 %v5379_v35  ;;  %v267_v34 = vld [vmem:[#allocation6 + $0x5b0] sm:$0xff]  ;;  %v256_v35 = vld [vmem:[#allocation6 + $0x558] sm:$0xff] }
  0x98   :  { %v5093_v39 = vcombine.high %v255_v33, %v267_v34  ;;  %v5092_v45 = vcombine.low %v255_v33, %v267_v34  ;;  %v5094_v46 = vcombine.low %v256_v35, %v268_v36 }
  0x9a   :  { %3143 = vmatpush1.bf16.msra.mxu0 %v5376_v40  ;;  %3225 = vmatpush1.bf16.msra.mxu1 %v5378_v42  ;;  %v5095_v40 = vcombine.high %v256_v35, %v268_v36  ;;  %v291_v42 = vld [vmem:[#allocation6 + $0x670] sm:$0xff] }
  0x9b   :  { %3259 = vmatprep.subr.bf16.mxu0 %v4925_v43  ;;  %3341 = vmatprep.subr.bf16.mxu1 %v4927_v44  ;;  %v280_v43 = vld [vmem:[#allocation6 + $0x618] sm:$0xff]  ;;  %v5117_v48 = vcombine.high %v279_v41, %v291_v42  ;;  %v5116_v54 = vcombine.low %v279_v41, %v291_v42 }
  0x9c   :  { %v292_v44 = vld [vmem:[#allocation6 + $0x678] sm:$0xff] }
  0x9d   :  { %5400 = vmatmul.mubr.msk.bf16.vlgmr.msra.gmra.mrb[0].mxu0 %vm3091_vm0, %v6020_v47  ;;  %5401 = vmatmul.mubr.msk.bf16.vlgmr.msra.gmra.mrb[0].mxu1 %vm3091_vm0, %v6020_v47  ;;  %v5119_v49 = vcombine.high %v280_v43, %v292_v44  ;;  %v5118_v55 = vcombine.low %v280_v43, %v292_v44 }
  0x9e   :  { %3260 = vmatpush1.bf16.msra.mxu0 %v4924_v50  ;;  %3342 = vmatpush1.bf16.msra.mxu1 %v4926_v51  ;;  %v303_v50 = vld [vmem:[#allocation6 + $0x6d0] sm:$0xff] }
  0x9f   :  { %3261 = vmatprep.subr.bf16.mxu0 %v4949_v52  ;;  %3343 = vmatprep.subr.bf16.mxu1 %v4951_v53  ;;  %v315_v51 = vld [vmem:[#allocation6 + $0x730] sm:$0xff]  ;;  %v304_v52 = vld [vmem:[#allocation6 + $0x6d8] sm:$0xff] }
  0xa0   :  { %3291 = vmatprep.mubr.bf16.mxu0 %v6010_v57  ;;  %3373 = vmatprep.mubr.bf16.mxu1 %v6010_v57  ;;  %v316_v53 = vld [vmem:[#allocation6 + $0x738] sm:$0xff]  ;;  %v5141_v56 = vcombine.high %v303_v50, %v315_v51  ;;  %v5140_v63 = vcombine.low %v303_v50, %v315_v51 }
  0xa1   :  { %v5143_v58 = vcombine.high %v304_v52, %v316_v53  ;;  %v5142_v0 = vcombine.low %v304_v52, %v316_v53 }
  0xa2   :  { %3262 = vmatpush1.bf16.msra.mxu0 %v4948_v59  ;;  %3344 = vmatpush1.bf16.msra.mxu1 %v4950_v60  ;;  %v327_v59 = vld [vmem:[#allocation6 + $0x790] sm:$0xff] }
  0xa3   :  { %3263 = vmatprep.subr.bf16.mxu0 %v4973_v61  ;;  %3345 = vmatprep.subr.bf16.mxu1 %v4975_v62  ;;  %v339_v60 = vld [vmem:[#allocation6 + $0x7f0] sm:$0xff]  ;;  %v328_v61 = vld [vmem:[#allocation6 + $0x798] sm:$0xff] }
  0xa4   :  { %v340_v62 = vld [vmem:[#allocation6 + $0x7f8] sm:$0xff]  ;;  %v5165_v1 = vcombine.high %v327_v59, %v339_v60  ;;  %v5164_v7 = vcombine.low %v327_v59, %v339_v60 }
  0xa5   :  { %v5167_v2 = vcombine.high %v328_v61, %v340_v62  ;;  %v5166_v8 = vcombine.low %v328_v61, %v340_v62 }
  0xa6   :  { %3264 = vmatpush1.bf16.msra.mxu0 %v4972_v3  ;;  %3346 = vmatpush1.bf16.msra.mxu1 %v4974_v4  ;;  %v351_v3 = vld [vmem:[#allocation6 + $0x850] sm:$0xff] }
  0xa7   :  { %3265 = vmatprep.subr.bf16.mxu0 %v4997_v5  ;;  %3347 = vmatprep.subr.bf16.mxu1 %v4999_v6  ;;  %v363_v4 = vld [vmem:[#allocation6 + $0x8b0] sm:$0xff]  ;;  %v352_v5 = vld [vmem:[#allocation6 + $0x858] sm:$0xff] }
  0xa8   :  { %v364_v6 = vld [vmem:[#allocation6 + $0x8b8] sm:$0xff]  ;;  %v5189_v9 = vcombine.high %v351_v3, %v363_v4  ;;  %v5188_v16 = vcombine.low %v351_v3, %v363_v4 }
  0xa9   :  { %v5191_v10 = vcombine.high %v352_v5, %v364_v6  ;;  %v5190_v17 = vcombine.low %v352_v5, %v364_v6 }
  0xaa   :  { %3266 = vmatpush1.bf16.msra.mxu0 %v4996_v11  ;;  %3348 = vmatpush1.bf16.msra.mxu1 %v4998_v13  ;;  %v375_v11 = vld [vmem:[#allocation6 + $0x910] sm:$0xff] }
  0xab   :  { %3267 = vmatprep.subr.bf16.mxu0 %v5021_v14  ;;  %3349 = vmatprep.subr.bf16.mxu1 %v5023_v15  ;;  %v387_v13 = vld [vmem:[#allocation6 + $0x970] sm:$0xff]  ;;  %v376_v14 = vld [vmem:[#allocation6 + $0x918] sm:$0xff] }
  0xac   :  { %v388_v15 = vld [vmem:[#allocation6 + $0x978] sm:$0xff]  ;;  %v5213_v18 = vcombine.high %v375_v11, %v387_v13  ;;  %v5212_v24 = vcombine.low %v375_v11, %v387_v13 }
  0xad   :  { %v5215_v19 = vcombine.high %v376_v14, %v388_v15  ;;  %v5214_v25 = vcombine.low %v376_v14, %v388_v15 }
  0xae   :  { %3268 = vmatpush1.bf16.msra.mxu0 %v5020_v20  ;;  %3350 = vmatpush1.bf16.msra.mxu1 %v5022_v21  ;;  %v399_v20 = vld [vmem:[#allocation6 + $0x9d0] sm:$0xff] }
  0xaf   :  { %3269 = vmatprep.subr.bf16.mxu0 %v5045_v22  ;;  %3351 = vmatprep.subr.bf16.mxu1 %v5047_v23  ;;  %v411_v21 = vld [vmem:[#allocation6 + $0xa30] sm:$0xff]  ;;  %v400_v22 = vld [vmem:[#allocation6 + $0x9d8] sm:$0xff] }
  0xb0   :  { %v412_v23 = vld [vmem:[#allocation6 + $0xa38] sm:$0xff]  ;;  %v5237_v26 = vcombine.high %v399_v20, %v411_v21  ;;  %v5236_v33 = vcombine.low %v399_v20, %v411_v21 }
  0xb1   :  { %v5239_v27 = vcombine.high %v400_v22, %v412_v23  ;;  %v5238_v34 = vcombine.low %v400_v22, %v412_v23 }
  0xb2   :  { %3270 = vmatpush1.bf16.msra.mxu0 %v5044_v28  ;;  %3352 = vmatpush1.bf16.msra.mxu1 %v5046_v30  ;;  %v423_v28 = vld [vmem:[#allocation6 + $0xa90] sm:$0xff] }
  0xb3   :  { %3271 = vmatprep.subr.bf16.mxu0 %v5069_v31  ;;  %3353 = vmatprep.subr.bf16.mxu1 %v5071_v32  ;;  %v435_v30 = vld [vmem:[#allocation6 + $0xaf0] sm:$0xff]  ;;  %v424_v31 = vld [vmem:[#allocation6 + $0xa98] sm:$0xff] }
  0xb4   :  { %v436_v32 = vld [vmem:[#allocation6 + $0xaf8] sm:$0xff]  ;;  %v5261_v35 = vcombine.high %v423_v28, %v435_v30  ;;  %v5260_v41 = vcombine.low %v423_v28, %v435_v30 }
  0xb5   :  { %v5263_v36 = vcombine.high %v424_v31, %v436_v32  ;;  %v5262_v42 = vcombine.low %v424_v31, %v436_v32 }
  0xb6   :  { %3272 = vmatpush1.bf16.msra.mxu0 %v5068_v37  ;;  %3354 = vmatpush1.bf16.msra.mxu1 %v5070_v38  ;;  %v447_v37 = vld [vmem:[#allocation6 + $0xb50] sm:$0xff] }
  0xb7   :  { %3273 = vmatprep.subr.bf16.mxu0 %v5093_v39  ;;  %3355 = vmatprep.subr.bf16.mxu1 %v5095_v40  ;;  %v459_v38 = vld [vmem:[#allocation6 + $0xbb0] sm:$0xff]  ;;  %v448_v39 = vld [vmem:[#allocation6 + $0xb58] sm:$0xff] }
  0xb8   :  { %v460_v40 = vld [vmem:[#allocation6 + $0xbb8] sm:$0xff]  ;;  %v5285_v43 = vcombine.high %v447_v37, %v459_v38  ;;  %v5284_v50 = vcombine.low %v447_v37, %v459_v38 }
  0xb9   :  { %v5287_v44 = vcombine.high %v448_v39, %v460_v40  ;;  %v5286_v51 = vcombine.low %v448_v39, %v460_v40 }
  0xba   :  { %3274 = vmatpush1.bf16.msra.mxu0 %v5092_v45  ;;  %3356 = vmatpush1.bf16.msra.mxu1 %v5094_v46  ;;  %v471_v45 = vld [vmem:[#allocation6 + $0xc10] sm:$0xff] }
  0xbb   :  { %3275 = vmatprep.subr.bf16.mxu0 %v5117_v48  ;;  %3357 = vmatprep.subr.bf16.mxu1 %v5119_v49  ;;  %v483_v46 = vld [vmem:[#allocation6 + $0xc70] sm:$0xff]  ;;  %v472_v48 = vld [vmem:[#allocation6 + $0xc18] sm:$0xff] }
  0xbc   :  { %v484_v49 = vld [vmem:[#allocation6 + $0xc78] sm:$0xff]  ;;  %v5309_v52 = vcombine.high %v471_v45, %v483_v46  ;;  %v5308_v59 = vcombine.low %v471_v45, %v483_v46 }
  0xbd   :  { %v5311_v53 = vcombine.high %v472_v48, %v484_v49  ;;  %v5310_v60 = vcombine.low %v472_v48, %v484_v49 }
  0xbe   :  { %3276 = vmatpush1.bf16.msra.mxu0 %v5116_v54  ;;  %3358 = vmatpush1.bf16.msra.mxu1 %v5118_v55  ;;  %v495_v54 = vld [vmem:[#allocation6 + $0xcd0] sm:$0xff] }
  0xbf   :  { %3277 = vmatprep.subr.bf16.mxu0 %v5141_v56  ;;  %3359 = vmatprep.subr.bf16.mxu1 %v5143_v58  ;;  %v507_v55 = vld [vmem:[#allocation6 + $0xd30] sm:$0xff]  ;;  %v496_v56 = vld [vmem:[#allocation6 + $0xcd8] sm:$0xff] }
  0xc0   :  { %v508_v58 = vld [vmem:[#allocation6 + $0xd38] sm:$0xff]  ;;  %v5333_v61 = vcombine.high %v495_v54, %v507_v55  ;;  %v5332_v3 = vcombine.low %v495_v54, %v507_v55 }
  0xc1   :  { %v5335_v62 = vcombine.high %v496_v56, %v508_v58  ;;  %v5334_v4 = vcombine.low %v496_v56, %v508_v58 }
  0xc2   :  { %3278 = vmatpush1.bf16.msra.mxu0 %v5140_v63  ;;  %3360 = vmatpush1.bf16.msra.mxu1 %v5142_v0  ;;  %v519_v63 = vld [vmem:[#allocation6 + $0xd90] sm:$0xff] }
  0xc3   :  { %3279 = vmatprep.subr.bf16.mxu0 %v5165_v1  ;;  %3361 = vmatprep.subr.bf16.mxu1 %v5167_v2  ;;  %v531_v0 = vld [vmem:[#allocation6 + $0xdf0] sm:$0xff]  ;;  %v520_v1 = vld [vmem:[#allocation6 + $0xd98] sm:$0xff] }
  0xc4   :  { %v532_v2 = vld [vmem:[#allocation6 + $0xdf8] sm:$0xff]  ;;  %v5357_v5 = vcombine.high %v519_v63, %v531_v0  ;;  %v5356_v11 = vcombine.low %v519_v63, %v531_v0 }
  0xc5   :  { %v5359_v6 = vcombine.high %v520_v1, %v532_v2  ;;  %v5358_v13 = vcombine.low %v520_v1, %v532_v2 }
  0xc6   :  { %3280 = vmatpush1.bf16.msra.mxu0 %v5164_v7  ;;  %3362 = vmatpush1.bf16.msra.mxu1 %v5166_v8  ;;  %v543_v7 = vld [vmem:[#allocation6 + $0xe50] sm:$0xff] }
  0xc7   :  { %3281 = vmatprep.subr.bf16.mxu0 %v5189_v9  ;;  %3363 = vmatprep.subr.bf16.mxu1 %v5191_v10  ;;  %v555_v8 = vld [vmem:[#allocation6 + $0xeb0] sm:$0xff]  ;;  %v544_v9 = vld [vmem:[#allocation6 + $0xe58] sm:$0xff] }
  0xc8   :  { %v556_v10 = vld [vmem:[#allocation6 + $0xeb8] sm:$0xff]  ;;  %v5381_v14 = vcombine.high %v543_v7, %v555_v8  ;;  %v5380_v20 = vcombine.low %v543_v7, %v555_v8 }
  0xc9   :  { %v5383_v15 = vcombine.high %v544_v9, %v556_v10  ;;  %v5382_v21 = vcombine.low %v544_v9, %v556_v10 }
  0xca   :  { %3282 = vmatpush1.bf16.msra.mxu0 %v5188_v16  ;;  %3364 = vmatpush1.bf16.msra.mxu1 %v5190_v17  ;;  %v89_v16 = vld [vmem:[#allocation6 + $0x20] sm:$0xff] }
  0xcb   :  { %3283 = vmatprep.subr.bf16.mxu0 %v5213_v18  ;;  %3365 = vmatprep.subr.bf16.mxu1 %v5215_v19  ;;  %v101_v17 = vld [vmem:[#allocation6 + $0x80] sm:$0xff]  ;;  %v90_v18 = vld [vmem:[#allocation6 + $0x28] sm:$0xff] }
  0xcc   :  { %v102_v19 = vld [vmem:[#allocation6 + $0x88] sm:$0xff]  ;;  %v4929_v22 = vcombine.high %v89_v16, %v101_v17  ;;  %v4928_v28 = vcombine.low %v89_v16, %v101_v17 }
  0xcd   :  { %v4931_v23 = vcombine.high %v90_v18, %v102_v19  ;;  %v4930_v30 = vcombine.low %v90_v18, %v102_v19 }
  0xce   :  { %3284 = vmatpush1.bf16.msra.mxu0 %v5212_v24  ;;  %3366 = vmatpush1.bf16.msra.mxu1 %v5214_v25  ;;  %v113_v24 = vld [vmem:[#allocation6 + $0xe0] sm:$0xff] }
  0xcf   :  { %3285 = vmatprep.subr.bf16.mxu0 %v5237_v26  ;;  %3367 = vmatprep.subr.bf16.mxu1 %v5239_v27  ;;  %v125_v25 = vld [vmem:[#allocation6 + $0x140] sm:$0xff]  ;;  %v114_v26 = vld [vmem:[#allocation6 + $0xe8] sm:$0xff] }
  0xd0   :  { %v126_v27 = vld [vmem:[#allocation6 + $0x148] sm:$0xff]  ;;  %v4953_v31 = vcombine.high %v113_v24, %v125_v25  ;;  %v4952_v37 = vcombine.low %v113_v24, %v125_v25 }
  0xd1   :  { %v4955_v32 = vcombine.high %v114_v26, %v126_v27  ;;  %v4954_v38 = vcombine.low %v114_v26, %v126_v27 }
  0xd2   :  { %3286 = vmatpush1.bf16.msra.mxu0 %v5236_v33  ;;  %3368 = vmatpush1.bf16.msra.mxu1 %v5238_v34  ;;  %v137_v33 = vld [vmem:[#allocation6 + $0x1a0] sm:$0xff] }
  0xd3   :  { %3287 = vmatprep.subr.bf16.mxu0 %v5261_v35  ;;  %3369 = vmatprep.subr.bf16.mxu1 %v5263_v36  ;;  %v149_v34 = vld [vmem:[#allocation6 + $0x200] sm:$0xff]  ;;  %v138_v35 = vld [vmem:[#allocation6 + $0x1a8] sm:$0xff] }
  0xd4   :  { %v150_v36 = vld [vmem:[#allocation6 + $0x208] sm:$0xff]  ;;  %v4977_v39 = vcombine.high %v137_v33, %v149_v34  ;;  %v4976_v45 = vcombine.low %v137_v33, %v149_v34 }
  0xd5   :  { %v4979_v40 = vcombine.high %v138_v35, %v150_v36  ;;  %v4978_v46 = vcombine.low %v138_v35, %v150_v36 }
  0xd6   :  { %3288 = vmatpush1.bf16.msra.mxu0 %v5260_v41  ;;  %3370 = vmatpush1.bf16.msra.mxu1 %v5262_v42  ;;  %v161_v41 = vld [vmem:[#allocation6 + $0x260] sm:$0xff] }
  0xd7   :  { %3289 = vmatprep.subr.bf16.mxu0 %v5285_v43  ;;  %3371 = vmatprep.subr.bf16.mxu1 %v5287_v44  ;;  %v173_v42 = vld [vmem:[#allocation6 + $0x2c0] sm:$0xff]  ;;  %v162_v43 = vld [vmem:[#allocation6 + $0x268] sm:$0xff] }
  0xd8   :  { %v174_v44 = vld [vmem:[#allocation6 + $0x2c8] sm:$0xff]  ;;  %v5001_v48 = vcombine.high %v161_v41, %v173_v42  ;;  %v5000_v54 = vcombine.low %v161_v41, %v173_v42 }
  0xd9   :  { %v5003_v49 = vcombine.high %v162_v43, %v174_v44  ;;  %v5002_v55 = vcombine.low %v162_v43, %v174_v44 }
  0xda   :  { %3290 = vmatpush1.bf16.msra.mxu0 %v5284_v50  ;;  %3372 = vmatpush1.bf16.msra.mxu1 %v5286_v51  ;;  %v185_v50 = vld [vmem:[#allocation6 + $0x320] sm:$0xff] }
  0xdb   :  { %3300 = vmatprep.subr.bf16.mxu0 %v5309_v52  ;;  %3382 = vmatprep.subr.bf16.mxu1 %v5311_v53  ;;  %v197_v51 = vld [vmem:[#allocation6 + $0x380] sm:$0xff]  ;;  %v186_v52 = vld [vmem:[#allocation6 + $0x328] sm:$0xff] }
  0xdc   :  { %v198_v53 = vld [vmem:[#allocation6 + $0x388] sm:$0xff]  ;;  %v5025_v56 = vcombine.high %v185_v50, %v197_v51  ;;  %v5024_v63 = vcombine.low %v185_v50, %v197_v51 }
  0xdd   :  { %3292 = vmatmul.mubr.bf16.vlgmr.msra.gmra.mrb[4].mxu0 %v6014_v12  ;;  %3374 = vmatmul.mubr.bf16.vlgmr.msra.gmra.mrb[4].mxu1 %v6014_v12  ;;  %v5027_v58 = vcombine.high %v186_v52, %v198_v53  ;;  %v5026_v0 = vcombine.low %v186_v52, %v198_v53 }
  0xde   :  { %3301 = vmatpush1.bf16.msra.mxu0 %v5308_v59  ;;  %3383 = vmatpush1.bf16.msra.mxu1 %v5310_v60  ;;  %v209_v59 = vld [vmem:[#allocation6 + $0x3e0] sm:$0xff] }
  0xdf   :  { %3302 = vmatprep.subr.bf16.mxu0 %v5333_v61  ;;  %3384 = vmatprep.subr.bf16.mxu1 %v5335_v62  ;;  %v221_v60 = vld [vmem:[#allocation6 + $0x440] sm:$0xff]  ;;  %v210_v61 = vld [vmem:[#allocation6 + $0x3e8] sm:$0xff] }
  0xe0   :  { %3332 = vmatprep.mubr.bf16.mxu0 %v5930_v29  ;;  %3414 = vmatprep.mubr.bf16.mxu1 %v5930_v29  ;;  %v222_v62 = vld [vmem:[#allocation6 + $0x448] sm:$0xff]  ;;  %v5049_v1 = vcombine.high %v209_v59, %v221_v60  ;;  %v5048_v7 = vcombine.low %v209_v59, %v221_v60 }
  0xe1   :  { %v5051_v2 = vcombine.high %v210_v61, %v222_v62  ;;  %v5050_v8 = vcombine.low %v210_v61, %v222_v62 }
  0xe2   :  { %3303 = vmatpush1.bf16.msra.mxu0 %v5332_v3  ;;  %3385 = vmatpush1.bf16.msra.mxu1 %v5334_v4  ;;  %v233_v3 = vld [vmem:[#allocation6 + $0x4a0] sm:$0xff] }
  0xe3   :  { %3304 = vmatprep.subr.bf16.mxu0 %v5357_v5  ;;  %3386 = vmatprep.subr.bf16.mxu1 %v5359_v6  ;;  %v245_v4 = vld [vmem:[#allocation6 + $0x500] sm:$0xff]  ;;  %v234_v5 = vld [vmem:[#allocation6 + $0x4a8] sm:$0xff] }
  0xe4   :  { %v246_v6 = vld [vmem:[#allocation6 + $0x508] sm:$0xff]  ;;  %v5073_v9 = vcombine.high %v233_v3, %v245_v4  ;;  %v5072_v16 = vcombine.low %v233_v3, %v245_v4 }
  0xe5   :  { %v5075_v10 = vcombine.high %v234_v5, %v246_v6  ;;  %v5074_v17 = vcombine.low %v234_v5, %v246_v6 }
  0xe6   :  { %3305 = vmatpush1.bf16.msra.mxu0 %v5356_v11  ;;  %3387 = vmatpush1.bf16.msra.mxu1 %v5358_v13  ;;  %v257_v11 = vld [vmem:[#allocation6 + $0x560] sm:$0xff] }
  0xe7   :  { %3306 = vmatprep.subr.bf16.mxu0 %v5381_v14  ;;  %3388 = vmatprep.subr.bf16.mxu1 %v5383_v15  ;;  %v269_v13 = vld [vmem:[#allocation6 + $0x5c0] sm:$0xff]  ;;  %v258_v14 = vld [vmem:[#allocation6 + $0x568] sm:$0xff] }
  0xe8   :  { %v270_v15 = vld [vmem:[#allocation6 + $0x5c8] sm:$0xff]  ;;  %v5097_v18 = vcombine.high %v257_v11, %v269_v13  ;;  %v5096_v24 = vcombine.low %v257_v11, %v269_v13 }
  0xe9   :  { %v5099_v19 = vcombine.high %v258_v14, %v270_v15  ;;  %v5098_v25 = vcombine.low %v258_v14, %v270_v15 }
  0xea   :  { %3307 = vmatpush1.bf16.msra.mxu0 %v5380_v20  ;;  %3389 = vmatpush1.bf16.msra.mxu1 %v5382_v21  ;;  %v281_v20 = vld [vmem:[#allocation6 + $0x620] sm:$0xff] }
  0xeb   :  { %3423 = vmatprep.subr.bf16.mxu0 %v4929_v22  ;;  %3505 = vmatprep.subr.bf16.mxu1 %v4931_v23  ;;  %v293_v21 = vld [vmem:[#allocation6 + $0x680] sm:$0xff]  ;;  %v282_v22 = vld [vmem:[#allocation6 + $0x628] sm:$0xff] }
  0xec   :  { %v294_v23 = vld [vmem:[#allocation6 + $0x688] sm:$0xff]  ;;  %v5121_v26 = vcombine.high %v281_v20, %v293_v21  ;;  %v5120_v33 = vcombine.low %v281_v20, %v293_v21 }
  0xed   :  { %5402 = vmatmul.mubr.msk.bf16.vlgmr.msra.gmra.mrb[4].mxu0 %vm3091_vm0, %v6020_v47  ;;  %5403 = vmatmul.mubr.msk.bf16.vlgmr.msra.gmra.mrb[4].mxu1 %vm3091_vm0, %v6020_v47  ;;  %v5123_v27 = vcombine.high %v282_v22, %v294_v23  ;;  %v5122_v34 = vcombine.low %v282_v22, %v294_v23 }
  0xee   :  { %3424 = vmatpush1.bf16.msra.mxu0 %v4928_v28  ;;  %3506 = vmatpush1.bf16.msra.mxu1 %v4930_v30  ;;  %v305_v28 = vld [vmem:[#allocation6 + $0x6e0] sm:$0xff] }
  0xef   :  { %3425 = vmatprep.subr.bf16.mxu0 %v4953_v31  ;;  %3507 = vmatprep.subr.bf16.mxu1 %v4955_v32  ;;  %v317_v30 = vld [vmem:[#allocation6 + $0x740] sm:$0xff]  ;;  %v306_v31 = vld [vmem:[#allocation6 + $0x6e8] sm:$0xff] }
  0xf0   :  { %3455 = vmatprep.mubr.bf16.mxu0 %v6010_v57  ;;  %3537 = vmatprep.mubr.bf16.mxu1 %v6010_v57  ;;  %v318_v32 = vld [vmem:[#allocation6 + $0x748] sm:$0xff]  ;;  %v5145_v35 = vcombine.high %v305_v28, %v317_v30  ;;  %v5144_v41 = vcombine.low %v305_v28, %v317_v30 }
  0xf1   :  { %v5147_v36 = vcombine.high %v306_v31, %v318_v32  ;;  %v5146_v42 = vcombine.low %v306_v31, %v318_v32 }
  0xf2   :  { %3426 = vmatpush1.bf16.msra.mxu0 %v4952_v37  ;;  %3508 = vmatpush1.bf16.msra.mxu1 %v4954_v38  ;;  %v329_v37 = vld [vmem:[#allocation6 + $0x7a0] sm:$0xff] }
  0xf3   :  { %3427 = vmatprep.subr.bf16.mxu0 %v4977_v39  ;;  %3509 = vmatprep.subr.bf16.mxu1 %v4979_v40  ;;  %v341_v38 = vld [vmem:[#allocation6 + $0x800] sm:$0xff]  ;;  %v330_v39 = vld [vmem:[#allocation6 + $0x7a8] sm:$0xff] }
  0xf4   :  { %v342_v40 = vld [vmem:[#allocation6 + $0x808] sm:$0xff]  ;;  %v5169_v43 = vcombine.high %v329_v37, %v341_v38  ;;  %v5168_v50 = vcombine.low %v329_v37, %v341_v38 }
  0xf5   :  { %v5171_v44 = vcombine.high %v330_v39, %v342_v40  ;;  %v5170_v51 = vcombine.low %v330_v39, %v342_v40 }
  0xf6   :  { %3428 = vmatpush1.bf16.msra.mxu0 %v4976_v45  ;;  %3510 = vmatpush1.bf16.msra.mxu1 %v4978_v46  ;;  %v353_v45 = vld [vmem:[#allocation6 + $0x860] sm:$0xff] }
  0xf7   :  { %3429 = vmatprep.subr.bf16.mxu0 %v5001_v48  ;;  %3511 = vmatprep.subr.bf16.mxu1 %v5003_v49  ;;  %v365_v46 = vld [vmem:[#allocation6 + $0x8c0] sm:$0xff]  ;;  %v354_v48 = vld [vmem:[#allocation6 + $0x868] sm:$0xff] }
  0xf8   :  { %v366_v49 = vld [vmem:[#allocation6 + $0x8c8] sm:$0xff]  ;;  %v5193_v52 = vcombine.high %v353_v45, %v365_v46  ;;  %v5192_v59 = vcombine.low %v353_v45, %v365_v46 }
  0xf9   :  { %v5195_v53 = vcombine.high %v354_v48, %v366_v49  ;;  %v5194_v60 = vcombine.low %v354_v48, %v366_v49 }
  0xfa   :  { %3430 = vmatpush1.bf16.msra.mxu0 %v5000_v54  ;;  %3512 = vmatpush1.bf16.msra.mxu1 %v5002_v55  ;;  %v377_v54 = vld [vmem:[#allocation6 + $0x920] sm:$0xff] }
  0xfb   :  { %3431 = vmatprep.subr.bf16.mxu0 %v5025_v56  ;;  %3513 = vmatprep.subr.bf16.mxu1 %v5027_v58  ;;  %v389_v55 = vld [vmem:[#allocation6 + $0x980] sm:$0xff]  ;;  %v378_v56 = vld [vmem:[#allocation6 + $0x928] sm:$0xff] }
  0xfc   :  { %v390_v58 = vld [vmem:[#allocation6 + $0x988] sm:$0xff]  ;;  %v5217_v61 = vcombine.high %v377_v54, %v389_v55  ;;  %v5216_v3 = vcombine.low %v377_v54, %v389_v55 }
  0xfd   :  { %v5219_v62 = vcombine.high %v378_v56, %v390_v58  ;;  %v5218_v4 = vcombine.low %v378_v56, %v390_v58 }
  0xfe   :  { %3432 = vmatpush1.bf16.msra.mxu0 %v5024_v63  ;;  %3514 = vmatpush1.bf16.msra.mxu1 %v5026_v0  ;;  %v401_v63 = vld [vmem:[#allocation6 + $0x9e0] sm:$0xff] }
  0xff   :  { %3433 = vmatprep.subr.bf16.mxu0 %v5049_v1  ;;  %3515 = vmatprep.subr.bf16.mxu1 %v5051_v2  ;;  %v413_v0 = vld [vmem:[#allocation6 + $0xa40] sm:$0xff]  ;;  %v402_v1 = vld [vmem:[#allocation6 + $0x9e8] sm:$0xff] }
 0x100   :  { %v414_v2 = vld [vmem:[#allocation6 + $0xa48] sm:$0xff]  ;;  %v5241_v5 = vcombine.high %v401_v63, %v413_v0  ;;  %v5240_v11 = vcombine.low %v401_v63, %v413_v0 }
 0x101   :  { %v5243_v6 = vcombine.high %v402_v1, %v414_v2  ;;  %v5242_v13 = vcombine.low %v402_v1, %v414_v2 }
 0x102   :  { %3434 = vmatpush1.bf16.msra.mxu0 %v5048_v7  ;;  %3516 = vmatpush1.bf16.msra.mxu1 %v5050_v8  ;;  %v425_v7 = vld [vmem:[#allocation6 + $0xaa0] sm:$0xff] }
 0x103   :  { %3435 = vmatprep.subr.bf16.mxu0 %v5073_v9  ;;  %3517 = vmatprep.subr.bf16.mxu1 %v5075_v10  ;;  %v437_v8 = vld [vmem:[#allocation6 + $0xb00] sm:$0xff]  ;;  %v426_v9 = vld [vmem:[#allocation6 + $0xaa8] sm:$0xff] }
 0x104   :  { %v438_v10 = vld [vmem:[#allocation6 + $0xb08] sm:$0xff]  ;;  %v5265_v14 = vcombine.high %v425_v7, %v437_v8  ;;  %v5264_v20 = vcombine.low %v425_v7, %v437_v8 }
 0x105   :  { %v5267_v15 = vcombine.high %v426_v9, %v438_v10  ;;  %v5266_v21 = vcombine.low %v426_v9, %v438_v10 }
 0x106   :  { %3436 = vmatpush1.bf16.msra.mxu0 %v5072_v16  ;;  %3518 = vmatpush1.bf16.msra.mxu1 %v5074_v17  ;;  %v449_v16 = vld [vmem:[#allocation6 + $0xb60] sm:$0xff] }
 0x107   :  { %3437 = vmatprep.subr.bf16.mxu0 %v5097_v18  ;;  %3519 = vmatprep.subr.bf16.mxu1 %v5099_v19  ;;  %v461_v17 = vld [vmem:[#allocation6 + $0xbc0] sm:$0xff]  ;;  %v450_v18 = vld [vmem:[#allocation6 + $0xb68] sm:$0xff] }
 0x108   :  { %v462_v19 = vld [vmem:[#allocation6 + $0xbc8] sm:$0xff]  ;;  %v5289_v22 = vcombine.high %v449_v16, %v461_v17  ;;  %v5288_v28 = vcombine.low %v449_v16, %v461_v17 }
 0x109   :  { %v5291_v23 = vcombine.high %v450_v18, %v462_v19  ;;  %v5290_v30 = vcombine.low %v450_v18, %v462_v19 }
 0x10a   :  { %3438 = vmatpush1.bf16.msra.mxu0 %v5096_v24  ;;  %3520 = vmatpush1.bf16.msra.mxu1 %v5098_v25  ;;  %v473_v24 = vld [vmem:[#allocation6 + $0xc20] sm:$0xff] }
 0x10b   :  { %3439 = vmatprep.subr.bf16.mxu0 %v5121_v26  ;;  %3521 = vmatprep.subr.bf16.mxu1 %v5123_v27  ;;  %v485_v25 = vld [vmem:[#allocation6 + $0xc80] sm:$0xff]  ;;  %v474_v26 = vld [vmem:[#allocation6 + $0xc28] sm:$0xff] }
 0x10c   :  { %v486_v27 = vld [vmem:[#allocation6 + $0xc88] sm:$0xff]  ;;  %v5313_v31 = vcombine.high %v473_v24, %v485_v25  ;;  %v5312_v37 = vcombine.low %v473_v24, %v485_v25 }
 0x10d   :  { %v5315_v32 = vcombine.high %v474_v26, %v486_v27  ;;  %v5314_v38 = vcombine.low %v474_v26, %v486_v27 }
 0x10e   :  { %3440 = vmatpush1.bf16.msra.mxu0 %v5120_v33  ;;  %3522 = vmatpush1.bf16.msra.mxu1 %v5122_v34  ;;  %v497_v33 = vld [vmem:[#allocation6 + $0xce0] sm:$0xff] }
 0x10f   :  { %3441 = vmatprep.subr.bf16.mxu0 %v5145_v35  ;;  %3523 = vmatprep.subr.bf16.mxu1 %v5147_v36  ;;  %v509_v34 = vld [vmem:[#allocation6 + $0xd40] sm:$0xff]  ;;  %v498_v35 = vld [vmem:[#allocation6 + $0xce8] sm:$0xff] }
 0x110   :  { %v510_v36 = vld [vmem:[#allocation6 + $0xd48] sm:$0xff]  ;;  %v5337_v39 = vcombine.high %v497_v33, %v509_v34  ;;  %v5336_v45 = vcombine.low %v497_v33, %v509_v34 }
 0x111   :  { %v5339_v40 = vcombine.high %v498_v35, %v510_v36  ;;  %v5338_v46 = vcombine.low %v498_v35, %v510_v36 }
 0x112   :  { %3442 = vmatpush1.bf16.msra.mxu0 %v5144_v41  ;;  %3524 = vmatpush1.bf16.msra.mxu1 %v5146_v42  ;;  %v521_v41 = vld [vmem:[#allocation6 + $0xda0] sm:$0xff] }
 0x113   :  { %3443 = vmatprep.subr.bf16.mxu0 %v5169_v43  ;;  %3525 = vmatprep.subr.bf16.mxu1 %v5171_v44  ;;  %v533_v42 = vld [vmem:[#allocation6 + $0xe00] sm:$0xff]  ;;  %v522_v43 = vld [vmem:[#allocation6 + $0xda8] sm:$0xff] }
 0x114   :  { %v534_v44 = vld [vmem:[#allocation6 + $0xe08] sm:$0xff]  ;;  %v5361_v48 = vcombine.high %v521_v41, %v533_v42  ;;  %v5360_v54 = vcombine.low %v521_v41, %v533_v42 }
 0x115   :  { %v5363_v49 = vcombine.high %v522_v43, %v534_v44  ;;  %v5362_v55 = vcombine.low %v522_v43, %v534_v44 }
 0x116   :  { %3444 = vmatpush1.bf16.msra.mxu0 %v5168_v50  ;;  %3526 = vmatpush1.bf16.msra.mxu1 %v5170_v51  ;;  %v545_v50 = vld [vmem:[#allocation6 + $0xe60] sm:$0xff] }
 0x117   :  { %3445 = vmatprep.subr.bf16.mxu0 %v5193_v52  ;;  %3527 = vmatprep.subr.bf16.mxu1 %v5195_v53  ;;  %v557_v51 = vld [vmem:[#allocation6 + $0xec0] sm:$0xff]  ;;  %v546_v52 = vld [vmem:[#allocation6 + $0xe68] sm:$0xff] }
 0x118   :  { %v558_v53 = vld [vmem:[#allocation6 + $0xec8] sm:$0xff]  ;;  %v5385_v56 = vcombine.high %v545_v50, %v557_v51  ;;  %v5384_v63 = vcombine.low %v545_v50, %v557_v51 }
 0x119   :  { %v5387_v58 = vcombine.high %v546_v52, %v558_v53  ;;  %v5386_v0 = vcombine.low %v546_v52, %v558_v53 }
 0x11a   :  { %3446 = vmatpush1.bf16.msra.mxu0 %v5192_v59  ;;  %3528 = vmatpush1.bf16.msra.mxu1 %v5194_v60  ;;  %v91_v59 = vld [vmem:[#allocation6 + $0x30] sm:$0xff] }
 0x11b   :  { %3447 = vmatprep.subr.bf16.mxu0 %v5217_v61  ;;  %3529 = vmatprep.subr.bf16.mxu1 %v5219_v62  ;;  %v103_v60 = vld [vmem:[#allocation6 + $0x90] sm:$0xff]  ;;  %v92_v61 = vld [vmem:[#allocation6 + $0x38] sm:$0xff] }
 0x11c   :  { %v104_v62 = vld [vmem:[#allocation6 + $0x98] sm:$0xff]  ;;  %v4933_v1 = vcombine.high %v91_v59, %v103_v60  ;;  %v4932_v7 = vcombine.low %v91_v59, %v103_v60 }
 0x11d   :  { %v4935_v2 = vcombine.high %v92_v61, %v104_v62  ;;  %v4934_v8 = vcombine.low %v92_v61, %v104_v62 }
 0x11e   :  { %3448 = vmatpush1.bf16.msra.mxu0 %v5216_v3  ;;  %3530 = vmatpush1.bf16.msra.mxu1 %v5218_v4  ;;  %v115_v3 = vld [vmem:[#allocation6 + $0xf0] sm:$0xff] }
 0x11f   :  { %3449 = vmatprep.subr.bf16.mxu0 %v5241_v5  ;;  %3531 = vmatprep.subr.bf16.mxu1 %v5243_v6  ;;  %v127_v4 = vld [vmem:[#allocation6 + $0x150] sm:$0xff]  ;;  %v116_v5 = vld [vmem:[#allocation6 + $0xf8] sm:$0xff] }
 0x120   :  { %v128_v6 = vld [vmem:[#allocation6 + $0x158] sm:$0xff]  ;;  %v4957_v9 = vcombine.high %v115_v3, %v127_v4  ;;  %v4956_v16 = vcombine.low %v115_v3, %v127_v4 }
 0x121   :  { %v4959_v10 = vcombine.high %v116_v5, %v128_v6  ;;  %v4958_v17 = vcombine.low %v116_v5, %v128_v6 }
 0x122   :  { %3450 = vmatpush1.bf16.msra.mxu0 %v5240_v11  ;;  %3532 = vmatpush1.bf16.msra.mxu1 %v5242_v13  ;;  %v139_v11 = vld [vmem:[#allocation6 + $0x1b0] sm:$0xff] }
 0x123   :  { %3451 = vmatprep.subr.bf16.mxu0 %v5265_v14  ;;  %3533 = vmatprep.subr.bf16.mxu1 %v5267_v15  ;;  %v151_v13 = vld [vmem:[#allocation6 + $0x210] sm:$0xff]  ;;  %v140_v14 = vld [vmem:[#allocation6 + $0x1b8] sm:$0xff] }
 0x124   :  { %v152_v15 = vld [vmem:[#allocation6 + $0x218] sm:$0xff]  ;;  %v4981_v18 = vcombine.high %v139_v11, %v151_v13  ;;  %v4980_v24 = vcombine.low %v139_v11, %v151_v13 }
 0x125   :  { %v4983_v19 = vcombine.high %v140_v14, %v152_v15  ;;  %v4982_v25 = vcombine.low %v140_v14, %v152_v15 }
 0x126   :  { %3452 = vmatpush1.bf16.msra.mxu0 %v5264_v20  ;;  %3534 = vmatpush1.bf16.msra.mxu1 %v5266_v21  ;;  %v163_v20 = vld [vmem:[#allocation6 + $0x270] sm:$0xff] }
 0x127   :  { %3453 = vmatprep.subr.bf16.mxu0 %v5289_v22  ;;  %3535 = vmatprep.subr.bf16.mxu1 %v5291_v23  ;;  %v175_v21 = vld [vmem:[#allocation6 + $0x2d0] sm:$0xff]  ;;  %v164_v22 = vld [vmem:[#allocation6 + $0x278] sm:$0xff] }
 0x128   :  { %v176_v23 = vld [vmem:[#allocation6 + $0x2d8] sm:$0xff]  ;;  %v5005_v26 = vcombine.high %v163_v20, %v175_v21  ;;  %v5004_v33 = vcombine.low %v163_v20, %v175_v21 }
 0x129   :  { %v5007_v27 = vcombine.high %v164_v22, %v176_v23  ;;  %v5006_v34 = vcombine.low %v164_v22, %v176_v23 }
 0x12a   :  { %3454 = vmatpush1.bf16.msra.mxu0 %v5288_v28  ;;  %3536 = vmatpush1.bf16.msra.mxu1 %v5290_v30  ;;  %v187_v28 = vld [vmem:[#allocation6 + $0x330] sm:$0xff] }
 0x12b   :  { %3464 = vmatprep.subr.bf16.mxu0 %v5313_v31  ;;  %3546 = vmatprep.subr.bf16.mxu1 %v5315_v32  ;;  %v199_v30 = vld [vmem:[#allocation6 + $0x390] sm:$0xff]  ;;  %v188_v31 = vld [vmem:[#allocation6 + $0x338] sm:$0xff] }
 0x12c   :  { %v200_v32 = vld [vmem:[#allocation6 + $0x398] sm:$0xff]  ;;  %v5029_v35 = vcombine.high %v187_v28, %v199_v30  ;;  %v5028_v41 = vcombine.low %v187_v28, %v199_v30  ;;  %v571_v28 = vlaneseq }
 0x12d   :  { %3456 = vmatmul.mubr.bf16.vlgmr.msra.gmra.mrb[8].mxu0 %v6014_v12  ;;  %3538 = vmatmul.mubr.bf16.vlgmr.msra.gmra.mrb[8].mxu1 %v6014_v12  ;;  %v5031_v36 = vcombine.high %v188_v31, %v200_v32  ;;  %v5030_v42 = vcombine.low %v188_v31, %v200_v32 }
 0x12e   :  { %3465 = vmatpush1.bf16.msra.mxu0 %v5312_v37  ;;  %3547 = vmatpush1.bf16.msra.mxu1 %v5314_v38  ;;  %v211_v37 = vld [vmem:[#allocation6 + $0x3f0] sm:$0xff] }
 0x12f   :  { %3466 = vmatprep.subr.bf16.mxu0 %v5337_v39  ;;  %3548 = vmatprep.subr.bf16.mxu1 %v5339_v40  ;;  %v223_v38 = vld [vmem:[#allocation6 + $0x450] sm:$0xff]  ;;  %v212_v39 = vld [vmem:[#allocation6 + $0x3f8] sm:$0xff] }
 0x130   :  { %3496 = vmatprep.mubr.bf16.mxu0 %v5930_v29  ;;  %3578 = vmatprep.mubr.bf16.mxu1 %v5930_v29  ;;  %v224_v40 = vld [vmem:[#allocation6 + $0x458] sm:$0xff]  ;;  %v5053_v43 = vcombine.high %v211_v37, %v223_v38  ;;  %v5052_v50 = vcombine.low %v211_v37, %v223_v38  ;;  %v6048_v38 = vshrl.u32 %v571_v28, 7 }
 0x131   :  { %v5055_v44 = vcombine.high %v212_v39, %v224_v40  ;;  %v5054_v51 = vcombine.low %v212_v39, %v224_v40  ;;  %v392_v37 = vld [vmem:[#allocation6 + $0x998] sm:$0xff] }
 0x132   :  { %3467 = vmatpush1.bf16.msra.mxu0 %v5336_v45  ;;  %3549 = vmatpush1.bf16.msra.mxu1 %v5338_v46  ;;  %v235_v45 = vld [vmem:[#allocation6 + $0x4b0] sm:$0xff] }
 0x133   :  { %3468 = vmatprep.subr.bf16.mxu0 %v5361_v48  ;;  %3550 = vmatprep.subr.bf16.mxu1 %v5363_v49  ;;  %v247_v46 = vld [vmem:[#allocation6 + $0x510] sm:$0xff]  ;;  %v236_v48 = vld [vmem:[#allocation6 + $0x4b8] sm:$0xff] }
 0x134   :  { %v248_v49 = vld [vmem:[#allocation6 + $0x518] sm:$0xff]  ;;  %v5077_v52 = vcombine.high %v235_v45, %v247_v46  ;;  %v5076_v59 = vcombine.low %v235_v45, %v247_v46  ;;  %v6051_v45 = vsub.s32 0, %v6048_v38 }
 0x135   :  { %v5079_v53 = vcombine.high %v236_v48, %v248_v49  ;;  %v5078_v60 = vcombine.low %v236_v48, %v248_v49  ;;  %v404_v46 = vld [vmem:[#allocation6 + $0x9f8] sm:$0xff] }
 0x136   :  { %3469 = vmatpush1.bf16.msra.mxu0 %v5360_v54  ;;  %3551 = vmatpush1.bf16.msra.mxu1 %v5362_v55  ;;  %v259_v54 = vld [vmem:[#allocation6 + $0x570] sm:$0xff]  ;;  %v416_v48 = vld [vmem:[#allocation6 + $0xa58] sm:$0xff] }
 0x137   :  { %3470 = vmatprep.subr.bf16.mxu0 %v5385_v56  ;;  %3552 = vmatprep.subr.bf16.mxu1 %v5387_v58  ;;  %v271_v55 = vld [vmem:[#allocation6 + $0x5d0] sm:$0xff]  ;;  %v260_v56 = vld [vmem:[#allocation6 + $0x578] sm:$0xff] }
 0x138   :  { %v272_v58 = vld [vmem:[#allocation6 + $0x5d8] sm:$0xff]  ;;  %v5101_v61 = vcombine.high %v259_v54, %v271_v55  ;;  %v5100_v3 = vcombine.low %v259_v54, %v271_v55  ;;  %v6062_v54 = vsub.s32 3, %v6048_v38 }
 0x139   :  { %v5103_v62 = vcombine.high %v260_v56, %v272_v58  ;;  %v5102_v4 = vcombine.low %v260_v56, %v272_v58  ;;  %v5247_v56 = vcombine.high %v404_v46, %v416_v48  ;;  %v427_v58 = vld [vmem:[#allocation6 + $0xab0] sm:$0xff] }
 0x13a   :  { %3471 = vmatpush1.bf16.msra.mxu0 %v5384_v63  ;;  %3553 = vmatpush1.bf16.msra.mxu1 %v5386_v0  ;;  %v283_v63 = vld [vmem:[#allocation6 + $0x630] sm:$0xff] }
 0x13b   :  { %3587 = vmatprep.subr.bf16.mxu0 %v4933_v1  ;;  %3669 = vmatprep.subr.bf16.mxu1 %v4935_v2  ;;  %v295_v0 = vld [vmem:[#allocation6 + $0x690] sm:$0xff]  ;;  %v284_v1 = vld [vmem:[#allocation6 + $0x638] sm:$0xff] }
 0x13c   :  { %v296_v2 = vld [vmem:[#allocation6 + $0x698] sm:$0xff]  ;;  %v5125_v5 = vcombine.high %v283_v63, %v295_v0  ;;  %v5124_v11 = vcombine.low %v283_v63, %v295_v0 }
 0x13d   :  { %5404 = vmatmul.mubr.msk.bf16.vlgmr.msra.gmra.mrb[8].mxu0 %vm3091_vm0, %v6020_v47  ;;  %5405 = vmatmul.mubr.msk.bf16.vlgmr.msra.gmra.mrb[8].mxu1 %vm3091_vm0, %v6020_v47  ;;  %v5127_v6 = vcombine.high %v284_v1, %v296_v2  ;;  %v5126_v13 = vcombine.low %v284_v1, %v296_v2 }
 0x13e   :  { %3588 = vmatpush1.bf16.msra.mxu0 %v4932_v7  ;;  %3670 = vmatpush1.bf16.msra.mxu1 %v4934_v8  ;;  %v307_v7 = vld [vmem:[#allocation6 + $0x6f0] sm:$0xff] }
 0x13f   :  { %3589 = vmatprep.subr.bf16.mxu0 %v4957_v9  ;;  %3671 = vmatprep.subr.bf16.mxu1 %v4959_v10  ;;  %v319_v8 = vld [vmem:[#allocation6 + $0x750] sm:$0xff]  ;;  %v308_v9 = vld [vmem:[#allocation6 + $0x6f8] sm:$0xff] }
 0x140   :  { %3619 = vmatprep.mubr.bf16.mxu0 %v6010_v57  ;;  %3701 = vmatprep.mubr.bf16.mxu1 %v6010_v57  ;;  %v320_v10 = vld [vmem:[#allocation6 + $0x758] sm:$0xff]  ;;  %v5149_v14 = vcombine.high %v307_v7, %v319_v8  ;;  %v5148_v20 = vcombine.low %v307_v7, %v319_v8  ;;  %v451_v7 = vld [vmem:[#allocation6 + $0xb70] sm:$0xff] }
 0x141   :  { %v5151_v15 = vcombine.high %v308_v9, %v320_v10  ;;  %v5150_v21 = vcombine.low %v308_v9, %v320_v10  ;;  %v463_v8 = vld [vmem:[#allocation6 + $0xbd0] sm:$0xff] }
 0x142   :  { %3590 = vmatpush1.bf16.msra.mxu0 %v4956_v16  ;;  %3672 = vmatpush1.bf16.msra.mxu1 %v4958_v17  ;;  %v331_v16 = vld [vmem:[#allocation6 + $0x7b0] sm:$0xff] }
 0x143   :  { %3591 = vmatprep.subr.bf16.mxu0 %v4981_v18  ;;  %3673 = vmatprep.subr.bf16.mxu1 %v4983_v19  ;;  %v343_v17 = vld [vmem:[#allocation6 + $0x810] sm:$0xff]  ;;  %v332_v18 = vld [vmem:[#allocation6 + $0x7b8] sm:$0xff] }
 0x144   :  { %v344_v19 = vld [vmem:[#allocation6 + $0x818] sm:$0xff]  ;;  %v5173_v22 = vcombine.high %v331_v16, %v343_v17  ;;  %v5172_v30 = vcombine.low %v331_v16, %v343_v17 }
 0x145   :  { %v5175_v23 = vcombine.high %v332_v18, %v344_v19  ;;  %v5174_v31 = vcombine.low %v332_v18, %v344_v19 }
 0x146   :  { %3592 = vmatpush1.bf16.msra.mxu0 %v4980_v24  ;;  %3674 = vmatpush1.bf16.msra.mxu1 %v4982_v25  ;;  %v355_v24 = vld [vmem:[#allocation6 + $0x870] sm:$0xff] }
 0x147   :  { %3593 = vmatprep.subr.bf16.mxu0 %v5005_v26  ;;  %3675 = vmatprep.subr.bf16.mxu1 %v5007_v27  ;;  %v367_v25 = vld [vmem:[#allocation6 + $0x8d0] sm:$0xff]  ;;  %v356_v26 = vld [vmem:[#allocation6 + $0x878] sm:$0xff] }
 0x148   :  { %v368_v27 = vld [vmem:[#allocation6 + $0x8d8] sm:$0xff]  ;;  %v5197_v32 = vcombine.high %v355_v24, %v367_v25  ;;  %v5196_v39 = vcombine.low %v355_v24, %v367_v25  ;;  %v5293_v25 = vcombine.high %v451_v7, %v463_v8 }
 0x149   :  { %v5198_v40 = vcombine.low %v356_v26, %v368_v27 }
 0x14a   :  { %3594 = vmatpush1.bf16.msra.mxu0 %v5004_v33  ;;  %3676 = vmatpush1.bf16.msra.mxu1 %v5006_v34  ;;  %v5199_v33 = vcombine.high %v356_v26, %v368_v27  ;;  %v379_v34 = vld [vmem:[#allocation6 + $0x930] sm:$0xff] }
 0x14b   :  { %3595 = vmatprep.subr.bf16.mxu0 %v5029_v35  ;;  %3677 = vmatprep.subr.bf16.mxu1 %v5031_v36  ;;  %v391_v35 = vld [vmem:[#allocation6 + $0x990] sm:$0xff]  ;;  %v380_v36 = vld [vmem:[#allocation6 + $0x938] sm:$0xff] }
 0x14c   :  { %v5220_v49 = vcombine.low %v379_v34, %v391_v35 }
 0x14e   :  { %3596 = vmatpush1.bf16.msra.mxu0 %v5028_v41  ;;  %3678 = vmatpush1.bf16.msra.mxu1 %v5030_v42  ;;  %v5221_v41 = vcombine.high %v379_v34, %v391_v35  ;;  %v5223_v42 = vcombine.high %v380_v36, %v392_v37  ;;  %v476_v34 = vld [vmem:[#allocation6 + $0xc38] sm:$0xff] }
 0x14f   :  { %3597 = vmatprep.subr.bf16.mxu0 %v5053_v43  ;;  %3679 = vmatprep.subr.bf16.mxu1 %v5055_v44  ;;  %v403_v43 = vld [vmem:[#allocation6 + $0x9f0] sm:$0xff]  ;;  %v488_v35 = vld [vmem:[#allocation6 + $0xc98] sm:$0xff] }
 0x150   :  { %v415_v44 = vld [vmem:[#allocation6 + $0xa50] sm:$0xff] }
 0x151   :  { %v5245_v55 = vcombine.high %v403_v43, %v415_v44  ;;  %v5244_v1 = vcombine.low %v403_v43, %v415_v44  ;;  %v500_v43 = vld [vmem:[#allocation6 + $0xcf8] sm:$0xff] }
 0x152   :  { %3598 = vmatpush1.bf16.msra.mxu0 %v5052_v50  ;;  %3680 = vmatpush1.bf16.msra.mxu1 %v5054_v51  ;;  %v6053_v50 = vld [vmem:[#allocation8] sm:$0xff]  ;;  %v6056_v51 = vsub.s32 2, %v6048_v38  ;;  %v512_v44 = vld [vmem:[#allocation6 + $0xd58] sm:$0xff] }
 0x153   :  { %3599 = vmatprep.subr.bf16.mxu0 %v5077_v52  ;;  %3681 = vmatprep.subr.bf16.mxu1 %v5079_v53  ;;  %v6059_v52 = vsub.s32 1, %v6048_v38  ;;  %v5222_v53 = vcombine.low %v380_v36, %v392_v37  ;;  %v586_v2 = vrot.slane %v6053_v50, %v6062_v54  ;;  %v5292_v36 = vcombine.low %v451_v7, %v463_v8 }
 0x154   :  { %v582_v63 = vrot.slane %v6053_v50, %v6056_v51 }
 0x155   :  { %v578_v0 = vrot.slane %v6053_v50, %v6059_v52 }
 0x156   :  { %3600 = vmatpush1.bf16.msra.mxu0 %v5076_v59  ;;  %3682 = vmatpush1.bf16.msra.mxu1 %v5078_v60  ;;  %v439_v59 = vld [vmem:[#allocation6 + $0xb10] sm:$0xff]  ;;  %v574_v60 = vrot.slane %v6053_v50, %v6051_v45 }
 0x157   :  { %3601 = vmatprep.subr.bf16.mxu0 %v5101_v61  ;;  %3683 = vmatprep.subr.bf16.mxu1 %v5103_v62  ;;  %v428_v61 = vld [vmem:[#allocation6 + $0xab8] sm:$0xff]  ;;  %v5268_v19 = vcombine.low %v427_v58, %v439_v59 }
 0x158   :  { %v440_v62 = vld [vmem:[#allocation6 + $0xb18] sm:$0xff] }
 0x159   :  { %v5270_v24 = vcombine.low %v428_v61, %v440_v62 }
 0x15a   :  { %3602 = vmatpush1.bf16.msra.mxu0 %v5100_v3  ;;  %3684 = vmatpush1.bf16.msra.mxu1 %v5102_v4  ;;  %v5246_v3 = vcombine.low %v404_v46, %v416_v48  ;;  %v5269_v4 = vcombine.high %v427_v58, %v439_v59  ;;  %v5318_v48 = vcombine.low %v476_v34, %v488_v35  ;;  %v524_v58 = vld [vmem:[#allocation6 + $0xdb8] sm:$0xff] }
 0x15b   :  { %3603 = vmatprep.subr.bf16.mxu0 %v5125_v5  ;;  %3685 = vmatprep.subr.bf16.mxu1 %v5127_v6  ;;  %v5271_v6 = vcombine.high %v428_v61, %v440_v62  ;;  %v536_v59 = vld [vmem:[#allocation6 + $0xe18] sm:$0xff]  ;;  %v5342_v62 = vcombine.low %v500_v43, %v512_v44 }
 0x15e   :  { %3604 = vmatpush1.bf16.msra.mxu0 %v5124_v11  ;;  %3686 = vmatpush1.bf16.msra.mxu1 %v5126_v13  ;;  %v452_v13 = vld [vmem:[#allocation6 + $0xb78] sm:$0xff] }
 0x15f   :  { %3605 = vmatprep.subr.bf16.mxu0 %v5149_v14  ;;  %3687 = vmatprep.subr.bf16.mxu1 %v5151_v15  ;;  %v464_v14 = vld [vmem:[#allocation6 + $0xbd8] sm:$0xff] }
 0x160   :  { %v5295_v28 = vcombine.high %v452_v13, %v464_v14  ;;  %v5294_v37 = vcombine.low %v452_v13, %v464_v14  ;;  %v560_v13 = vld [vmem:[#allocation6 + $0xed8] sm:$0xff] }
 0x162   :  { %3606 = vmatpush1.bf16.msra.mxu0 %v5148_v20  ;;  %3688 = vmatpush1.bf16.msra.mxu1 %v5150_v21 }
 0x163   :  { %3607 = vmatprep.subr.bf16.mxu0 %v5173_v22  ;;  %3689 = vmatprep.subr.bf16.mxu1 %v5175_v23 }
 0x166   :  { %3608 = vmatpush1.bf16.msra.mxu0 %v5172_v30  ;;  %3690 = vmatpush1.bf16.msra.mxu1 %v5174_v31  ;;  %v475_v30 = vld [vmem:[#allocation6 + $0xc30] sm:$0xff] }
 0x167   :  { %3609 = vmatprep.subr.bf16.mxu0 %v5197_v32  ;;  %3691 = vmatprep.subr.bf16.mxu1 %v5199_v33  ;;  %v487_v31 = vld [vmem:[#allocation6 + $0xc90] sm:$0xff] }
 0x168   :  { %v5316_v46 = vcombine.low %v475_v30, %v487_v31 }
 0x16a   :  { %3610 = vmatpush1.bf16.msra.mxu0 %v5196_v39  ;;  %3692 = vmatpush1.bf16.msra.mxu1 %v5198_v40  ;;  %v5317_v39 = vcombine.high %v475_v30, %v487_v31  ;;  %v5319_v40 = vcombine.high %v476_v34, %v488_v35  ;;  %v106_v30 = vld [vmem:[#allocation6 + $0xa8] sm:$0xff]  ;;  %v117_v34 = vld [vmem:[#allocation6 + $0x100] sm:$0xff] }
 0x16b   :  { %3611 = vmatprep.subr.bf16.mxu0 %v5221_v41  ;;  %3693 = vmatprep.subr.bf16.mxu1 %v5223_v42  ;;  %v499_v41 = vld [vmem:[#allocation6 + $0xcf0] sm:$0xff]  ;;  %v129_v35 = vld [vmem:[#allocation6 + $0x160] sm:$0xff] }
 0x16c   :  { %v511_v42 = vld [vmem:[#allocation6 + $0xd50] sm:$0xff] }
 0x16e   :  { %3612 = vmatpush1.bf16.msra.mxu0 %v5220_v49  ;;  %3694 = vmatpush1.bf16.msra.mxu1 %v5222_v53  ;;  %v5341_v49 = vcombine.high %v499_v41, %v511_v42  ;;  %v5343_v53 = vcombine.high %v500_v43, %v512_v44  ;;  %v141_v43 = vld [vmem:[#allocation6 + $0x1c0] sm:$0xff] }
 0x16f   :  { %3613 = vmatprep.subr.bf16.mxu0 %v5245_v55  ;;  %3695 = vmatprep.subr.bf16.mxu1 %v5247_v56  ;;  %v523_v55 = vld [vmem:[#allocation6 + $0xdb0] sm:$0xff]  ;;  %v153_v44 = vld [vmem:[#allocation6 + $0x220] sm:$0xff] }
 0x170   :  { %v3170_v5 = vpop.f32.mrb[0].mxu0  ;;  %v3252_v10 = vpop.f32.mrb[0].mxu1  ;;  %v535_v56 = vld [vmem:[#allocation6 + $0xe10] sm:$0xff] }
 0x171   :  { %v6072_v9 = vadd.f32 %v3170_v5, %v574_v60  ;;  %v3172_v11 = vpop.f32.mrb[1].mxu0  ;;  %v6074_v15 = vadd.f32 %v3252_v10, %v582_v63  ;;  %v3254_v17 = vpop.f32.mrb[1].mxu1  ;;  %v5340_v60 = vcombine.low %v499_v41, %v511_v42  ;;  %v5365_v63 = vcombine.high %v523_v55, %v535_v56  ;;  %v559_v5 = vld [vmem:[#allocation6 + $0xed0] sm:$0xff] }
 0x172   :  { %v6076_v16 = vadd.f32 %v3172_v11, %v578_v0  ;;  %v3174_v18 = vpop.f32.mrb[2].mxu0  ;;  %3614 = vmatpush1.bf16.msra.mxu0 %v5244_v1  ;;  %v6079_v21 = vadd.f32 %v3254_v17, %v586_v2  ;;  %v3256_v22 = vpop.f32.mrb[2].mxu1  ;;  %3696 = vmatpush1.bf16.msra.mxu1 %v5246_v3  ;;  %v5367_v3 = vcombine.high %v524_v58, %v536_v59  ;;  %v548_v11 = vld [vmem:[#allocation6 + $0xe78] sm:$0xff] }
 0x173   :  { %v4103_v20 = vmul.f32 0.70710677, %v6072_v9  ;;  %v3175_v23 = vpop.f32.mrb[3].mxu0  ;;  %3615 = vmatprep.subr.bf16.mxu0 %v5269_v4  ;;  %v4105_v26 = vmul.f32 0.70710677, %v6074_v15  ;;  %3697 = vmatprep.subr.bf16.mxu1 %v5271_v6  ;;  %v3257_v33 = vpop.f32.mrb[3].mxu1  ;;  %v5364_v10 = vcombine.low %v523_v55, %v535_v56  ;;  %v4961_v41 = vcombine.high %v117_v34, %v129_v35 }
 0x174   :  { %v4104_v27 = vmul.f32 0.70710677, %v6076_v16  ;;  %v4106_v32 = vmul.f32 0.70710677, %v6079_v21  ;;  %v4079_v1 = vmul.f32 0.5, %v6072_v9  ;;  %v547_v4 = vld [vmem:[#allocation6 + $0xe70] sm:$0xff]  ;;  %v4985_v55 = vcombine.high %v141_v43, %v153_v44 }
 0x175   :  { %5758 = verf.f32 %v4103_v20  ;;  %v4081_v7 = vmul.f32 0.5, %v6074_v15  ;;  %v4080_v9 = vmul.f32 0.5, %v6076_v16  ;;  %v4082_v22 = vmul.f32 0.5, %v6079_v21  ;;  %v94_v16 = vld [vmem:[#allocation6 + $0x48] sm:$0xff] }
 0x176   :  { %5760 = verf.f32 %v4105_v26  ;;  %3616 = vmatpush1.bf16.msra.mxu0 %v5268_v19  ;;  %3698 = vmatpush1.bf16.msra.mxu1 %v5270_v24  ;;  %v5366_v19 = vcombine.low %v524_v58, %v536_v59  ;;  %v5389_v15 = vcombine.high %v547_v4, %v559_v5  ;;  %v93_v26 = vld [vmem:[#allocation6 + $0x40] sm:$0xff]  ;;  %v5388_v31 = vcombine.low %v547_v4, %v559_v5  ;;  %v190_v4 = vld [vmem:[#allocation6 + $0x348] sm:$0xff] }
 0x177   :  { %5762 = verf.f32 %v4104_v27  ;;  %3617 = vmatprep.subr.bf16.mxu0 %v5293_v25  ;;  %3699 = vmatprep.subr.bf16.mxu1 %v5295_v28  ;;  %v5391_v25 = vcombine.high %v548_v11, %v560_v13  ;;  %v105_v27 = vld [vmem:[#allocation6 + $0xa0] sm:$0xff]  ;;  %v4939_v33 = vcombine.high %v94_v16, %v106_v30  ;;  %v202_v5 = vld [vmem:[#allocation6 + $0x3a8] sm:$0xff] }
 0x178   :  { %5764 = verf.f32 %v4106_v32  ;;  %v5390_v32 = vcombine.low %v548_v11, %v560_v13  ;;  %v4937_v21 = vcombine.high %v93_v26, %v105_v27  ;;  %v165_v58 = vld [vmem:[#allocation6 + $0x280] sm:$0xff] }
 0x179   :  { %v177_v59 = vld [vmem:[#allocation6 + $0x2e0] sm:$0xff] }
 0x17a   :  { %3618 = vmatpush1.bf16.msra.mxu0 %v5292_v36  ;;  %3700 = vmatpush1.bf16.msra.mxu1 %v5294_v37  ;;  %v118_v36 = vld [vmem:[#allocation6 + $0x108] sm:$0xff]  ;;  %v213_v11 = vld [vmem:[#allocation6 + $0x400] sm:$0xff] }
 0x17b   :  { %3628 = vmatprep.subr.bf16.mxu0 %v5317_v39  ;;  %3710 = vmatprep.subr.bf16.mxu1 %v5319_v40  ;;  %v130_v37 = vld [vmem:[#allocation6 + $0x168] sm:$0xff]  ;;  %v4936_v39 = vcombine.low %v93_v26, %v105_v27  ;;  %v4938_v40 = vcombine.low %v94_v16, %v106_v30  ;;  %v225_v13 = vld [vmem:[#allocation6 + $0x460] sm:$0xff] }
 0x17c   :  { %v4963_v42 = vcombine.high %v118_v36, %v130_v37  ;;  %v238_v26 = vld [vmem:[#allocation6 + $0x4c8] sm:$0xff]  ;;  %v5056_v16 = vcombine.low %v213_v11, %v225_v13 }
 0x17d   :  { %3620 = vmatmul.mubr.bf16.vlgmr.msra.gmra.mrb[12].mxu0 %v6014_v12  ;;  %3702 = vmatmul.mubr.bf16.vlgmr.msra.gmra.mrb[12].mxu1 %v6014_v12  ;;  %v250_v27 = vld [vmem:[#allocation6 + $0x528] sm:$0xff] }
 0x17e   :  { %3629 = vmatpush1.bf16.msra.mxu0 %v5316_v46  ;;  %3711 = vmatpush1.bf16.msra.mxu1 %v5318_v48  ;;  %v142_v46 = vld [vmem:[#allocation6 + $0x1c8] sm:$0xff] }
 0x17f   :  { %v5759_v61 = vpop.eup %5758  ;;  %3630 = vmatprep.subr.bf16.mxu0 %v5341_v49  ;;  %3712 = vmatprep.subr.bf16.mxu1 %v5343_v53  ;;  %v154_v48 = vld [vmem:[#allocation6 + $0x228] sm:$0xff]  ;;  %v4960_v49 = vcombine.low %v117_v34, %v129_v35  ;;  %v4962_v53 = vcombine.low %v118_v36, %v130_v37  ;;  %v5082_v37 = vcombine.low %v238_v26, %v250_v27 }
 0x180   :  { %v5761_v0 = vpop.eup %5760  ;;  %v4151_v2 = vadd.f32 1.0, %v5759_v61  ;;  %3660 = vmatprep.mubr.bf16.mxu0 %v5930_v29  ;;  %3742 = vmatprep.mubr.bf16.mxu1 %v5930_v29  ;;  %v4987_v56 = vcombine.high %v142_v46, %v154_v48  ;;  %v178_v61 = vld [vmem:[#allocation6 + $0x2e8] sm:$0xff] }
 0x181   :  { %v5763_v6 = vpop.eup %5762  ;;  %v4153_v8 = vadd.f32 1.0, %v5761_v0  ;;  %v5009_v0 = vcombine.high %v165_v58, %v177_v59  ;;  %v262_v34 = vld [vmem:[#allocation6 + $0x588] sm:$0xff] }
 0x182   :  { %v5765_v14 = vpop.eup %5764  ;;  %v6090_v17 = vmul.f32 %v4151_v2, %v4079_v1  ;;  %v4152_v18 = vadd.f32 1.0, %v5763_v6  ;;  %3631 = vmatpush1.bf16.msra.mxu0 %v5340_v60  ;;  %3713 = vmatpush1.bf16.msra.mxu1 %v5342_v62  ;;  %v166_v60 = vld [vmem:[#allocation6 + $0x288] sm:$0xff]  ;;  %v4984_v62 = vcombine.low %v141_v43, %v153_v44  ;;  %v189_v2 = vld [vmem:[#allocation6 + $0x340] sm:$0xff]  ;;  %v5008_v6 = vcombine.low %v165_v58, %v177_v59 }
 0x183   :  { %v6093_v20 = vmul.f32 %v4153_v8, %v4081_v7  ;;  %v4154_v23 = vadd.f32 1.0, %v5765_v14  ;;  %3632 = vmatprep.subr.bf16.mxu0 %v5365_v63  ;;  %3714 = vmatprep.subr.bf16.mxu1 %v5367_v3  ;;  %v4986_v63 = vcombine.low %v142_v46, %v154_v48  ;;  %v5011_v1 = vcombine.high %v166_v60, %v178_v61  ;;  %v201_v3 = vld [vmem:[#allocation6 + $0x3a0] sm:$0xff]  ;;  %v214_v14 = vld [vmem:[#allocation6 + $0x408] sm:$0xff] }
 0x184   :  { %v6096_v24 = vmul.f32 %v4152_v18, %v4080_v9  ;;  %v5010_v7 = vcombine.low %v166_v60, %v178_v61  ;;  %v5033_v8 = vcombine.high %v189_v2, %v201_v3  ;;  %v226_v9 = vld [vmem:[#allocation6 + $0x468] sm:$0xff]  ;;  %v5032_v18 = vcombine.low %v189_v2, %v201_v3 }
 0x185   :  { %v6098_v28 = vmul.f32 %v4154_v23, %v4082_v22  ;;  %v5057_v22 = vcombine.high %v213_v11, %v225_v13  ;;  %v5059_v23 = vcombine.high %v214_v14, %v226_v9  ;;  %v5058_v30 = vcombine.low %v214_v14, %v226_v9  ;;  %v274_v35 = vld [vmem:[#allocation6 + $0x5e8] sm:$0xff] }
 0x186   :  { %3633 = vmatpush1.bf16.msra.mxu0 %v5364_v10  ;;  %3715 = vmatpush1.bf16.msra.mxu1 %v5366_v19  ;;  %v5035_v10 = vcombine.high %v190_v4, %v202_v5  ;;  %v5034_v19 = vcombine.low %v190_v4, %v202_v5  ;;  %v286_v43 = vld [vmem:[#allocation6 + $0x648] sm:$0xff]  ;;  %v5106_v48 = vcombine.low %v262_v34, %v274_v35 }
 0x187   :  { %3634 = vmatprep.subr.bf16.mxu0 %v5389_v15  ;;  %3716 = vmatprep.subr.bf16.mxu1 %v5391_v25  ;;  %v237_v15 = vld [vmem:[#allocation6 + $0x4c0] sm:$0xff]  ;;  %v298_v44 = vld [vmem:[#allocation6 + $0x6a8] sm:$0xff] }
 0x188   :  { %v249_v25 = vld [vmem:[#allocation6 + $0x520] sm:$0xff]  ;;  %v310_v58 = vld [vmem:[#allocation6 + $0x708] sm:$0xff]  ;;  %v5130_v61 = vcombine.low %v286_v43, %v298_v44 }
 0x189   :  { %v5080_v36 = vcombine.low %v237_v15, %v249_v25  ;;  %v322_v59 = vld [vmem:[#allocation6 + $0x768] sm:$0xff] }
 0x18a   :  { %3635 = vmatpush1.bf16.msra.mxu0 %v5388_v31  ;;  %3717 = vmatpush1.bf16.msra.mxu1 %v5390_v32  ;;  %v5081_v31 = vcombine.high %v237_v15, %v249_v25  ;;  %v5083_v32 = vcombine.high %v238_v26, %v250_v27  ;;  %v334_v2 = vld [vmem:[#allocation6 + $0x7c8] sm:$0xff]  ;;  %v5154_v5 = vcombine.low %v310_v58, %v322_v59 }
 0x18b   :  { %3751 = vmatprep.subr.bf16.mxu0 %v4937_v21  ;;  %3833 = vmatprep.subr.bf16.mxu1 %v4939_v33  ;;  %v261_v21 = vld [vmem:[#allocation6 + $0x580] sm:$0xff]  ;;  %v346_v3 = vld [vmem:[#allocation6 + $0x828] sm:$0xff] }
 0x18c   :  { %v273_v33 = vld [vmem:[#allocation6 + $0x5e0] sm:$0xff]  ;;  %v358_v11 = vld [vmem:[#allocation6 + $0x888] sm:$0xff]  ;;  %v5178_v9 = vcombine.low %v334_v2, %v346_v3 }
 0x18d   :  { %5406 = vmatmul.mubr.msk.bf16.vlgmr.msra.gmra.mrb[12].mxu0 %vm3091_vm0, %v6020_v47  ;;  %5407 = vmatmul.mubr.msk.bf16.vlgmr.msra.gmra.mrb[12].mxu1 %vm3091_vm0, %v6020_v47  ;;  %v5104_v46 = vcombine.low %v261_v21, %v273_v33  ;;  %v370_v13 = vld [vmem:[#allocation6 + $0x8e8] sm:$0xff] }
 0x18e   :  { %3752 = vmatpush1.bf16.msra.mxu0 %v4936_v39  ;;  %3834 = vmatpush1.bf16.msra.mxu1 %v4938_v40  ;;  %v5105_v39 = vcombine.high %v261_v21, %v273_v33  ;;  %v5107_v40 = vcombine.high %v262_v34, %v274_v35  ;;  %v382_v15 = vld [vmem:[#allocation6 + $0x948] sm:$0xff]  ;;  %v5202_v27 = vcombine.low %v358_v11, %v370_v13  ;;  %v6107_v21 = vsub.s32 4, %v6048_v38 }
 0x18f   :  { %3753 = vmatprep.subr.bf16.mxu0 %v4961_v41  ;;  %3835 = vmatprep.subr.bf16.mxu1 %v4963_v42  ;;  %v285_v41 = vld [vmem:[#allocation6 + $0x640] sm:$0xff]  ;;  %v394_v25 = vld [vmem:[#allocation6 + $0x9a8] sm:$0xff] }
 0x190   :  { %3783 = vmatprep.mubr.bf16.mxu0 %v6010_v57  ;;  %3865 = vmatprep.mubr.bf16.mxu1 %v6010_v57  ;;  %v297_v42 = vld [vmem:[#allocation6 + $0x6a0] sm:$0xff]  ;;  %v406_v33 = vld [vmem:[#allocation6 + $0xa08] sm:$0xff] }
 0x191   :  { %v5128_v60 = vcombine.low %v285_v41, %v297_v42  ;;  %v418_v34 = vld [vmem:[#allocation6 + $0xa68] sm:$0xff] }
 0x192   :  { %3754 = vmatpush1.bf16.msra.mxu0 %v4960_v49  ;;  %3836 = vmatpush1.bf16.msra.mxu1 %v4962_v53  ;;  %v5129_v49 = vcombine.high %v285_v41, %v297_v42  ;;  %v5131_v53 = vcombine.high %v286_v43, %v298_v44  ;;  %v5251_v42 = vcombine.high %v406_v33, %v418_v34  ;;  %v429_v43 = vld [vmem:[#allocation6 + $0xac0] sm:$0xff] }
 0x193   :  { %3755 = vmatprep.subr.bf16.mxu0 %v4985_v55  ;;  %3837 = vmatprep.subr.bf16.mxu1 %v4987_v56  ;;  %v309_v55 = vld [vmem:[#allocation6 + $0x700] sm:$0xff] }
 0x194   :  { %v321_v56 = vld [vmem:[#allocation6 + $0x760] sm:$0xff] }
 0x195   :  { %v5152_v4 = vcombine.low %v309_v55, %v321_v56  ;;  %v441_v44 = vld [vmem:[#allocation6 + $0xb20] sm:$0xff] }
 0x196   :  { %3756 = vmatpush1.bf16.msra.mxu0 %v4984_v62  ;;  %3838 = vmatpush1.bf16.msra.mxu1 %v4986_v63  ;;  %v5153_v62 = vcombine.high %v309_v55, %v321_v56  ;;  %v5155_v63 = vcombine.high %v310_v58, %v322_v59  ;;  %v5250_v58 = vcombine.low %v406_v33, %v418_v34 }
 0x197   :  { %3757 = vmatprep.subr.bf16.mxu0 %v5009_v0  ;;  %3839 = vmatprep.subr.bf16.mxu1 %v5011_v1  ;;  %v333_v0 = vld [vmem:[#allocation6 + $0x7c0] sm:$0xff]  ;;  %v5273_v59 = vcombine.high %v429_v43, %v441_v44 }
 0x198   :  { %v345_v1 = vld [vmem:[#allocation6 + $0x820] sm:$0xff] }
 0x199   :  { %v5176_v14 = vcombine.low %v333_v0, %v345_v1 }
 0x19a   :  { %3758 = vmatpush1.bf16.msra.mxu0 %v5008_v6  ;;  %3840 = vmatpush1.bf16.msra.mxu1 %v5010_v7  ;;  %v5177_v6 = vcombine.high %v333_v0, %v345_v1  ;;  %v5179_v7 = vcombine.high %v334_v2, %v346_v3  ;;  %v454_v3 = vld [vmem:[#allocation6 + $0xb88] sm:$0xff] }
 0x19b   :  { %3759 = vmatprep.subr.bf16.mxu0 %v5033_v8  ;;  %3841 = vmatprep.subr.bf16.mxu1 %v5035_v10  ;;  %v357_v8 = vld [vmem:[#allocation6 + $0x880] sm:$0xff] }
 0x19c   :  { %v369_v10 = vld [vmem:[#allocation6 + $0x8e0] sm:$0xff] }
 0x19d   :  { %v5200_v26 = vcombine.low %v357_v8, %v369_v10 }
 0x19e   :  { %3760 = vmatpush1.bf16.msra.mxu0 %v5032_v18  ;;  %3842 = vmatpush1.bf16.msra.mxu1 %v5034_v19  ;;  %v5201_v18 = vcombine.high %v357_v8, %v369_v10  ;;  %v5203_v19 = vcombine.high %v358_v11, %v370_v13  ;;  %v5272_v8 = vcombine.low %v429_v43, %v441_v44 }
 0x19f   :  { %3761 = vmatprep.subr.bf16.mxu0 %v5057_v22  ;;  %3843 = vmatprep.subr.bf16.mxu1 %v5059_v23  ;;  %v381_v22 = vld [vmem:[#allocation6 + $0x940] sm:$0xff] }
 0x1a0   :  { %v393_v23 = vld [vmem:[#allocation6 + $0x9a0] sm:$0xff] }
 0x1a1   :  { %v5224_v35 = vcombine.low %v381_v22, %v393_v23 }
 0x1a2   :  { %3762 = vmatpush1.bf16.msra.mxu0 %v5056_v16  ;;  %3844 = vmatpush1.bf16.msra.mxu1 %v5058_v30  ;;  %v5225_v16 = vcombine.high %v381_v22, %v393_v23  ;;  %v5227_v30 = vcombine.high %v382_v15, %v394_v25 }
 0x1a3   :  { %3763 = vmatprep.subr.bf16.mxu0 %v5081_v31  ;;  %3845 = vmatprep.subr.bf16.mxu1 %v5083_v32  ;;  %v405_v31 = vld [vmem:[#allocation6 + $0xa00] sm:$0xff] }
 0x1a4   :  { %v417_v32 = vld [vmem:[#allocation6 + $0xa60] sm:$0xff] }
 0x1a5   :  { %v5249_v41 = vcombine.high %v405_v31, %v417_v32  ;;  %v5248_v56 = vcombine.low %v405_v31, %v417_v32 }
 0x1a6   :  { %3764 = vmatpush1.bf16.msra.mxu0 %v5080_v36  ;;  %3846 = vmatpush1.bf16.msra.mxu1 %v5082_v37  ;;  %v6110_v36 = vsub.s32 6, %v6048_v38  ;;  %v6113_v37 = vsub.s32 5, %v6048_v38 }
 0x1a7   :  { %3765 = vmatprep.subr.bf16.mxu0 %v5105_v39  ;;  %3847 = vmatprep.subr.bf16.mxu1 %v5107_v40  ;;  %v5226_v39 = vcombine.low %v382_v15, %v394_v25  ;;  %v6116_v40 = vsub.s32 7, %v6048_v38  ;;  %v477_v15 = vld [vmem:[#allocation6 + $0xc40] sm:$0xff] }
 0x1a8   :  { %v594_v55 = vrot.slane %v6053_v50, %v6113_v37  ;;  %v489_v25 = vld [vmem:[#allocation6 + $0xca0] sm:$0xff] }
 0x1a9   :  { %v602_v38 = vrot.slane %v6053_v50, %v6116_v40  ;;  %v5321_v33 = vcombine.high %v477_v15, %v489_v25  ;;  %v5320_v43 = vcombine.low %v477_v15, %v489_v25 }
 0x1aa   :  { %3766 = vmatpush1.bf16.msra.mxu0 %v5104_v46  ;;  %3848 = vmatpush1.bf16.msra.mxu1 %v5106_v48  ;;  %v590_v46 = vrot.slane %v6053_v50, %v6107_v21  ;;  %v430_v48 = vld [vmem:[#allocation6 + $0xac8] sm:$0xff] }
 0x1ab   :  { %3767 = vmatprep.subr.bf16.mxu0 %v5129_v49  ;;  %3849 = vmatprep.subr.bf16.mxu1 %v5131_v53  ;;  %v442_v49 = vld [vmem:[#allocation6 + $0xb28] sm:$0xff]  ;;  %v598_v53 = vrot.slane %v6053_v50, %v6110_v36 }
 0x1ae   :  { %3768 = vmatpush1.bf16.msra.mxu0 %v5128_v60  ;;  %3850 = vmatpush1.bf16.msra.mxu1 %v5130_v61  ;;  %v5275_v61 = vcombine.high %v430_v48, %v442_v49 }
 0x1af   :  { %3769 = vmatprep.subr.bf16.mxu0 %v5153_v62  ;;  %3851 = vmatprep.subr.bf16.mxu1 %v5155_v63  ;;  %v453_v62 = vld [vmem:[#allocation6 + $0xb80] sm:$0xff] }
 0x1b0   :  { %v465_v63 = vld [vmem:[#allocation6 + $0xbe0] sm:$0xff] }
 0x1b1   :  { %v5296_v31 = vcombine.low %v453_v62, %v465_v63 }
 0x1b2   :  { %3770 = vmatpush1.bf16.msra.mxu0 %v5152_v4  ;;  %3852 = vmatpush1.bf16.msra.mxu1 %v5154_v5  ;;  %v466_v4 = vld [vmem:[#allocation6 + $0xbe8] sm:$0xff] }
 0x1b3   :  { %3771 = vmatprep.subr.bf16.mxu0 %v5177_v6  ;;  %3853 = vmatprep.subr.bf16.mxu1 %v5179_v7  ;;  %v5299_v23 = vcombine.high %v454_v3, %v466_v4  ;;  %v5298_v32 = vcombine.low %v454_v3, %v466_v4  ;;  %v561_v3 = vld [vmem:[#allocation6 + $0xee0] sm:$0xff] }
 0x1b6   :  { %3772 = vmatpush1.bf16.msra.mxu0 %v5176_v14  ;;  %3854 = vmatpush1.bf16.msra.mxu1 %v5178_v9  ;;  %v5274_v9 = vcombine.low %v430_v48, %v442_v49  ;;  %v525_v49 = vld [vmem:[#allocation6 + $0xdc0] sm:$0xff] }
 0x1b7   :  { %3773 = vmatprep.subr.bf16.mxu0 %v5201_v18  ;;  %3855 = vmatprep.subr.bf16.mxu1 %v5203_v19  ;;  %v5297_v18 = vcombine.high %v453_v62, %v465_v63 }
 0x1ba   :  { %3774 = vmatpush1.bf16.msra.mxu0 %v5200_v26  ;;  %3856 = vmatpush1.bf16.msra.mxu1 %v5202_v27 }
 0x1bb   :  { %3775 = vmatprep.subr.bf16.mxu0 %v5225_v16  ;;  %3857 = vmatprep.subr.bf16.mxu1 %v5227_v30  ;;  %v478_v16 = vld [vmem:[#allocation6 + $0xc48] sm:$0xff] }
 0x1bc   :  { %v490_v30 = vld [vmem:[#allocation6 + $0xca8] sm:$0xff] }
 0x1bd   :  { %v5323_v34 = vcombine.high %v478_v16, %v490_v30  ;;  %v5322_v44 = vcombine.low %v478_v16, %v490_v30  ;;  %v107_v16 = vld [vmem:[#allocation6 + $0xb0] sm:$0xff] }
 0x1be   :  { %3776 = vmatpush1.bf16.msra.mxu0 %v5224_v35  ;;  %3858 = vmatpush1.bf16.msra.mxu1 %v5226_v39  ;;  %v501_v35 = vld [vmem:[#allocation6 + $0xd00] sm:$0xff] }
 0x1bf   :  { %3777 = vmatprep.subr.bf16.mxu0 %v5249_v41  ;;  %3859 = vmatprep.subr.bf16.mxu1 %v5251_v42  ;;  %v513_v39 = vld [vmem:[#allocation6 + $0xd60] sm:$0xff]  ;;  %v502_v41 = vld [vmem:[#allocation6 + $0xd08] sm:$0xff] }
 0x1c0   :  { %v3334_v60 = vpop.f32.mrb[4].mxu0  ;;  %v3416_v1 = vpop.f32.mrb[4].mxu1  ;;  %v514_v42 = vld [vmem:[#allocation6 + $0xd68] sm:$0xff] }
 0x1c1   :  { %v6126_v0 = vadd.f32 %v3334_v60, %v590_v46  ;;  %v3336_v2 = vpop.f32.mrb[5].mxu0  ;;  %v6128_v5 = vadd.f32 %v3416_v1, %v598_v53  ;;  %v3418_v7 = vpop.f32.mrb[5].mxu1  ;;  %v5345_v46 = vcombine.high %v501_v35, %v513_v39  ;;  %v5347_v48 = vcombine.high %v502_v41, %v514_v42  ;;  %v537_v53 = vld [vmem:[#allocation6 + $0xe20] sm:$0xff] }
 0x1c2   :  { %v6130_v6 = vadd.f32 %v3336_v2, %v594_v55  ;;  %v3338_v50 = vpop.f32.mrb[6].mxu0  ;;  %3778 = vmatpush1.bf16.msra.mxu0 %v5248_v56  ;;  %v6133_v11 = vadd.f32 %v3418_v7, %v602_v38  ;;  %v3420_v13 = vpop.f32.mrb[6].mxu1  ;;  %3860 = vmatpush1.bf16.msra.mxu1 %v5250_v58  ;;  %v526_v55 = vld [vmem:[#allocation6 + $0xdc8] sm:$0xff]  ;;  %v5344_v38 = vcombine.low %v501_v35, %v513_v39  ;;  %v549_v2 = vld [vmem:[#allocation6 + $0xe80] sm:$0xff]  ;;  %v119_v35 = vld [vmem:[#allocation6 + $0x110] sm:$0xff] }
 0x1c3   :  { %v4107_v10 = vmul.f32 0.70710677, %v6126_v0  ;;  %v3339_v14 = vpop.f32.mrb[7].mxu0  ;;  %3779 = vmatprep.subr.bf16.mxu0 %v5273_v59  ;;  %v4109_v19 = vmul.f32 0.70710677, %v6128_v5  ;;  %3861 = vmatprep.subr.bf16.mxu1 %v5275_v61  ;;  %v3421_v27 = vpop.f32.mrb[7].mxu1  ;;  %v5346_v59 = vcombine.low %v502_v41, %v514_v42  ;;  %v5369_v60 = vcombine.high %v525_v49, %v537_v53 }
 0x1c4   :  { %v4108_v22 = vmul.f32 0.70710677, %v6130_v6  ;;  %v4110_v26 = vmul.f32 0.70710677, %v6133_v11  ;;  %v538_v56 = vld [vmem:[#allocation6 + $0xe28] sm:$0xff]  ;;  %v4083_v62 = vmul.f32 0.5, %v6126_v0 }
 0x1c5   :  { %5766 = verf.f32 %v4107_v10  ;;  %v5371_v1 = vcombine.high %v526_v55, %v538_v56  ;;  %v4085_v7 = vmul.f32 0.5, %v6128_v5  ;;  %v550_v10 = vld [vmem:[#allocation6 + $0xe88] sm:$0xff]  ;;  %v4084_v0 = vmul.f32 0.5, %v6130_v6  ;;  %v95_v27 = vld [vmem:[#allocation6 + $0x50] sm:$0xff]  ;;  %v96_v6 = vld [vmem:[#allocation6 + $0x58] sm:$0xff] }
 0x1c6   :  { %5768 = verf.f32 %v4109_v19  ;;  %3780 = vmatpush1.bf16.msra.mxu0 %v5272_v8  ;;  %3862 = vmatpush1.bf16.msra.mxu1 %v5274_v9  ;;  %v5368_v8 = vcombine.low %v525_v49, %v537_v53  ;;  %v562_v13 = vld [vmem:[#allocation6 + $0xee8] sm:$0xff]  ;;  %v5370_v19 = vcombine.low %v526_v55, %v538_v56  ;;  %v5393_v5 = vcombine.high %v549_v2, %v561_v3  ;;  %v131_v39 = vld [vmem:[#allocation6 + $0x170] sm:$0xff]  ;;  %v120_v41 = vld [vmem:[#allocation6 + $0x118] sm:$0xff] }
 0x1c7   :  { %5770 = verf.f32 %v4108_v22  ;;  %3781 = vmatprep.subr.bf16.mxu0 %v5297_v18  ;;  %3863 = vmatprep.subr.bf16.mxu1 %v5299_v23  ;;  %v4086_v23 = vmul.f32 0.5, %v6133_v11  ;;  %v4941_v11 = vcombine.high %v95_v27, %v107_v16  ;;  %v132_v42 = vld [vmem:[#allocation6 + $0x178] sm:$0xff]  ;;  %v143_v49 = vld [vmem:[#allocation6 + $0x1d0] sm:$0xff] }
 0x1c8   :  { %5772 = verf.f32 %v4110_v26  ;;  %v5395_v26 = vcombine.high %v550_v10, %v562_v13  ;;  %v155_v53 = vld [vmem:[#allocation6 + $0x230] sm:$0xff]  ;;  %v144_v55 = vld [vmem:[#allocation6 + $0x1d8] sm:$0xff] }
 0x1c9   :  { %v156_v56 = vld [vmem:[#allocation6 + $0x238] sm:$0xff] }
 0x1ca   :  { %3782 = vmatpush1.bf16.msra.mxu0 %v5296_v31  ;;  %3864 = vmatpush1.bf16.msra.mxu1 %v5298_v32  ;;  %v108_v31 = vld [vmem:[#allocation6 + $0xb8] sm:$0xff]  ;;  %v5392_v32 = vcombine.low %v549_v2, %v561_v3  ;;  %v4988_v2 = vcombine.low %v143_v49, %v155_v53  ;;  %v4990_v3 = vcombine.low %v144_v55, %v156_v56 }
 0x1cb   :  { %3792 = vmatprep.subr.bf16.mxu0 %v5321_v33  ;;  %3874 = vmatprep.subr.bf16.mxu1 %v5323_v34  ;;  %v5394_v33 = vcombine.low %v550_v10, %v562_v13  ;;  %v4943_v34 = vcombine.high %v96_v6, %v108_v31  ;;  %v192_v10 = vld [vmem:[#allocation6 + $0x358] sm:$0xff] }
 0x1cc   :  { %v204_v13 = vld [vmem:[#allocation6 + $0x3b8] sm:$0xff] }
 0x1cd   :  { %3784 = vmatmul.mubr.bf16.vlgmr.msra.gmra.mrb[16].mxu0 %v6014_v12  ;;  %3866 = vmatmul.mubr.bf16.vlgmr.msra.gmra.mrb[16].mxu1 %v6014_v12 }
 0x1ce   :  { %3793 = vmatpush1.bf16.msra.mxu0 %v5320_v43  ;;  %3875 = vmatpush1.bf16.msra.mxu1 %v5322_v44  ;;  %v4940_v43 = vcombine.low %v95_v27, %v107_v16  ;;  %v4942_v44 = vcombine.low %v96_v6, %v108_v31  ;;  %v5038_v27 = vcombine.low %v192_v10, %v204_v13  ;;  %v239_v31 = vld [vmem:[#allocation6 + $0x4d0] sm:$0xff] }
 0x1cf   :  { %v5767_v58 = vpop.eup %5766  ;;  %3794 = vmatprep.subr.bf16.mxu0 %v5345_v46  ;;  %3876 = vmatprep.subr.bf16.mxu1 %v5347_v48  ;;  %v4965_v46 = vcombine.high %v119_v35, %v131_v39  ;;  %v4967_v48 = vcombine.high %v120_v41, %v132_v42 }
 0x1d0   :  { %v5769_v61 = vpop.eup %5768  ;;  %v4155_v63 = vadd.f32 1.0, %v5767_v58  ;;  %3824 = vmatprep.mubr.bf16.mxu0 %v5930_v29  ;;  %3906 = vmatprep.mubr.bf16.mxu1 %v5930_v29  ;;  %v4966_v58 = vcombine.low %v120_v41, %v132_v42  ;;  %v263_v42 = vld [vmem:[#allocation6 + $0x590] sm:$0xff] }
 0x1d1   :  { %v5771_v4 = vpop.eup %5770  ;;  %v4157_v50 = vadd.f32 1.0, %v5769_v61  ;;  %v167_v61 = vld [vmem:[#allocation6 + $0x290] sm:$0xff] }
 0x1d2   :  { %v5773_v14 = vpop.eup %5772  ;;  %v6144_v9 = vmul.f32 %v4155_v63, %v4083_v62  ;;  %v4156_v18 = vadd.f32 1.0, %v5771_v4  ;;  %3795 = vmatpush1.bf16.msra.mxu0 %v5344_v38  ;;  %3877 = vmatpush1.bf16.msra.mxu1 %v5346_v59  ;;  %v4964_v38 = vcombine.low %v119_v35, %v131_v39  ;;  %v4989_v59 = vcombine.high %v143_v49, %v155_v53  ;;  %v179_v62 = vld [vmem:[#allocation6 + $0x2f0] sm:$0xff]  ;;  %v168_v63 = vld [vmem:[#allocation6 + $0x298] sm:$0xff] }
 0x1d3   :  { %v6147_v22 = vmul.f32 %v4157_v50, %v4085_v7  ;;  %v4158_v15 = vadd.f32 1.0, %v5773_v14  ;;  %3796 = vmatprep.subr.bf16.mxu0 %v5369_v60  ;;  %3878 = vmatprep.subr.bf16.mxu1 %v5371_v1  ;;  %v4991_v60 = vcombine.high %v144_v55, %v156_v56  ;;  %v180_v1 = vld [vmem:[#allocation6 + $0x2f8] sm:$0xff]  ;;  %v5013_v4 = vcombine.high %v167_v61, %v179_v62  ;;  %v191_v50 = vld [vmem:[#allocation6 + $0x350] sm:$0xff] }
 0x1d4   :  { %v6150_v25 = vmul.f32 %v4156_v18, %v4084_v0  ;;  %v5015_v7 = vcombine.high %v168_v63, %v180_v1  ;;  %v5012_v14 = vcombine.low %v167_v61, %v179_v62  ;;  %v5014_v0 = vcombine.low %v168_v63, %v180_v1  ;;  %v287_v56 = vld [vmem:[#allocation6 + $0x650] sm:$0xff] }
 0x1d5   :  { %v6152_v30 = vmul.f32 %v4158_v15, %v4086_v23  ;;  %v227_v23 = vld [vmem:[#allocation6 + $0x470] sm:$0xff]  ;;  %v216_v15 = vld [vmem:[#allocation6 + $0x418] sm:$0xff] }
 0x1d6   :  { %3797 = vmatpush1.bf16.msra.mxu0 %v5368_v8  ;;  %3879 = vmatpush1.bf16.msra.mxu1 %v5370_v19  ;;  %v203_v8 = vld [vmem:[#allocation6 + $0x3b0] sm:$0xff] }
 0x1d7   :  { %3798 = vmatprep.subr.bf16.mxu0 %v5393_v5  ;;  %3880 = vmatprep.subr.bf16.mxu1 %v5395_v26  ;;  %v5037_v18 = vcombine.high %v191_v50, %v203_v8  ;;  %v215_v19 = vld [vmem:[#allocation6 + $0x410] sm:$0xff]  ;;  %v228_v5 = vld [vmem:[#allocation6 + $0x478] sm:$0xff]  ;;  %v5036_v26 = vcombine.low %v191_v50, %v203_v8 }
 0x1d8   :  { %v5061_v16 = vcombine.high %v215_v19, %v227_v23  ;;  %v5063_v6 = vcombine.high %v216_v15, %v228_v5  ;;  %v5062_v35 = vcombine.low %v216_v15, %v228_v5  ;;  %v311_v1 = vld [vmem:[#allocation6 + $0x710] sm:$0xff] }
 0x1d9   :  { %v359_v5 = vld [vmem:[#allocation6 + $0x890] sm:$0xff] }
 0x1da   :  { %3799 = vmatpush1.bf16.msra.mxu0 %v5392_v32  ;;  %3881 = vmatpush1.bf16.msra.mxu1 %v5394_v33  ;;  %v251_v32 = vld [vmem:[#allocation6 + $0x530] sm:$0xff]  ;;  %v240_v33 = vld [vmem:[#allocation6 + $0x4d8] sm:$0xff] }
 0x1db   :  { %3915 = vmatprep.subr.bf16.mxu0 %v4941_v11  ;;  %3997 = vmatprep.subr.bf16.mxu1 %v4943_v34  ;;  %v252_v11 = vld [vmem:[#allocation6 + $0x538] sm:$0xff]  ;;  %v5060_v34 = vcombine.low %v215_v19, %v227_v23  ;;  %v5085_v39 = vcombine.high %v239_v31, %v251_v32 }
 0x1dc   :  { %v5087_v41 = vcombine.high %v240_v33, %v252_v11  ;;  %v5086_v49 = vcombine.low %v240_v33, %v252_v11  ;;  %v383_v11 = vld [vmem:[#allocation6 + $0x950] sm:$0xff] }
 0x1dd   :  { %5408 = vmatmul.mubr.msk.bf16.vlgmr.msra.gmra.mrb[16].mxu0 %vm3091_vm0, %v6020_v47  ;;  %5409 = vmatmul.mubr.msk.bf16.vlgmr.msra.gmra.mrb[16].mxu1 %vm3091_vm0, %v6020_v47 }
 0x1de   :  { %3916 = vmatpush1.bf16.msra.mxu0 %v4940_v43  ;;  %3998 = vmatpush1.bf16.msra.mxu1 %v4942_v44  ;;  %v275_v43 = vld [vmem:[#allocation6 + $0x5f0] sm:$0xff]  ;;  %v264_v44 = vld [vmem:[#allocation6 + $0x598] sm:$0xff] }
 0x1df   :  { %3917 = vmatprep.subr.bf16.mxu0 %v4965_v46  ;;  %3999 = vmatprep.subr.bf16.mxu1 %v4967_v48  ;;  %v276_v46 = vld [vmem:[#allocation6 + $0x5f8] sm:$0xff]  ;;  %v5084_v48 = vcombine.low %v239_v31, %v251_v32  ;;  %v5109_v53 = vcombine.high %v263_v42, %v275_v43 }
 0x1e0   :  { %3947 = vmatprep.mubr.bf16.mxu0 %v6010_v57  ;;  %4029 = vmatprep.mubr.bf16.mxu1 %v6010_v57  ;;  %v5039_v57 = vcombine.high %v192_v10, %v204_v13  ;;  %v5111_v55 = vcombine.high %v264_v44, %v276_v46  ;;  %v5110_v61 = vcombine.low %v264_v44, %v276_v46  ;;  %v335_v13 = vld [vmem:[#allocation6 + $0x7d0] sm:$0xff] }
 0x1e1   :  { %v407_v46 = vld [vmem:[#allocation6 + $0xa10] sm:$0xff] }
 0x1e2   :  { %3918 = vmatpush1.bf16.msra.mxu0 %v4964_v38  ;;  %4000 = vmatpush1.bf16.msra.mxu1 %v4966_v58  ;;  %v299_v38 = vld [vmem:[#allocation6 + $0x6b0] sm:$0xff]  ;;  %v288_v58 = vld [vmem:[#allocation6 + $0x658] sm:$0xff] }
 0x1e3   :  { %3919 = vmatprep.subr.bf16.mxu0 %v4989_v59  ;;  %4001 = vmatprep.subr.bf16.mxu1 %v4991_v60  ;;  %v300_v59 = vld [vmem:[#allocation6 + $0x6b8] sm:$0xff]  ;;  %v5108_v60 = vcombine.low %v263_v42, %v275_v43  ;;  %v5133_v62 = vcombine.high %v287_v56, %v299_v38 }
 0x1e4   :  { %v5135_v63 = vcombine.high %v288_v58, %v300_v59  ;;  %v5134_v50 = vcombine.low %v288_v58, %v300_v59 }
 0x1e6   :  { %3920 = vmatpush1.bf16.msra.mxu0 %v4988_v2  ;;  %4002 = vmatpush1.bf16.msra.mxu1 %v4990_v3  ;;  %v323_v2 = vld [vmem:[#allocation6 + $0x770] sm:$0xff]  ;;  %v312_v3 = vld [vmem:[#allocation6 + $0x718] sm:$0xff] }
 0x1e7   :  { %3921 = vmatprep.subr.bf16.mxu0 %v5013_v4  ;;  %4003 = vmatprep.subr.bf16.mxu1 %v5015_v7  ;;  %v324_v4 = vld [vmem:[#allocation6 + $0x778] sm:$0xff]  ;;  %v5132_v7 = vcombine.low %v287_v56, %v299_v38  ;;  %v5157_v8 = vcombine.high %v311_v1, %v323_v2  ;;  %v6160_v56 = vld [vmem:[#allocation8 + $0x8] sm:$0xff] }
 0x1e8   :  { %v5159_v10 = vcombine.high %v312_v3, %v324_v4  ;;  %v5158_v19 = vcombine.low %v312_v3, %v324_v4  ;;  %v610_v3 = vrot.slane %v6160_v56, %v6059_v52 }
 0x1ea   :  { %3922 = vmatpush1.bf16.msra.mxu0 %v5012_v14  ;;  %4004 = vmatpush1.bf16.msra.mxu1 %v5014_v0  ;;  %v347_v14 = vld [vmem:[#allocation6 + $0x830] sm:$0xff]  ;;  %v336_v0 = vld [vmem:[#allocation6 + $0x7d8] sm:$0xff] }
 0x1eb   :  { %3923 = vmatprep.subr.bf16.mxu0 %v5037_v18  ;;  %4005 = vmatprep.subr.bf16.mxu1 %v5039_v57  ;;  %v348_v18 = vld [vmem:[#allocation6 + $0x838] sm:$0xff]  ;;  %v5156_v57 = vcombine.low %v311_v1, %v323_v2  ;;  %v5181_v23 = vcombine.high %v335_v13, %v347_v14  ;;  %v614_v2 = vrot.slane %v6160_v56, %v6056_v51 }
 0x1ec   :  { %v5183_v15 = vcombine.high %v336_v0, %v348_v18  ;;  %v5182_v31 = vcombine.low %v336_v0, %v348_v18  ;;  %v444_v1 = vld [vmem:[#allocation6 + $0xb38] sm:$0xff]  ;;  %v467_v0 = vld [vmem:[#allocation6 + $0xbf0] sm:$0xff] }
 0x1ee   :  { %3924 = vmatpush1.bf16.msra.mxu0 %v5036_v26  ;;  %4006 = vmatpush1.bf16.msra.mxu1 %v5038_v27  ;;  %v371_v26 = vld [vmem:[#allocation6 + $0x8f0] sm:$0xff]  ;;  %v360_v27 = vld [vmem:[#allocation6 + $0x898] sm:$0xff] }
 0x1ef   :  { %3925 = vmatprep.subr.bf16.mxu0 %v5061_v16  ;;  %4007 = vmatprep.subr.bf16.mxu1 %v5063_v6  ;;  %v372_v16 = vld [vmem:[#allocation6 + $0x8f8] sm:$0xff]  ;;  %v5180_v6 = vcombine.low %v335_v13, %v347_v14  ;;  %v5205_v32 = vcombine.high %v359_v5, %v371_v26  ;;  %v455_v14 = vld [vmem:[#allocation6 + $0xb90] sm:$0xff] }
 0x1f0   :  { %v5207_v33 = vcombine.high %v360_v27, %v372_v16  ;;  %v5206_v42 = vcombine.low %v360_v27, %v372_v16 }
 0x1f2   :  { %3926 = vmatpush1.bf16.msra.mxu0 %v5060_v34  ;;  %4008 = vmatpush1.bf16.msra.mxu1 %v5062_v35  ;;  %v395_v34 = vld [vmem:[#allocation6 + $0x9b0] sm:$0xff]  ;;  %v384_v35 = vld [vmem:[#allocation6 + $0x958] sm:$0xff] }
 0x1f3   :  { %3927 = vmatprep.subr.bf16.mxu0 %v5085_v39  ;;  %4009 = vmatprep.subr.bf16.mxu1 %v5087_v41  ;;  %v396_v39 = vld [vmem:[#allocation6 + $0x9b8] sm:$0xff]  ;;  %v5204_v41 = vcombine.low %v359_v5, %v371_v26  ;;  %v5229_v43 = vcombine.high %v383_v11, %v395_v34 }
 0x1f4   :  { %v5231_v44 = vcombine.high %v384_v35, %v396_v39  ;;  %v5230_v38 = vcombine.low %v384_v35, %v396_v39  ;;  %v5301_v35 = vcombine.high %v455_v14, %v467_v0 }
 0x1f6   :  { %3928 = vmatpush1.bf16.msra.mxu0 %v5084_v48  ;;  %4010 = vmatpush1.bf16.msra.mxu1 %v5086_v49  ;;  %v419_v48 = vld [vmem:[#allocation6 + $0xa70] sm:$0xff]  ;;  %v408_v49 = vld [vmem:[#allocation6 + $0xa18] sm:$0xff] }
 0x1f7   :  { %3929 = vmatprep.subr.bf16.mxu0 %v5109_v53  ;;  %4011 = vmatprep.subr.bf16.mxu1 %v5111_v55  ;;  %v420_v53 = vld [vmem:[#allocation6 + $0xa78] sm:$0xff]  ;;  %v5228_v55 = vcombine.low %v383_v11, %v395_v34  ;;  %v5253_v58 = vcombine.high %v407_v46, %v419_v48  ;;  %v5252_v4 = vcombine.low %v407_v46, %v419_v48 }
 0x1f8   :  { %v5255_v59 = vcombine.high %v408_v49, %v420_v53 }
 0x1fa   :  { %3930 = vmatpush1.bf16.msra.mxu0 %v5108_v60  ;;  %4012 = vmatpush1.bf16.msra.mxu1 %v5110_v61  ;;  %v431_v60 = vld [vmem:[#allocation6 + $0xad0] sm:$0xff] }
 0x1fb   :  { %3931 = vmatprep.subr.bf16.mxu0 %v5133_v62  ;;  %4013 = vmatprep.subr.bf16.mxu1 %v5135_v63  ;;  %v443_v61 = vld [vmem:[#allocation6 + $0xb30] sm:$0xff]  ;;  %v606_v62 = vrot.slane %v6160_v56, %v6051_v45  ;;  %v432_v63 = vld [vmem:[#allocation6 + $0xad8] sm:$0xff] }
 0x1fc   :  { %v5279_v13 = vcombine.high %v432_v63, %v444_v1  ;;  %v5278_v34 = vcombine.low %v432_v63, %v444_v1  ;;  %v516_v63 = vld [vmem:[#allocation6 + $0xd78] sm:$0xff] }
 0x1fe   :  { %3932 = vmatpush1.bf16.msra.mxu0 %v5132_v7  ;;  %4014 = vmatpush1.bf16.msra.mxu1 %v5134_v50  ;;  %v618_v7 = vrot.slane %v6160_v56, %v6062_v54  ;;  %v5254_v50 = vcombine.low %v408_v49, %v420_v53  ;;  %v480_v49 = vld [vmem:[#allocation6 + $0xc58] sm:$0xff] }
 0x1ff   :  { %3933 = vmatprep.subr.bf16.mxu0 %v5157_v8  ;;  %4015 = vmatprep.subr.bf16.mxu1 %v5159_v10  ;;  %v5277_v8 = vcombine.high %v431_v60, %v443_v61  ;;  %v492_v53 = vld [vmem:[#allocation6 + $0xcb8] sm:$0xff] }
 0x202   :  { %3934 = vmatpush1.bf16.msra.mxu0 %v5156_v57  ;;  %4016 = vmatpush1.bf16.msra.mxu1 %v5158_v19 }
 0x203   :  { %3935 = vmatprep.subr.bf16.mxu0 %v5181_v23  ;;  %4017 = vmatprep.subr.bf16.mxu1 %v5183_v15  ;;  %v456_v23 = vld [vmem:[#allocation6 + $0xb98] sm:$0xff] }
 0x204   :  { %v468_v15 = vld [vmem:[#allocation6 + $0xbf8] sm:$0xff] }
 0x206   :  { %3936 = vmatpush1.bf16.msra.mxu0 %v5180_v6  ;;  %4018 = vmatpush1.bf16.msra.mxu1 %v5182_v31  ;;  %v5276_v6 = vcombine.low %v431_v60, %v443_v61  ;;  %v503_v60 = vld [vmem:[#allocation6 + $0xd10] sm:$0xff] }
 0x207   :  { %3937 = vmatprep.subr.bf16.mxu0 %v5205_v32  ;;  %4019 = vmatprep.subr.bf16.mxu1 %v5207_v33  ;;  %v515_v61 = vld [vmem:[#allocation6 + $0xd70] sm:$0xff] }
 0x20a   :  { %3938 = vmatpush1.bf16.msra.mxu0 %v5204_v41  ;;  %4020 = vmatpush1.bf16.msra.mxu1 %v5206_v42  ;;  %v5303_v42 = vcombine.high %v456_v23, %v468_v15 }
 0x20b   :  { %3939 = vmatprep.subr.bf16.mxu0 %v5229_v43  ;;  %4021 = vmatprep.subr.bf16.mxu1 %v5231_v44  ;;  %v479_v43 = vld [vmem:[#allocation6 + $0xc50] sm:$0xff] }
 0x20c   :  { %v491_v44 = vld [vmem:[#allocation6 + $0xcb0] sm:$0xff] }
 0x20d   :  { %v5324_v1 = vcombine.low %v479_v43, %v491_v44 }
 0x20e   :  { %3940 = vmatpush1.bf16.msra.mxu0 %v5228_v55  ;;  %4022 = vmatpush1.bf16.msra.mxu1 %v5230_v38  ;;  %v5300_v55 = vcombine.low %v455_v14, %v467_v0  ;;  %v5302_v38 = vcombine.low %v456_v23, %v468_v15 }
 0x20f   :  { %3941 = vmatprep.subr.bf16.mxu0 %v5253_v58  ;;  %4023 = vmatprep.subr.bf16.mxu1 %v5255_v59  ;;  %v5325_v58 = vcombine.high %v479_v43, %v491_v44  ;;  %v5327_v59 = vcombine.high %v480_v49, %v492_v53 }
 0x210   :  { %v3498_v10 = vpop.f32.mrb[8].mxu0  ;;  %v3580_v57 = vpop.f32.mrb[8].mxu1 }
 0x211   :  { %v6170_v18 = vadd.f32 %v3498_v10, %v606_v62  ;;  %v3500_v19 = vpop.f32.mrb[9].mxu0  ;;  %v6172_v5 = vadd.f32 %v3580_v57, %v614_v2  ;;  %v3582_v27 = vpop.f32.mrb[9].mxu1  ;;  %v504_v62 = vld [vmem:[#allocation6 + $0xd18] sm:$0xff]  ;;  %v5326_v2 = vcombine.low %v480_v49, %v492_v53 }
 0x212   :  { %v6174_v26 = vadd.f32 %v3500_v19, %v610_v3  ;;  %v3502_v16 = vpop.f32.mrb[10].mxu0  ;;  %3942 = vmatpush1.bf16.msra.mxu0 %v5252_v4  ;;  %v6177_v32 = vadd.f32 %v3582_v27, %v618_v7  ;;  %v3584_v33 = vpop.f32.mrb[10].mxu1  ;;  %4024 = vmatpush1.bf16.msra.mxu1 %v5254_v50  ;;  %v5349_v3 = vcombine.high %v503_v60, %v515_v61  ;;  %v527_v7 = vld [vmem:[#allocation6 + $0xdd0] sm:$0xff]  ;;  %v540_v10 = vld [vmem:[#allocation6 + $0xe38] sm:$0xff] }
 0x213   :  { %v4111_v31 = vmul.f32 0.70710677, %v6170_v18  ;;  %v3503_v11 = vpop.f32.mrb[11].mxu0  ;;  %3943 = vmatprep.subr.bf16.mxu0 %v5277_v8  ;;  %v4113_v39 = vmul.f32 0.70710677, %v6172_v5  ;;  %4025 = vmatprep.subr.bf16.mxu1 %v5279_v13  ;;  %v3585_v48 = vpop.f32.mrb[11].mxu1  ;;  %v5351_v4 = vcombine.high %v504_v62, %v516_v63  ;;  %v5348_v13 = vcombine.low %v503_v60, %v515_v61 }
 0x214   :  { %v4112_v41 = vmul.f32 0.70710677, %v6174_v26  ;;  %v4114_v46 = vmul.f32 0.70710677, %v6177_v32  ;;  %v539_v50 = vld [vmem:[#allocation6 + $0xe30] sm:$0xff]  ;;  %v528_v8 = vld [vmem:[#allocation6 + $0xdd8] sm:$0xff]  ;;  %v5350_v0 = vcombine.low %v504_v62, %v516_v63 }
 0x215   :  { %5774 = verf.f32 %v4111_v31  ;;  %v5373_v57 = vcombine.high %v527_v7, %v539_v50  ;;  %v4087_v23 = vmul.f32 0.5, %v6170_v18  ;;  %v5375_v27 = vcombine.high %v528_v8, %v540_v10  ;;  %v551_v16 = vld [vmem:[#allocation6 + $0xe90] sm:$0xff] }
 0x216   :  { %5776 = verf.f32 %v4113_v39  ;;  %3944 = vmatpush1.bf16.msra.mxu0 %v5276_v6  ;;  %4026 = vmatpush1.bf16.msra.mxu1 %v5278_v34  ;;  %v563_v6 = vld [vmem:[#allocation6 + $0xef0] sm:$0xff]  ;;  %v4089_v33 = vmul.f32 0.5, %v6172_v5  ;;  %v5372_v11 = vcombine.low %v527_v7, %v539_v50  ;;  %v552_v34 = vld [vmem:[#allocation6 + $0xe98] sm:$0xff]  ;;  %v4088_v18 = vmul.f32 0.5, %v6174_v26 }
 0x217   :  { %5778 = verf.f32 %v4112_v41  ;;  %3945 = vmatprep.subr.bf16.mxu0 %v5301_v35  ;;  %4027 = vmatprep.subr.bf16.mxu1 %v5303_v42  ;;  %v564_v35 = vld [vmem:[#allocation6 + $0xef8] sm:$0xff]  ;;  %v5374_v43 = vcombine.low %v528_v8, %v540_v10  ;;  %v5397_v5 = vcombine.high %v551_v16, %v563_v6 }
 0x218   :  { %5780 = verf.f32 %v4114_v46  ;;  %v4090_v46 = vmul.f32 0.5, %v6177_v32  ;;  %v5398_v26 = vcombine.low %v552_v34, %v564_v35  ;;  %v622_v32 = vrot.slane %v6160_v56, %v6107_v21 }
 0x21a   :  { %3946 = vmatpush1.bf16.msra.mxu0 %v5300_v55  ;;  %4028 = vmatpush1.bf16.msra.mxu1 %v5302_v38  ;;  %v5396_v55 = vcombine.low %v551_v16, %v563_v6  ;;  %v630_v38 = vrot.slane %v6160_v56, %v6110_v36 }
 0x21b   :  { %3956 = vmatprep.subr.bf16.mxu0 %v5325_v58  ;;  %4038 = vmatprep.subr.bf16.mxu1 %v5327_v59  ;;  %v626_v58 = vrot.slane %v6160_v56, %v6113_v37  ;;  %v634_v59 = vrot.slane %v6160_v56, %v6116_v40 }
 0x21d   :  { %3948 = vmatmul.mubr.bf16.vlgmr.msra.gmra.mrb[20].mxu0 %v6014_v12  ;;  %4030 = vmatmul.mubr.bf16.vlgmr.msra.gmra.mrb[20].mxu1 %v6014_v12 }
 0x21e   :  { %3957 = vmatpush1.bf16.msra.mxu0 %v5324_v1  ;;  %4039 = vmatpush1.bf16.msra.mxu1 %v5326_v2 }
 0x21f   :  { %v5775_v14 = vpop.eup %5774  ;;  %3958 = vmatprep.subr.bf16.mxu0 %v5349_v3  ;;  %4040 = vmatprep.subr.bf16.mxu1 %v5351_v4 }
 0x220   :  { %v5777_v19 = vpop.eup %5776  ;;  %v4159_v15 = vadd.f32 1.0, %v5775_v14  ;;  %3988 = vmatprep.mubr.bf16.mxu0 %v5930_v29  ;;  %4070 = vmatprep.mubr.bf16.mxu1 %v5930_v29  ;;  %v5399_v29 = vcombine.high %v552_v34, %v564_v35 }
 0x221   :  { %v5779_v31 = vpop.eup %5778  ;;  %v4161_v12 = vadd.f32 1.0, %v5777_v19 }
 0x222   :  { %v5781_v39 = vpop.eup %5780  ;;  %v6188_v41 = vmul.f32 %v4159_v15, %v4087_v23  ;;  %v4160_v42 = vadd.f32 1.0, %v5779_v31  ;;  %3959 = vmatpush1.bf16.msra.mxu0 %v5348_v13  ;;  %4041 = vmatpush1.bf16.msra.mxu1 %v5350_v0 }
 0x223   :  { %v6191_v44 = vmul.f32 %v4161_v12, %v4089_v33  ;;  %v4162_v48 = vadd.f32 1.0, %v5781_v39  ;;  %3960 = vmatprep.subr.bf16.mxu0 %v5373_v57  ;;  %4042 = vmatprep.subr.bf16.mxu1 %v5375_v27 }
 0x224   :  { %v6194_v49 = vmul.f32 %v4160_v42, %v4088_v18 }
 0x225   :  { %v6196_v53 = vmul.f32 %v4162_v48, %v4090_v46 }
 0x226   :  { %3961 = vmatpush1.bf16.msra.mxu0 %v5372_v11  ;;  %4043 = vmatpush1.bf16.msra.mxu1 %v5374_v43 }
 0x227   :  { %3962 = vmatprep.subr.bf16.mxu0 %v5397_v5  ;;  %4044 = vmatprep.subr.bf16.mxu1 %v5399_v29 }
 0x22a   :  { %3963 = vmatpush1.bf16.msra.mxu0 %v5396_v55  ;;  %4045 = vmatpush1.bf16.msra.mxu1 %v5398_v26 }
 0x22d   :  { %5410 = vmatmul.mubr.msk.bf16.vlgmr.msra.gmra.mrb[20].mxu0 %vm3091_vm0, %v6020_v47  ;;  %5411 = vmatmul.mubr.msk.bf16.vlgmr.msra.gmra.mrb[20].mxu1 %vm3091_vm0, %v6020_v47 }
 0x260   :  { %v3662_v60 = vpop.f32.mrb[12].mxu0  ;;  %v3744_v62 = vpop.f32.mrb[12].mxu1 }
 0x261   :  { %v5690_v61 = vadd.f32 %v3662_v60, %v622_v32  ;;  %v3664_v63 = vpop.f32.mrb[13].mxu0  ;;  %v5692_v1 = vadd.f32 %v3744_v62, %v630_v38  ;;  %v3746_v3 = vpop.f32.mrb[13].mxu1 }
 0x262   :  { %v5691_v2 = vadd.f32 %v3664_v63, %v626_v58  ;;  %v3666_v47 = vpop.f32.mrb[14].mxu0  ;;  %v5693_v7 = vadd.f32 %v3746_v3, %v634_v59  ;;  %v3748_v50 = vpop.f32.mrb[14].mxu1 }
 0x263   :  { %v4115_v4 = vmul.f32 0.70710677, %v5690_v61  ;;  %v3667_v8 = vpop.f32.mrb[15].mxu0  ;;  %v4117_v10 = vmul.f32 0.70710677, %v5692_v1  ;;  %v3749_v0 = vpop.f32.mrb[15].mxu1 }
 0x264   :  { %v4116_v13 = vmul.f32 0.70710677, %v5691_v2  ;;  %v4118_v14 = vmul.f32 0.70710677, %v5693_v7  ;;  %v4091_v19 = vmul.f32 0.5, %v5690_v61  ;;  %v4093_v27 = vmul.f32 0.5, %v5692_v1 }
 0x265   :  { %5782 = verf.f32 %v4115_v4  ;;  %v4092_v33 = vmul.f32 0.5, %v5691_v2  ;;  %v4094_v34 = vmul.f32 0.5, %v5693_v7 }
 0x266   :  { %5784 = verf.f32 %v4117_v10 }
 0x267   :  { %5786 = verf.f32 %v4116_v13 }
 0x268   :  { %5788 = verf.f32 %v4118_v14 }
 0x26f   :  { %v5783_v56 = vpop.eup %5782 }
 0x270   :  { %v5785_v57 = vpop.eup %5784  ;;  %v4163_v23 = vadd.f32 1.0, %v5783_v56 }
 0x271   :  { %v5787_v15 = vpop.eup %5786  ;;  %v4165_v16 = vadd.f32 1.0, %v5785_v57 }
 0x272   :  { %v5789_v6 = vpop.eup %5788  ;;  %v6210_v31 = vmul.f32 %v4163_v23, %v4091_v19  ;;  %v4164_v12 = vadd.f32 1.0, %v5787_v15 }
 0x273   :  { %v6212_v11 = vmul.f32 %v4165_v16, %v4093_v27  ;;  %v4166_v35 = vadd.f32 1.0, %v5789_v6 }
 0x274   :  { %v6214_v39 = vmul.f32 %v4164_v12, %v4092_v33 }
 0x275   :  { %v6216_v18 = vmul.f32 %v4166_v35, %v4094_v34 }
 0x276   :  { %5903 = shalt.err (!%p5900_p6)  }
 0x277   :  { %s5904_s23 = scalar_lea.vmem %s76_s16, 24576  ;;  %p5909_p8 = scmp.lt.s32.totalorder %s76_s16, %s76_s16 }
 0x278   :  { %p5905_p7 = scmp.ne.s32.totalorder %s76_s16, %s5904_s23  ;;  %p5910_p9 = scmp.lt.s32.totalorder %s5904_s23, %s5904_s23 }
 0x27a   :  { %p5911_p10 = por %p5910_p9, %p5909_p8 }
 0x27c   :  { %p5912_p11 = pnand %p5911_p10, %p5905_p7 }
 0x27e   :  { %5915 = shalt.err (!%p5912_p11)  }
 0x27f   :  { %78 = dma.hbm_to_vmem [thread:$0]  %s6308_s3, 24576, %s76_s16, [#allocation3]  ;;  %v567_v42 = vld [vmem:[#allocation8 + $0x10] sm:$0xff] }
 0x280   :  { %v638_v43 = vrot.slane %v567_v42, %v6051_v45  ;;  %v646_v46 = vrot.slane %v567_v42, %v6056_v51  ;;  %v642_v48 = vrot.slane %v567_v42, %v6059_v52  ;;  %v650_v5 = vrot.slane %v567_v42, %v6062_v54 }
 0x281   :  { %v654_v27 = vrot.slane %v567_v42, %v6107_v21  ;;  %v662_v16 = vrot.slane %v567_v42, %v6110_v36  ;;  %v658_v6 = vrot.slane %v567_v42, %v6113_v37  ;;  %v666_v33 = vrot.slane %v567_v42, %v6116_v40 }
 0x2b0   :  { %v3826_v29 = vpop.f32.mrb[16].mxu0  ;;  %v3908_v26 = vpop.f32.mrb[16].mxu1 }
 0x2b1   :  { %v5694_v55 = vadd.f32 %v3826_v29, %v638_v43  ;;  %v3828_v32 = vpop.f32.mrb[17].mxu0  ;;  %v5696_v38 = vadd.f32 %v3908_v26, %v646_v46  ;;  %v3910_v59 = vpop.f32.mrb[17].mxu1 }
 0x2b2   :  { %v5695_v58 = vadd.f32 %v3828_v32, %v642_v48  ;;  %v3830_v60 = vpop.f32.mrb[18].mxu0  ;;  %v5697_v62 = vadd.f32 %v3910_v59, %v650_v5  ;;  %v3912_v63 = vpop.f32.mrb[18].mxu1 }
 0x2b3   :  { %v4119_v61 = vmul.f32 0.70710677, %v5694_v55  ;;  %v3831_v1 = vpop.f32.mrb[19].mxu0  ;;  %v4121_v2 = vmul.f32 0.70710677, %v5696_v38  ;;  %v3913_v3 = vpop.f32.mrb[19].mxu1 }
 0x2b4   :  { %v4120_v45 = vmul.f32 0.70710677, %v5695_v58  ;;  %v4122_v51 = vmul.f32 0.70710677, %v5697_v62  ;;  %v4095_v47 = vmul.f32 0.5, %v5694_v55  ;;  %v4097_v50 = vmul.f32 0.5, %v5696_v38 }
 0x2b5   :  { %5790 = verf.f32 %v4119_v61  ;;  %v4096_v14 = vmul.f32 0.5, %v5695_v58  ;;  %v4098_v57 = vmul.f32 0.5, %v5697_v62 }
 0x2b6   :  { %5792 = verf.f32 %v4121_v2 }
 0x2b7   :  { %5794 = verf.f32 %v4120_v45 }
 0x2b8   :  { %5796 = verf.f32 %v4122_v51 }
 0x2bf   :  { %v5791_v52 = vpop.eup %5790 }
 0x2c0   :  { %v5793_v54 = vpop.eup %5792  ;;  %v4167_v4 = vadd.f32 1.0, %v5791_v52 }
 0x2c1   :  { %v5795_v7 = vpop.eup %5794  ;;  %v4169_v8 = vadd.f32 1.0, %v5793_v54 }
 0x2c2   :  { %v5797_v10 = vpop.eup %5796  ;;  %v6234_v13 = vmul.f32 %v4167_v4, %v4095_v47  ;;  %v4168_v0 = vadd.f32 1.0, %v5795_v7 }
 0x2c3   :  { %v6236_v56 = vmul.f32 %v4169_v8, %v4097_v50  ;;  %v4170_v19 = vadd.f32 1.0, %v5797_v10 }
 0x2c4   :  { %v6238_v23 = vmul.f32 %v4168_v0, %v4096_v14 }
 0x2c5   :  { %v6240_v15 = vmul.f32 %v4170_v19, %v4098_v57 }
 0x300   :  { %v3990_v12 = vpop.f32.mrb[20].mxu0  ;;  %v4072_v35 = vpop.f32.mrb[20].mxu1 }
 0x301   :  { %v5698_v34 = vadd.f32 %v3990_v12, %v654_v27  ;;  %v3992_v43 = vpop.f32.mrb[21].mxu0  ;;  %v5700_v46 = vadd.f32 %v4072_v35, %v662_v16  ;;  %v4074_v5 = vpop.f32.mrb[21].mxu1 }
 0x302   :  { %v5699_v48 = vadd.f32 %v3992_v43, %v658_v6  ;;  %v3994_v29 = vpop.f32.mrb[22].mxu0  ;;  %v5701_v26 = vadd.f32 %v4074_v5, %v666_v33  ;;  %v4076_v32 = vpop.f32.mrb[22].mxu1 }
 0x303   :  { %v4123_v55 = vmul.f32 0.70710677, %v5698_v34  ;;  %v3995_v38 = vpop.f32.mrb[23].mxu0  ;;  %v4125_v58 = vmul.f32 0.70710677, %v5700_v46  ;;  %v4077_v59 = vpop.f32.mrb[23].mxu1 }
 0x304   :  { %v4124_v21 = vmul.f32 0.70710677, %v5699_v48  ;;  %v4126_v36 = vmul.f32 0.70710677, %v5701_v26  ;;  %v4099_v42 = vmul.f32 0.5, %v5698_v34  ;;  %v4101_v62 = vmul.f32 0.5, %v5700_v46 }
 0x305   :  { %5798 = verf.f32 %v4123_v55  ;;  %v4100_v45 = vmul.f32 0.5, %v5699_v48  ;;  %v4102_v52 = vmul.f32 0.5, %v5701_v26 }
 0x306   :  { %5800 = verf.f32 %v4125_v58 }
 0x307   :  { %5802 = verf.f32 %v4124_v21 }
 0x308   :  { %5804 = verf.f32 %v4126_v36 }
 0x30f   :  { %v5799_v37 = vpop.eup %5798 }
 0x310   :  { %v5801_v40 = vpop.eup %5800  ;;  %v4171_v60 = vadd.f32 1.0, %v5799_v37 }
 0x311   :  { %v5803_v61 = vpop.eup %5802  ;;  %v4173_v63 = vadd.f32 1.0, %v5801_v40 }
 0x312   :  { %v5805_v1 = vpop.eup %5804  ;;  %v6246_v2 = vmul.f32 %v4171_v60, %v4099_v42  ;;  %v4172_v51 = vadd.f32 1.0, %v5803_v61 }
 0x313   :  { %v6248_v3 = vmul.f32 %v4173_v63, %v4101_v62  ;;  %v4174_v54 = vadd.f32 1.0, %v5805_v1 }
 0x314   :  { %v6250_v47 = vmul.f32 %v4172_v51, %v4100_v45 }
 0x315   :  { %v6252_v4 = vmul.f32 %v4174_v54, %v4102_v52 }
 0x316   :  { %5922 = dma.done.wait [#allocation3], 24576 }
 0x317   :  { %5923 = vsyncadd [#allocation3], 4294942720  ;;  %v4204_v7 = vpack.c.bf16 %v6096_v24, %v6096_v24  ;;  %v4206_v50 = vpack.c.bf16 %v6098_v28, %v6098_v28  ;;  %v4235_v8 = vld [vmem:[#allocation2 + $0x40] sm:$0xff]  ;;  %v4236_v57 = vld [vmem:[#allocation2 + $0x48] sm:$0xff]  ;;  %v4203_v63 = vpack.c.bf16 %v6090_v17, %v6090_v17  ;;  %v4205_v1 = vpack.c.bf16 %v6093_v20, %v6093_v20 }
 0x318   :  { %v4251_v10 = vld [vmem:[#allocation2 + $0xc0] sm:$0xff]  ;;  %5414 = vmatprep.subr.bf16.mxu0 %v4235_v8  ;;  %v4252_v19 = vld [vmem:[#allocation2 + $0xc8] sm:$0xff]  ;;  %v4237_v24 = vld [vmem:[#allocation2 + $0x50] sm:$0xff] }
 0x319   :  { %4458 = vmatprep.mubr.bf16.mxu0 %v4204_v7  ;;  %4498 = vmatprep.mubr.bf16.mxu1 %v4206_v50  ;;  %v4227_v14 = vld [vmem:[#allocation2] sm:$0xff]  ;;  %v4228_v27 = vld [vmem:[#allocation2 + $0x8] sm:$0xff]  ;;  %v4253_v6 = vld [vmem:[#allocation2 + $0xd0] sm:$0xff]  ;;  %v4208_v7 = vpack.c.bf16 %v6150_v25, %v6150_v25  ;;  %v4210_v50 = vpack.c.bf16 %v6152_v30, %v6152_v30 }
 0x31a   :  { %5436 = vmatprep.subr.bf16.mxu1 %v4251_v10  ;;  %v4243_v0 = vld [vmem:[#allocation2 + $0x80] sm:$0xff]  ;;  %5415 = vmatpush3.bf16.msra.mxu0 %v4227_v14  ;;  %v4244_v16 = vld [vmem:[#allocation2 + $0x88] sm:$0xff]  ;;  %v4229_v28 = vld [vmem:[#allocation2 + $0x10] sm:$0xff] }
 0x31b   :  { %5437 = vmatpush3.bf16.msra.mxu1 %v4243_v0  ;;  %5416 = vmatprep.subr.bf16.mxu0 %v4236_v57  ;;  %v4245_v33 = vld [vmem:[#allocation2 + $0x90] sm:$0xff]  ;;  %v4238_v12 = vld [vmem:[#allocation2 + $0x58] sm:$0xff]  ;;  %v4239_v46 = vld [vmem:[#allocation2 + $0x60] sm:$0xff] }
 0x31c   :  { %5438 = vmatprep.subr.bf16.mxu1 %v4252_v19  ;;  %v4254_v34 = vld [vmem:[#allocation2 + $0xd8] sm:$0xff]  ;;  %v4255_v48 = vld [vmem:[#allocation2 + $0xe0] sm:$0xff]  ;;  %v4240_v55 = vld [vmem:[#allocation2 + $0x68] sm:$0xff] }
 0x31d   :  { %v4230_v35 = vld [vmem:[#allocation2 + $0x18] sm:$0xff]  ;;  %v4231_v5 = vld [vmem:[#allocation2 + $0x20] sm:$0xff]  ;;  %v4256_v26 = vld [vmem:[#allocation2 + $0xe8] sm:$0xff] }
 0x31e   :  { %5417 = vmatpush3.bf16.msra.mxu0 %v4228_v27  ;;  %v4246_v43 = vld [vmem:[#allocation2 + $0x98] sm:$0xff]  ;;  %v4247_v29 = vld [vmem:[#allocation2 + $0xa0] sm:$0xff]  ;;  %v4232_v32 = vld [vmem:[#allocation2 + $0x28] sm:$0xff] }
 0x31f   :  { %5439 = vmatpush3.bf16.msra.mxu1 %v4244_v16  ;;  %5418 = vmatprep.subr.bf16.mxu0 %v4237_v24  ;;  %v4248_v38 = vld [vmem:[#allocation2 + $0xa8] sm:$0xff]  ;;  %v4241_v58 = vld [vmem:[#allocation2 + $0x70] sm:$0xff]  ;;  %v4242_v37 = vld [vmem:[#allocation2 + $0x78] sm:$0xff] }
 0x320   :  { %5440 = vmatprep.subr.bf16.mxu1 %v4253_v6  ;;  %v4257_v21 = vld [vmem:[#allocation2 + $0xf0] sm:$0xff]  ;;  %v4258_v40 = vld [vmem:[#allocation2 + $0xf8] sm:$0xff]  ;;  %v4267_v61 = vld [vmem:[#allocation2 + $0x140] sm:$0xff] }
 0x321   :  { %v4233_v36 = vld [vmem:[#allocation2 + $0x30] sm:$0xff]  ;;  %v4234_v42 = vld [vmem:[#allocation2 + $0x38] sm:$0xff]  ;;  %v4283_v62 = vld [vmem:[#allocation2 + $0x1c0] sm:$0xff] }
 0x322   :  { %5419 = vmatpush3.bf16.msra.mxu0 %v4229_v28  ;;  %v4249_v59 = vld [vmem:[#allocation2 + $0xb0] sm:$0xff]  ;;  %v4250_v60 = vld [vmem:[#allocation2 + $0xb8] sm:$0xff]  ;;  %v4259_v45 = vld [vmem:[#allocation2 + $0x100] sm:$0xff] }
 0x323   :  { %5441 = vmatpush3.bf16.msra.mxu1 %v4245_v33  ;;  %5420 = vmatprep.subr.bf16.mxu0 %v4238_v12  ;;  %v4275_v51 = vld [vmem:[#allocation2 + $0x180] sm:$0xff]  ;;  %v4268_v52 = vld [vmem:[#allocation2 + $0x148] sm:$0xff]  ;;  %v4269_v8 = vld [vmem:[#allocation2 + $0x150] sm:$0xff] }
 0x324   :  { %5442 = vmatprep.subr.bf16.mxu1 %v4254_v34  ;;  %v4284_v54 = vld [vmem:[#allocation2 + $0x1c8] sm:$0xff]  ;;  %v4285_v10 = vld [vmem:[#allocation2 + $0x1d0] sm:$0xff]  ;;  %v4270_v0 = vld [vmem:[#allocation2 + $0x158] sm:$0xff] }
 0x325   :  { %v4260_v17 = vld [vmem:[#allocation2 + $0x108] sm:$0xff]  ;;  %v4261_v25 = vld [vmem:[#allocation2 + $0x110] sm:$0xff]  ;;  %v4286_v30 = vld [vmem:[#allocation2 + $0x1d8] sm:$0xff] }
 0x326   :  { %5421 = vmatpush3.bf16.msra.mxu0 %v4230_v35  ;;  %v4276_v20 = vld [vmem:[#allocation2 + $0x188] sm:$0xff]  ;;  %v4277_v14 = vld [vmem:[#allocation2 + $0x190] sm:$0xff]  ;;  %v4262_v57 = vld [vmem:[#allocation2 + $0x118] sm:$0xff] }
 0x327   :  { %5443 = vmatpush3.bf16.msra.mxu1 %v4246_v43  ;;  %5422 = vmatprep.subr.bf16.mxu0 %v4239_v46  ;;  %v4278_v19 = vld [vmem:[#allocation2 + $0x198] sm:$0xff]  ;;  %v4271_v27 = vld [vmem:[#allocation2 + $0x160] sm:$0xff]  ;;  %v4272_v28 = vld [vmem:[#allocation2 + $0x168] sm:$0xff] }
 0x328   :  { %5444 = vmatprep.subr.bf16.mxu1 %v4255_v48  ;;  %v4287_v16 = vld [vmem:[#allocation2 + $0x1e0] sm:$0xff]  ;;  %v4288_v33 = vld [vmem:[#allocation2 + $0x1e8] sm:$0xff]  ;;  %v4273_v35 = vld [vmem:[#allocation2 + $0x170] sm:$0xff] }
 0x329   :  { %v4263_v24 = vld [vmem:[#allocation2 + $0x120] sm:$0xff]  ;;  %v4264_v12 = vld [vmem:[#allocation2 + $0x128] sm:$0xff]  ;;  %v4289_v43 = vld [vmem:[#allocation2 + $0x1f0] sm:$0xff] }
 0x32a   :  { %5423 = vmatpush3.bf16.msra.mxu0 %v4231_v5  ;;  %v4279_v6 = vld [vmem:[#allocation2 + $0x1a0] sm:$0xff]  ;;  %v4280_v34 = vld [vmem:[#allocation2 + $0x1a8] sm:$0xff]  ;;  %v4265_v46 = vld [vmem:[#allocation2 + $0x130] sm:$0xff] }
 0x32b   :  { %5445 = vmatpush3.bf16.msra.mxu1 %v4247_v29  ;;  %5424 = vmatprep.subr.bf16.mxu0 %v4240_v55  ;;  %v4281_v48 = vld [vmem:[#allocation2 + $0x1b0] sm:$0xff]  ;;  %v4274_v5 = vld [vmem:[#allocation2 + $0x178] sm:$0xff] }
 0x32c   :  { %5446 = vmatprep.subr.bf16.mxu1 %v4256_v26  ;;  %v4290_v29 = vld [vmem:[#allocation2 + $0x1f8] sm:$0xff] }
 0x32d   :  { %v4266_v55 = vld [vmem:[#allocation2 + $0x138] sm:$0xff] }
 0x32e   :  { %5425 = vmatpush3.bf16.msra.mxu0 %v4232_v32  ;;  %v4282_v26 = vld [vmem:[#allocation2 + $0x1b8] sm:$0xff]  ;;  %v4299_v32 = vld [vmem:[#allocation2 + $0x240] sm:$0xff] }
 0x32f   :  { %5447 = vmatpush3.bf16.msra.mxu1 %v4248_v38  ;;  %5426 = vmatprep.subr.bf16.mxu0 %v4241_v58  ;;  %v4315_v38 = vld [vmem:[#allocation2 + $0x2c0] sm:$0xff]  ;;  %v4207_v58 = vpack.c.bf16 %v6144_v9, %v6144_v9  ;;  %v4292_v9 = vld [vmem:[#allocation2 + $0x208] sm:$0xff] }
 0x330   :  { %5448 = vmatprep.subr.bf16.mxu1 %v4257_v21  ;;  %v4209_v21 = vpack.c.bf16 %v6147_v22, %v6147_v22  ;;  %v4308_v22 = vld [vmem:[#allocation2 + $0x288] sm:$0xff] }
 0x332   :  { %5427 = vmatpush3.bf16.msra.mxu0 %v4233_v36  ;;  %v4291_v36 = vld [vmem:[#allocation2 + $0x200] sm:$0xff] }
 0x333   :  { %5449 = vmatpush3.bf16.msra.mxu1 %v4249_v59  ;;  %5428 = vmatprep.subr.bf16.mxu0 %v4242_v37  ;;  %v4307_v59 = vld [vmem:[#allocation2 + $0x280] sm:$0xff]  ;;  %v4300_v37 = vld [vmem:[#allocation2 + $0x248] sm:$0xff] }
 0x334   :  { %5450 = vmatprep.subr.bf16.mxu1 %v4258_v40  ;;  %v4316_v40 = vld [vmem:[#allocation2 + $0x2c8] sm:$0xff] }
 0x336   :  { %5429 = vmatpush3.bf16.msra.mxu0 %v4234_v42  ;;  %v4212_v42 = vpack.c.bf16 %v6194_v49, %v6194_v49  ;;  %v4293_v49 = vld [vmem:[#allocation2 + $0x210] sm:$0xff] }
 0x337   :  { %5451 = vmatpush3.bf16.msra.mxu1 %v4250_v60  ;;  %5458 = vmatprep.subr.bf16.mxu0 %v4267_v61  ;;  %v4214_v60 = vpack.c.bf16 %v6196_v53, %v6196_v53  ;;  %v4301_v61 = vld [vmem:[#allocation2 + $0x250] sm:$0xff]  ;;  %v4318_v53 = vld [vmem:[#allocation2 + $0x2d8] sm:$0xff] }
 0x338   :  { %5480 = vmatprep.subr.bf16.mxu1 %v4283_v62  ;;  %v4317_v62 = vld [vmem:[#allocation2 + $0x2d0] sm:$0xff] }
 0x339   :  { %4459 = vmatmul.mubr.bf16.vlgmr.msra.gmra.mrb[24].mxu0 %v4203_v63  ;;  %v4309_v63 = vld [vmem:[#allocation2 + $0x290] sm:$0xff] }
 0x33a   :  { %4499 = vmatmul.mubr.bf16.vlgmr.msra.gmra.mrb[24].mxu1 %v4205_v1  ;;  %5459 = vmatpush3.bf16.msra.mxu0 %v4259_v45  ;;  %v4302_v1 = vld [vmem:[#allocation2 + $0x258] sm:$0xff] }
 0x33b   :  { %5481 = vmatpush3.bf16.msra.mxu1 %v4275_v51  ;;  %5460 = vmatprep.subr.bf16.mxu0 %v4268_v52  ;;  %v4294_v45 = vld [vmem:[#allocation2 + $0x218] sm:$0xff]  ;;  %v4303_v52 = vld [vmem:[#allocation2 + $0x260] sm:$0xff] }
 0x33c   :  { %5482 = vmatprep.subr.bf16.mxu1 %v4284_v54  ;;  %4538 = vmatprep.mubr.bf16.mxu0 %v4208_v7  ;;  %v4310_v51 = vld [vmem:[#allocation2 + $0x298] sm:$0xff]  ;;  %v4319_v54 = vld [vmem:[#allocation2 + $0x2e0] sm:$0xff] }
 0x33d   :  { %4578 = vmatprep.mubr.bf16.mxu1 %v4210_v50  ;;  %v4295_v7 = vld [vmem:[#allocation2 + $0x220] sm:$0xff] }
 0x33e   :  { %5461 = vmatpush3.bf16.msra.mxu0 %v4260_v17  ;;  %v4311_v50 = vld [vmem:[#allocation2 + $0x2a0] sm:$0xff]  ;;  %v4304_v17 = vld [vmem:[#allocation2 + $0x268] sm:$0xff] }
 0x33f   :  { %5483 = vmatpush3.bf16.msra.mxu1 %v4276_v20  ;;  %5462 = vmatprep.subr.bf16.mxu0 %v4269_v8  ;;  %v4320_v20 = vld [vmem:[#allocation2 + $0x2e8] sm:$0xff] }
 0x340   :  { %5484 = vmatprep.subr.bf16.mxu1 %v4285_v10  ;;  %v4296_v8 = vld [vmem:[#allocation2 + $0x228] sm:$0xff] }
 0x341   :  { %v4312_v10 = vld [vmem:[#allocation2 + $0x2a8] sm:$0xff] }
 0x342   :  { %5463 = vmatpush3.bf16.msra.mxu0 %v4261_v25  ;;  %v4305_v25 = vld [vmem:[#allocation2 + $0x270] sm:$0xff] }
 0x343   :  { %5485 = vmatpush3.bf16.msra.mxu1 %v4277_v14  ;;  %5464 = vmatprep.subr.bf16.mxu0 %v4270_v0  ;;  %v4321_v14 = vld [vmem:[#allocation2 + $0x2f0] sm:$0xff] }
 0x344   :  { %5486 = vmatprep.subr.bf16.mxu1 %v4286_v30  ;;  %v4297_v0 = vld [vmem:[#allocation2 + $0x230] sm:$0xff] }
 0x345   :  { %v4313_v30 = vld [vmem:[#allocation2 + $0x2b0] sm:$0xff] }
 0x346   :  { %5465 = vmatpush3.bf16.msra.mxu0 %v4262_v57  ;;  %v4306_v57 = vld [vmem:[#allocation2 + $0x278] sm:$0xff] }
 0x347   :  { %5487 = vmatpush3.bf16.msra.mxu1 %v4278_v19  ;;  %5466 = vmatprep.subr.bf16.mxu0 %v4271_v27  ;;  %v4322_v19 = vld [vmem:[#allocation2 + $0x2f8] sm:$0xff] }
 0x348   :  { %5488 = vmatprep.subr.bf16.mxu1 %v4287_v16  ;;  %v4298_v27 = vld [vmem:[#allocation2 + $0x238] sm:$0xff] }
 0x349   :  { %v4314_v16 = vld [vmem:[#allocation2 + $0x2b8] sm:$0xff] }
 0x34a   :  { %5467 = vmatpush3.bf16.msra.mxu0 %v4263_v24  ;;  %v4331_v24 = vld [vmem:[#allocation2 + $0x340] sm:$0xff] }
 0x34b   :  { %5489 = vmatpush3.bf16.msra.mxu1 %v4279_v6  ;;  %5468 = vmatprep.subr.bf16.mxu0 %v4272_v28  ;;  %v4347_v6 = vld [vmem:[#allocation2 + $0x3c0] sm:$0xff]  ;;  %v4211_v28 = vpack.c.bf16 %v6188_v41, %v6188_v41  ;;  %v4324_v41 = vld [vmem:[#allocation2 + $0x308] sm:$0xff] }
 0x34c   :  { %5490 = vmatprep.subr.bf16.mxu1 %v4288_v33  ;;  %v4213_v33 = vpack.c.bf16 %v6191_v44, %v6191_v44  ;;  %v4340_v44 = vld [vmem:[#allocation2 + $0x388] sm:$0xff] }
 0x34e   :  { %5469 = vmatpush3.bf16.msra.mxu0 %v4264_v12  ;;  %v4323_v12 = vld [vmem:[#allocation2 + $0x300] sm:$0xff] }
 0x34f   :  { %5491 = vmatpush3.bf16.msra.mxu1 %v4280_v34  ;;  %5470 = vmatprep.subr.bf16.mxu0 %v4273_v35  ;;  %v4339_v34 = vld [vmem:[#allocation2 + $0x380] sm:$0xff]  ;;  %v4332_v35 = vld [vmem:[#allocation2 + $0x348] sm:$0xff] }
 0x350   :  { %5492 = vmatprep.subr.bf16.mxu1 %v4289_v43  ;;  %v4348_v43 = vld [vmem:[#allocation2 + $0x3c8] sm:$0xff] }
 0x352   :  { %5471 = vmatpush3.bf16.msra.mxu0 %v4265_v46  ;;  %v4216_v46 = vpack.c.bf16 %v6214_v39, %v6214_v39  ;;  %v4325_v39 = vld [vmem:[#allocation2 + $0x310] sm:$0xff] }
 0x353   :  { %5493 = vmatpush3.bf16.msra.mxu1 %v4281_v48  ;;  %5472 = vmatprep.subr.bf16.mxu0 %v4274_v5  ;;  %v4218_v48 = vpack.c.bf16 %v6216_v18, %v6216_v18  ;;  %v4333_v5 = vld [vmem:[#allocation2 + $0x350] sm:$0xff]  ;;  %v4350_v18 = vld [vmem:[#allocation2 + $0x3d8] sm:$0xff] }
 0x354   :  { %5494 = vmatprep.subr.bf16.mxu1 %v4290_v29  ;;  %v4349_v29 = vld [vmem:[#allocation2 + $0x3d0] sm:$0xff] }
 0x356   :  { %5473 = vmatpush3.bf16.msra.mxu0 %v4266_v55  ;;  %v4341_v55 = vld [vmem:[#allocation2 + $0x390] sm:$0xff] }
 0x357   :  { %5495 = vmatpush3.bf16.msra.mxu1 %v4282_v26  ;;  %5502 = vmatprep.subr.bf16.mxu0 %v4299_v32  ;;  %v4334_v26 = vld [vmem:[#allocation2 + $0x358] sm:$0xff] }
 0x358   :  { %5524 = vmatprep.subr.bf16.mxu1 %v4315_v38  ;;  %v4326_v32 = vld [vmem:[#allocation2 + $0x318] sm:$0xff] }
 0x359   :  { %4539 = vmatmul.mubr.bf16.vlgmr.msra.gmra.mrb[28].mxu0 %v4207_v58  ;;  %v4342_v38 = vld [vmem:[#allocation2 + $0x398] sm:$0xff]  ;;  %v4335_v58 = vld [vmem:[#allocation2 + $0x360] sm:$0xff] }
 0x35a   :  { %4579 = vmatmul.mubr.bf16.vlgmr.msra.gmra.mrb[28].mxu1 %v4209_v21  ;;  %5503 = vmatpush3.bf16.msra.mxu0 %v4291_v36  ;;  %v4351_v21 = vld [vmem:[#allocation2 + $0x3e0] sm:$0xff] }
 0x35b   :  { %5525 = vmatpush3.bf16.msra.mxu1 %v4307_v59  ;;  %5504 = vmatprep.subr.bf16.mxu0 %v4300_v37  ;;  %v4327_v36 = vld [vmem:[#allocation2 + $0x320] sm:$0xff]  ;;  %v4336_v37 = vld [vmem:[#allocation2 + $0x368] sm:$0xff] }
 0x35c   :  { %5526 = vmatprep.subr.bf16.mxu1 %v4316_v40  ;;  %4618 = vmatprep.mubr.bf16.mxu0 %v4212_v42  ;;  %v4343_v59 = vld [vmem:[#allocation2 + $0x3a0] sm:$0xff]  ;;  %v4352_v40 = vld [vmem:[#allocation2 + $0x3e8] sm:$0xff] }
 0x35d   :  { %4658 = vmatprep.mubr.bf16.mxu1 %v4214_v60  ;;  %v4328_v42 = vld [vmem:[#allocation2 + $0x328] sm:$0xff] }
 0x35e   :  { %5505 = vmatpush3.bf16.msra.mxu0 %v4292_v9  ;;  %v4344_v60 = vld [vmem:[#allocation2 + $0x3a8] sm:$0xff]  ;;  %v4337_v9 = vld [vmem:[#allocation2 + $0x370] sm:$0xff] }
 0x35f   :  { %5527 = vmatpush3.bf16.msra.mxu1 %v4308_v22  ;;  %5506 = vmatprep.subr.bf16.mxu0 %v4301_v61  ;;  %v4353_v22 = vld [vmem:[#allocation2 + $0x3f0] sm:$0xff] }
 0x360   :  { %5528 = vmatprep.subr.bf16.mxu1 %v4317_v62  ;;  %v4329_v61 = vld [vmem:[#allocation2 + $0x330] sm:$0xff] }
 0x361   :  { %v4345_v62 = vld [vmem:[#allocation2 + $0x3b0] sm:$0xff] }
 0x362   :  { %5507 = vmatpush3.bf16.msra.mxu0 %v4293_v49  ;;  %v4338_v49 = vld [vmem:[#allocation2 + $0x378] sm:$0xff] }
 0x363   :  { %5529 = vmatpush3.bf16.msra.mxu1 %v4309_v63  ;;  %5508 = vmatprep.subr.bf16.mxu0 %v4302_v1  ;;  %v4354_v63 = vld [vmem:[#allocation2 + $0x3f8] sm:$0xff] }
 0x364   :  { %5530 = vmatprep.subr.bf16.mxu1 %v4318_v53  ;;  %v4330_v1 = vld [vmem:[#allocation2 + $0x338] sm:$0xff] }
 0x365   :  { %v4346_v53 = vld [vmem:[#allocation2 + $0x3b8] sm:$0xff] }
 0x366   :  { %5509 = vmatpush3.bf16.msra.mxu0 %v4294_v45  ;;  %v4363_v45 = vld [vmem:[#allocation2 + $0x440] sm:$0xff] }
 0x367   :  { %5531 = vmatpush3.bf16.msra.mxu1 %v4310_v51  ;;  %5510 = vmatprep.subr.bf16.mxu0 %v4303_v52  ;;  %v4379_v51 = vld [vmem:[#allocation2 + $0x4c0] sm:$0xff]  ;;  %v4215_v52 = vpack.c.bf16 %v6210_v31, %v6210_v31  ;;  %v4356_v31 = vld [vmem:[#allocation2 + $0x408] sm:$0xff] }
 0x368   :  { %5532 = vmatprep.subr.bf16.mxu1 %v4319_v54  ;;  %v4217_v54 = vpack.c.bf16 %v6212_v11, %v6212_v11  ;;  %v4372_v11 = vld [vmem:[#allocation2 + $0x488] sm:$0xff] }
 0x36a   :  { %5511 = vmatpush3.bf16.msra.mxu0 %v4295_v7  ;;  %v4355_v7 = vld [vmem:[#allocation2 + $0x400] sm:$0xff] }
 0x36b   :  { %5533 = vmatpush3.bf16.msra.mxu1 %v4311_v50  ;;  %5512 = vmatprep.subr.bf16.mxu0 %v4304_v17  ;;  %v4371_v50 = vld [vmem:[#allocation2 + $0x480] sm:$0xff]  ;;  %v4364_v17 = vld [vmem:[#allocation2 + $0x448] sm:$0xff] }
 0x36c   :  { %5534 = vmatprep.subr.bf16.mxu1 %v4320_v20  ;;  %v4380_v20 = vld [vmem:[#allocation2 + $0x4c8] sm:$0xff] }
 0x36e   :  { %5513 = vmatpush3.bf16.msra.mxu0 %v4296_v8  ;;  %v4220_v8 = vpack.c.bf16 %v6238_v23, %v6238_v23  ;;  %v4357_v23 = vld [vmem:[#allocation2 + $0x410] sm:$0xff] }
 0x36f   :  { %5535 = vmatpush3.bf16.msra.mxu1 %v4312_v10  ;;  %5514 = vmatprep.subr.bf16.mxu0 %v4305_v25  ;;  %v4222_v10 = vpack.c.bf16 %v6240_v15, %v6240_v15  ;;  %v4365_v25 = vld [vmem:[#allocation2 + $0x450] sm:$0xff]  ;;  %v4382_v15 = vld [vmem:[#allocation2 + $0x4d8] sm:$0xff] }
 0x370   :  { %5536 = vmatprep.subr.bf16.mxu1 %v4321_v14  ;;  %v4381_v14 = vld [vmem:[#allocation2 + $0x4d0] sm:$0xff] }
 0x372   :  { %5515 = vmatpush3.bf16.msra.mxu0 %v4297_v0  ;;  %v4373_v0 = vld [vmem:[#allocation2 + $0x490] sm:$0xff] }
 0x373   :  { %5537 = vmatpush3.bf16.msra.mxu1 %v4313_v30  ;;  %5516 = vmatprep.subr.bf16.mxu0 %v4306_v57  ;;  %v4366_v30 = vld [vmem:[#allocation2 + $0x458] sm:$0xff] }
 0x374   :  { %5538 = vmatprep.subr.bf16.mxu1 %v4322_v19  ;;  %v4358_v57 = vld [vmem:[#allocation2 + $0x418] sm:$0xff] }
 0x375   :  { %v4374_v19 = vld [vmem:[#allocation2 + $0x498] sm:$0xff] }
 0x376   :  { %5517 = vmatpush3.bf16.msra.mxu0 %v4298_v27  ;;  %v4367_v27 = vld [vmem:[#allocation2 + $0x460] sm:$0xff] }
 0x377   :  { %5539 = vmatpush3.bf16.msra.mxu1 %v4314_v16  ;;  %5546 = vmatprep.subr.bf16.mxu0 %v4331_v24  ;;  %v4383_v16 = vld [vmem:[#allocation2 + $0x4e0] sm:$0xff] }
 0x378   :  { %5568 = vmatprep.subr.bf16.mxu1 %v4347_v6  ;;  %v4359_v24 = vld [vmem:[#allocation2 + $0x420] sm:$0xff] }
 0x379   :  { %4619 = vmatmul.mubr.bf16.vlgmr.msra.gmra.mrb[32].mxu0 %v4211_v28  ;;  %v4375_v6 = vld [vmem:[#allocation2 + $0x4a0] sm:$0xff]  ;;  %v4368_v28 = vld [vmem:[#allocation2 + $0x468] sm:$0xff] }
 0x37a   :  { %4659 = vmatmul.mubr.bf16.vlgmr.msra.gmra.mrb[32].mxu1 %v4213_v33  ;;  %5547 = vmatpush3.bf16.msra.mxu0 %v4323_v12  ;;  %v4384_v33 = vld [vmem:[#allocation2 + $0x4e8] sm:$0xff] }
 0x37b   :  { %5569 = vmatpush3.bf16.msra.mxu1 %v4339_v34  ;;  %5548 = vmatprep.subr.bf16.mxu0 %v4332_v35  ;;  %v4360_v12 = vld [vmem:[#allocation2 + $0x428] sm:$0xff]  ;;  %v4369_v35 = vld [vmem:[#allocation2 + $0x470] sm:$0xff] }
 0x37c   :  { %5570 = vmatprep.subr.bf16.mxu1 %v4348_v43  ;;  %4698 = vmatprep.mubr.bf16.mxu0 %v4216_v46  ;;  %v4376_v34 = vld [vmem:[#allocation2 + $0x4a8] sm:$0xff]  ;;  %v4385_v43 = vld [vmem:[#allocation2 + $0x4f0] sm:$0xff] }
 0x37d   :  { %4738 = vmatprep.mubr.bf16.mxu1 %v4218_v48  ;;  %v4361_v46 = vld [vmem:[#allocation2 + $0x430] sm:$0xff] }
 0x37e   :  { %5549 = vmatpush3.bf16.msra.mxu0 %v4324_v41  ;;  %v4377_v48 = vld [vmem:[#allocation2 + $0x4b0] sm:$0xff]  ;;  %v4370_v41 = vld [vmem:[#allocation2 + $0x478] sm:$0xff] }
 0x37f   :  { %5571 = vmatpush3.bf16.msra.mxu1 %v4340_v44  ;;  %5550 = vmatprep.subr.bf16.mxu0 %v4333_v5  ;;  %v4386_v44 = vld [vmem:[#allocation2 + $0x4f8] sm:$0xff] }
 0x380   :  { %5572 = vmatprep.subr.bf16.mxu1 %v4349_v29  ;;  %v4362_v5 = vld [vmem:[#allocation2 + $0x438] sm:$0xff] }
 0x381   :  { %v4378_v29 = vld [vmem:[#allocation2 + $0x4b8] sm:$0xff] }
 0x382   :  { %5551 = vmatpush3.bf16.msra.mxu0 %v4325_v39  ;;  %v4395_v39 = vld [vmem:[#allocation2 + $0x540] sm:$0xff] }
 0x383   :  { %5573 = vmatpush3.bf16.msra.mxu1 %v4341_v55  ;;  %5552 = vmatprep.subr.bf16.mxu0 %v4334_v26  ;;  %v4411_v55 = vld [vmem:[#allocation2 + $0x5c0] sm:$0xff]  ;;  %v4219_v26 = vpack.c.bf16 %v6234_v13, %v6234_v13  ;;  %v4388_v13 = vld [vmem:[#allocation2 + $0x508] sm:$0xff] }
 0x384   :  { %5574 = vmatprep.subr.bf16.mxu1 %v4350_v18  ;;  %v4221_v18 = vpack.c.bf16 %v6236_v56, %v6236_v56  ;;  %v4404_v56 = vld [vmem:[#allocation2 + $0x588] sm:$0xff] }
 0x386   :  { %5553 = vmatpush3.bf16.msra.mxu0 %v4326_v32  ;;  %v4387_v32 = vld [vmem:[#allocation2 + $0x500] sm:$0xff] }
 0x387   :  { %5575 = vmatpush3.bf16.msra.mxu1 %v4342_v38  ;;  %5554 = vmatprep.subr.bf16.mxu0 %v4335_v58  ;;  %v4403_v38 = vld [vmem:[#allocation2 + $0x580] sm:$0xff]  ;;  %v4396_v58 = vld [vmem:[#allocation2 + $0x548] sm:$0xff] }
 0x388   :  { %5576 = vmatprep.subr.bf16.mxu1 %v4351_v21  ;;  %v4412_v21 = vld [vmem:[#allocation2 + $0x5c8] sm:$0xff] }
 0x38a   :  { %5555 = vmatpush3.bf16.msra.mxu0 %v4327_v36  ;;  %v4224_v36 = vpack.c.bf16 %v6250_v47, %v6250_v47  ;;  %v4389_v47 = vld [vmem:[#allocation2 + $0x510] sm:$0xff] }
 0x38b   :  { %5577 = vmatpush3.bf16.msra.mxu1 %v4343_v59  ;;  %5556 = vmatprep.subr.bf16.mxu0 %v4336_v37  ;;  %v4226_v59 = vpack.c.bf16 %v6252_v4, %v6252_v4  ;;  %v4397_v37 = vld [vmem:[#allocation2 + $0x550] sm:$0xff]  ;;  %v4414_v4 = vld [vmem:[#allocation2 + $0x5d8] sm:$0xff] }
 0x38c   :  { %5578 = vmatprep.subr.bf16.mxu1 %v4352_v40  ;;  %v4413_v40 = vld [vmem:[#allocation2 + $0x5d0] sm:$0xff] }
 0x38e   :  { %5557 = vmatpush3.bf16.msra.mxu0 %v4328_v42  ;;  %v4405_v42 = vld [vmem:[#allocation2 + $0x590] sm:$0xff] }
 0x38f   :  { %5579 = vmatpush3.bf16.msra.mxu1 %v4344_v60  ;;  %5558 = vmatprep.subr.bf16.mxu0 %v4337_v9  ;;  %v4398_v60 = vld [vmem:[#allocation2 + $0x558] sm:$0xff] }
 0x390   :  { %5580 = vmatprep.subr.bf16.mxu1 %v4353_v22  ;;  %v4390_v9 = vld [vmem:[#allocation2 + $0x518] sm:$0xff] }
 0x391   :  { %v4406_v22 = vld [vmem:[#allocation2 + $0x598] sm:$0xff] }
 0x392   :  { %5559 = vmatpush3.bf16.msra.mxu0 %v4329_v61  ;;  %v4399_v61 = vld [vmem:[#allocation2 + $0x560] sm:$0xff] }
 0x393   :  { %5581 = vmatpush3.bf16.msra.mxu1 %v4345_v62  ;;  %5560 = vmatprep.subr.bf16.mxu0 %v4338_v49  ;;  %v4415_v62 = vld [vmem:[#allocation2 + $0x5e0] sm:$0xff] }
 0x394   :  { %5582 = vmatprep.subr.bf16.mxu1 %v4354_v63  ;;  %v4391_v49 = vld [vmem:[#allocation2 + $0x520] sm:$0xff] }
 0x395   :  { %v4407_v63 = vld [vmem:[#allocation2 + $0x5a0] sm:$0xff] }
 0x396   :  { %5561 = vmatpush3.bf16.msra.mxu0 %v4330_v1  ;;  %v4400_v1 = vld [vmem:[#allocation2 + $0x568] sm:$0xff] }
 0x397   :  { %5583 = vmatpush3.bf16.msra.mxu1 %v4346_v53  ;;  %5590 = vmatprep.subr.bf16.mxu0 %v4363_v45  ;;  %v4416_v53 = vld [vmem:[#allocation2 + $0x5e8] sm:$0xff] }
 0x398   :  { %5612 = vmatprep.subr.bf16.mxu1 %v4379_v51  ;;  %v4392_v45 = vld [vmem:[#allocation2 + $0x528] sm:$0xff] }
 0x399   :  { %4699 = vmatmul.mubr.bf16.vlgmr.msra.gmra.mrb[36].mxu0 %v4215_v52  ;;  %v4408_v51 = vld [vmem:[#allocation2 + $0x5a8] sm:$0xff]  ;;  %v4401_v52 = vld [vmem:[#allocation2 + $0x570] sm:$0xff] }
 0x39a   :  { %4739 = vmatmul.mubr.bf16.vlgmr.msra.gmra.mrb[36].mxu1 %v4217_v54  ;;  %5591 = vmatpush3.bf16.msra.mxu0 %v4355_v7  ;;  %v4417_v54 = vld [vmem:[#allocation2 + $0x5f0] sm:$0xff] }
 0x39b   :  { %5613 = vmatpush3.bf16.msra.mxu1 %v4371_v50  ;;  %5592 = vmatprep.subr.bf16.mxu0 %v4364_v17  ;;  %v4393_v7 = vld [vmem:[#allocation2 + $0x530] sm:$0xff]  ;;  %v4402_v17 = vld [vmem:[#allocation2 + $0x578] sm:$0xff] }
 0x39c   :  { %5614 = vmatprep.subr.bf16.mxu1 %v4380_v20  ;;  %4778 = vmatprep.mubr.bf16.mxu0 %v4220_v8  ;;  %v4409_v50 = vld [vmem:[#allocation2 + $0x5b0] sm:$0xff]  ;;  %v4418_v20 = vld [vmem:[#allocation2 + $0x5f8] sm:$0xff] }
 0x39d   :  { %4818 = vmatprep.mubr.bf16.mxu1 %v4222_v10  ;;  %v4394_v8 = vld [vmem:[#allocation2 + $0x538] sm:$0xff] }
 0x39e   :  { %5593 = vmatpush3.bf16.msra.mxu0 %v4356_v31  ;;  %v4410_v10 = vld [vmem:[#allocation2 + $0x5b8] sm:$0xff]  ;;  %v4223_v31 = vpack.c.bf16 %v6246_v2, %v6246_v2 }
 0x39f   :  { %5615 = vmatpush3.bf16.msra.mxu1 %v4372_v11  ;;  %5594 = vmatprep.subr.bf16.mxu0 %v4365_v25  ;;  %v4225_v11 = vpack.c.bf16 %v6248_v3, %v6248_v3 }
 0x3a0   :  { %5616 = vmatprep.subr.bf16.mxu1 %v4381_v14 }
 0x3a2   :  { %5595 = vmatpush3.bf16.msra.mxu0 %v4357_v23  ;;  %v5412_v23 = vld [vmem:[#allocation9] ss:$0 sm:$0xff] }
 0x3a3   :  { %5617 = vmatpush3.bf16.msra.mxu1 %v4373_v0  ;;  %5596 = vmatprep.subr.bf16.mxu0 %v4366_v30 }
 0x3a4   :  { %5618 = vmatprep.subr.bf16.mxu1 %v4382_v15 }
 0x3a6   :  { %5597 = vmatpush3.bf16.msra.mxu0 %v4358_v57 }
 0x3a7   :  { %5619 = vmatpush3.bf16.msra.mxu1 %v4374_v19  ;;  %5598 = vmatprep.subr.bf16.mxu0 %v4367_v27 }
 0x3a8   :  { %5620 = vmatprep.subr.bf16.mxu1 %v4383_v16 }
 0x3aa   :  { %5599 = vmatpush3.bf16.msra.mxu0 %v4359_v24 }
 0x3ab   :  { %5621 = vmatpush3.bf16.msra.mxu1 %v4375_v6  ;;  %5600 = vmatprep.subr.bf16.mxu0 %v4368_v28 }
 0x3ac   :  { %5622 = vmatprep.subr.bf16.mxu1 %v4384_v33 }
 0x3ae   :  { %5601 = vmatpush3.bf16.msra.mxu0 %v4360_v12 }
 0x3af   :  { %5623 = vmatpush3.bf16.msra.mxu1 %v4376_v34  ;;  %5602 = vmatprep.subr.bf16.mxu0 %v4369_v35 }
 0x3b0   :  { %5624 = vmatprep.subr.bf16.mxu1 %v4385_v43 }
 0x3b2   :  { %5603 = vmatpush3.bf16.msra.mxu0 %v4361_v46 }
 0x3b3   :  { %5625 = vmatpush3.bf16.msra.mxu1 %v4377_v48  ;;  %5604 = vmatprep.subr.bf16.mxu0 %v4370_v41 }
 0x3b4   :  { %5626 = vmatprep.subr.bf16.mxu1 %v4386_v44 }
 0x3b6   :  { %5605 = vmatpush3.bf16.msra.mxu0 %v4362_v5 }
 0x3b7   :  { %5627 = vmatpush3.bf16.msra.mxu1 %v4378_v29  ;;  %5634 = vmatprep.subr.bf16.mxu0 %v4395_v39 }
 0x3b8   :  { %5656 = vmatprep.subr.bf16.mxu1 %v4411_v55 }
 0x3b9   :  { %4779 = vmatmul.mubr.bf16.vlgmr.msra.gmra.mrb[40].mxu0 %v4219_v26 }
 0x3ba   :  { %4819 = vmatmul.mubr.bf16.vlgmr.msra.gmra.mrb[40].mxu1 %v4221_v18  ;;  %5635 = vmatpush3.bf16.msra.mxu0 %v4387_v32 }
 0x3bb   :  { %5657 = vmatpush3.bf16.msra.mxu1 %v4403_v38  ;;  %5636 = vmatprep.subr.bf16.mxu0 %v4396_v58 }
 0x3bc   :  { %5658 = vmatprep.subr.bf16.mxu1 %v4412_v21  ;;  %4858 = vmatprep.mubr.bf16.mxu0 %v4224_v36 }
 0x3bd   :  { %4898 = vmatprep.mubr.bf16.mxu1 %v4226_v59 }
 0x3be   :  { %5637 = vmatpush3.bf16.msra.mxu0 %v4388_v13 }
 0x3bf   :  { %5659 = vmatpush3.bf16.msra.mxu1 %v4404_v56  ;;  %5638 = vmatprep.subr.bf16.mxu0 %v4397_v37 }
 0x3c0   :  { %5660 = vmatprep.subr.bf16.mxu1 %v4413_v40 }
 0x3c2   :  { %5639 = vmatpush3.bf16.msra.mxu0 %v4389_v47 }
 0x3c3   :  { %5661 = vmatpush3.bf16.msra.mxu1 %v4405_v42  ;;  %5640 = vmatprep.subr.bf16.mxu0 %v4398_v60 }
 0x3c4   :  { %5662 = vmatprep.subr.bf16.mxu1 %v4414_v4 }
 0x3c6   :  { %5641 = vmatpush3.bf16.msra.mxu0 %v4390_v9 }
 0x3c7   :  { %5663 = vmatpush3.bf16.msra.mxu1 %v4406_v22  ;;  %5642 = vmatprep.subr.bf16.mxu0 %v4399_v61 }
 0x3c8   :  { %5664 = vmatprep.subr.bf16.mxu1 %v4415_v62 }
 0x3ca   :  { %5643 = vmatpush3.bf16.msra.mxu0 %v4391_v49 }
 0x3cb   :  { %5665 = vmatpush3.bf16.msra.mxu1 %v4407_v63  ;;  %5644 = vmatprep.subr.bf16.mxu0 %v4400_v1 }
 0x3cc   :  { %5666 = vmatprep.subr.bf16.mxu1 %v4416_v53 }
 0x3ce   :  { %5645 = vmatpush3.bf16.msra.mxu0 %v4392_v45 }
 0x3cf   :  { %5667 = vmatpush3.bf16.msra.mxu1 %v4408_v51  ;;  %5646 = vmatprep.subr.bf16.mxu0 %v4401_v52 }
 0x3d0   :  { %5668 = vmatprep.subr.bf16.mxu1 %v4417_v54 }
 0x3d2   :  { %5647 = vmatpush3.bf16.msra.mxu0 %v4393_v7 }
 0x3d3   :  { %5669 = vmatpush3.bf16.msra.mxu1 %v4409_v50  ;;  %5648 = vmatprep.subr.bf16.mxu0 %v4402_v17 }
 0x3d4   :  { %5670 = vmatprep.subr.bf16.mxu1 %v4418_v20 }
 0x3d6   :  { %5649 = vmatpush3.bf16.msra.mxu0 %v4394_v8 }
 0x3d7   :  { %5671 = vmatpush3.bf16.msra.mxu1 %v4410_v10 }
 0x3d9   :  { %4859 = vmatmul.mubr.bf16.vlgmr.msra.gmra.mrb[44].mxu0 %v4223_v31 }
 0x3da   :  { %4899 = vmatmul.mubr.bf16.vlgmr.msra.gmra.mrb[44].mxu1 %v4225_v11 }
 0x40c   :  { %v5430_v25 = vpop.f32.mrb[24].mxu0 }
 0x40d   :  { %v5452_v14 = vpop.f32.mrb[24].mxu1  ;;  %v5431_v0 = vpop.f32.mrb[25].mxu0 }
 0x40e   :  { %v5453_v30 = vpop.f32.mrb[25].mxu1  ;;  %v5432_v15 = vadd.f32 %v5431_v0, %v5430_v25  ;;  %v5433_v19 = vpop.f32.mrb[26].mxu0 }
 0x40f   :  { %v5454_v57 = vadd.f32 %v5453_v30, %v5452_v14  ;;  %v5455_v27 = vpop.f32.mrb[26].mxu1  ;;  %v5434_v16 = vpop.f32.mrb[27].mxu0 }
 0x410   :  { %v5456_v24 = vpop.f32.mrb[27].mxu1  ;;  %v4461_v6 = vadd.f32 %v5432_v15, %v5412_v23 }
 0x412   :  { %v4501_v2 = vadd.f32 %v5454_v57, %v4461_v6 }
 0x42c   :  { %v5474_v28 = vpop.f32.mrb[28].mxu0 }
 0x42d   :  { %v5496_v33 = vpop.f32.mrb[28].mxu1  ;;  %v5475_v3 = vpop.f32.mrb[29].mxu0 }
 0x42e   :  { %v5497_v12 = vpop.f32.mrb[29].mxu1  ;;  %v5476_v34 = vadd.f32 %v5475_v3, %v5474_v28  ;;  %v5477_v43 = vpop.f32.mrb[30].mxu0 }
 0x42f   :  { %v5498_v35 = vadd.f32 %v5497_v12, %v5496_v33  ;;  %v5499_v46 = vpop.f32.mrb[30].mxu1  ;;  %v5478_v48 = vpop.f32.mrb[31].mxu0 }
 0x430   :  { %v5500_v41 = vpop.f32.mrb[31].mxu1  ;;  %v4541_v44 = vadd.f32 %v5476_v34, %v4501_v2 }
 0x432   :  { %v4581_v5 = vadd.f32 %v5498_v35, %v4541_v44 }
 0x44c   :  { %v5518_v29 = vpop.f32.mrb[32].mxu0 }
 0x44d   :  { %v5540_v39 = vpop.f32.mrb[32].mxu1  ;;  %v5519_v55 = vpop.f32.mrb[33].mxu0 }
 0x44e   :  { %v5541_v26 = vpop.f32.mrb[33].mxu1  ;;  %v5520_v18 = vadd.f32 %v5519_v55, %v5518_v29  ;;  %v5521_v38 = vpop.f32.mrb[34].mxu0 }
 0x44f   :  { %v5542_v32 = vadd.f32 %v5541_v26, %v5540_v39  ;;  %v5543_v58 = vpop.f32.mrb[34].mxu1  ;;  %v5522_v21 = vpop.f32.mrb[35].mxu0 }
 0x450   :  { %v5544_v36 = vpop.f32.mrb[35].mxu1  ;;  %v4621_v59 = vadd.f32 %v5520_v18, %v4581_v5 }
 0x452   :  { %v4661_v13 = vadd.f32 %v5542_v32, %v4621_v59 }
 0x46c   :  { %v5562_v56 = vpop.f32.mrb[36].mxu0 }
 0x46d   :  { %v5584_v37 = vpop.f32.mrb[36].mxu1  ;;  %v5563_v40 = vpop.f32.mrb[37].mxu0 }
 0x46e   :  { %v5585_v47 = vpop.f32.mrb[37].mxu1  ;;  %v5564_v42 = vadd.f32 %v5563_v40, %v5562_v56  ;;  %v5565_v4 = vpop.f32.mrb[38].mxu0 }
 0x46f   :  { %v5586_v60 = vadd.f32 %v5585_v47, %v5584_v37  ;;  %v5587_v9 = vpop.f32.mrb[38].mxu1  ;;  %v5566_v22 = vpop.f32.mrb[39].mxu0 }
 0x470   :  { %v5588_v61 = vpop.f32.mrb[39].mxu1  ;;  %v4701_v62 = vadd.f32 %v5564_v42, %v4661_v13 }
 0x472   :  { %v4741_v49 = vadd.f32 %v5586_v60, %v4701_v62 }
 0x48c   :  { %v5606_v63 = vpop.f32.mrb[40].mxu0 }
 0x48d   :  { %v5628_v1 = vpop.f32.mrb[40].mxu1  ;;  %v5607_v53 = vpop.f32.mrb[41].mxu0 }
 0x48e   :  { %v5629_v45 = vpop.f32.mrb[41].mxu1  ;;  %v5608_v51 = vadd.f32 %v5607_v53, %v5606_v63  ;;  %v5609_v54 = vpop.f32.mrb[42].mxu0 }
 0x48f   :  { %v5630_v52 = vadd.f32 %v5629_v45, %v5628_v1  ;;  %v5631_v7 = vpop.f32.mrb[42].mxu1  ;;  %v5610_v50 = vpop.f32.mrb[43].mxu0 }
 0x490   :  { %v5632_v17 = vpop.f32.mrb[43].mxu1  ;;  %v4781_v20 = vadd.f32 %v5608_v51, %v4741_v49 }
 0x492   :  { %v4821_v8 = vadd.f32 %v5630_v52, %v4781_v20 }
 0x4ac   :  { %v5650_v10 = vpop.f32.mrb[44].mxu0 }
 0x4ad   :  { %v5672_v31 = vpop.f32.mrb[44].mxu1  ;;  %v5651_v11 = vpop.f32.mrb[45].mxu0 }
 0x4ae   :  { %v5673_v25 = vpop.f32.mrb[45].mxu1  ;;  %v5652_v14 = vadd.f32 %v5651_v11, %v5650_v10  ;;  %v5653_v0 = vpop.f32.mrb[46].mxu0 }
 0x4af   :  { %v5674_v23 = vadd.f32 %v5673_v25, %v5672_v31  ;;  %v5675_v30 = vpop.f32.mrb[46].mxu1  ;;  %v5654_v15 = vpop.f32.mrb[47].mxu0 }
 0x4b0   :  { %v5676_v57 = vpop.f32.mrb[47].mxu1  ;;  %v4861_v19 = vadd.f32 %v5652_v14, %v4821_v8 }
 0x4b2   :  { %v4901_v27 = vadd.f32 %v5674_v23, %v4861_v19 }
 0x4b4   :  { %4906 = vst [vmem:[%s6310_s5] sm:$0xff] %v4901_v27 }
 0x4b5   :  { %4911 = vsyncpa [#allocation5], 1 }
 0x4b6   :  { %4912 = vsyncpa [#allocation7], 1 }
 0x4b7   :  { %4913 = vsyncpa [#allocation10], 1 }
 0x4b8   :  { %4914 = vsyncmov [#allocation3] }
 0x4bb   :  { %s4915_s27 = vpop.sfrf %4914 }
 0x4bc   :  { %p5413_p12 = scmp.ne.s32.totalorder %s4915_s27, 0 }
 0x4be   :  { %4919 = shalt.err (%p5413_p12)  }

</bundles_post_ra>
